<compile_context>
chip_gen: v7x
topology: tpu7x:2x2x1
jax: 0.10.0
libtpu: 0.0.40
codegen_flags: <defaults>
</compile_context>

<pallas_src>
import jax
import jax.numpy as jnp
from jax.experimental import pallas as pl
from jax.experimental.pallas import tpu as pltpu


def _gru_kernel(x_ref,       # (T*Bp, 1)     time-major rows, batch zero-padded to Bp=8
                w_ih0_ref,   # (1, 3G)       layer-0 input weights, gate-padded
                w_ih_ref,    # (L-1, H, 3G)  layer 1..L-1 input weights, gate-padded
                w_hh_ref,    # (L, H, 3G)    hidden weights, gate-padded
                b_gx_ref,    # (L, 1, 3G)    b_ih with b_hh r/z columns folded in
                b_hn_ref,    # (L, 1, G)     b_hh n-gate columns, lane-padded
                fc_w_ref,    # (H, G)        fc weight, lane-padded
                fc_b_ref,    # (1, G)        fc bias, lane-padded
                out_ref):    # (Bp, G)       padded output (wrapper slices [:B, :O])
    Bp, G = out_ref.shape
    L, H, _ = w_hh_ref.shape
    T = x_ref.shape[0] // Bp

    def cell(gx, h_prev, layer):
        # gx: (Bp, 3G) input-path pre-activation (biases already folded in)
        # h_prev: (Bp, H).  All gate slices below are vreg-granular, lane offset 0.
        gh = jnp.dot(h_prev, w_hh_ref[layer],
                     preferred_element_type=jnp.float32)               # (Bp, 3G)
        pre_r = gx[:, 0:H] + gh[:, 0:H]
        pre_z = gx[:, G:G + H] + gh[:, G:G + H]
        # sigmoid via a single EUP op: sigmoid(x) = 0.5*tanh(0.5*x) + 0.5
        r = 0.5 * jnp.tanh(0.5 * pre_r) + 0.5
        z = 0.5 * jnp.tanh(0.5 * pre_z) + 0.5
        # n-gate bias applied straight after the matmul -> overlaps r's tanh
        ghn = gh[:, 2 * G:2 * G + H] + b_hn_ref[layer][:, 0:H]
        n = jnp.tanh(gx[:, 2 * G:2 * G + H] + r * ghn)
        return n + z * (h_prev - n)                                    # == (1-z)*n + z*h

    # Per-layer hidden states (h0 == 0), carried as values — no scratch ref.
    h = [jnp.zeros((Bp, H), jnp.float32) for _ in range(L)]

    # Wavefront over (layer, time): all cells with layer + t == wave are independent,
    # so the data-dependence depth is L+T-1 waves instead of L*T cells.
    for wave in range(L + T - 1):
        lo = max(0, wave - T + 1)
        hi = min(L, wave + 1)
        new_h = {}
        for layer in range(lo, hi):
            t = wave - layer
            if layer == 0:
                # input_size == 1: outer-product broadcast, no MXU push (off-chain)
                xv = x_ref[t * Bp:(t + 1) * Bp, :]                     # (Bp, 1)
                gx = xv * w_ih0_ref[...] + b_gx_ref[0]                 # (Bp, 3G)
            else:
                gx = jnp.dot(h[layer - 1], w_ih_ref[layer - 1],
                             preferred_element_type=jnp.float32) + b_gx_ref[layer]
            new_h[layer] = cell(gx, h[layer], layer)
        for layer in range(lo, hi):        # commit after the wave (read old, then write)
            h[layer] = new_h[layer]

    # fc on the last timestep of the top layer; full-lane (unmasked) store.
    out_ref[...] = (jnp.dot(h[L - 1], fc_w_ref[...],
                            preferred_element_type=jnp.float32) + fc_b_ref[...])


def _pad_gate_groups(w, H, G):
    """(..., 3H) -> (..., 3G): each gate's H columns at the start of its own G-lane group."""
    pads = [(0, 0)] * (w.ndim - 1) + [(0, G - H)]
    return jnp.concatenate(
        [jnp.pad(w[..., g * H:(g + 1) * H], pads) for g in range(3)], axis=-1)


def gru_model_forward(x, params):
    """x: (B, T, I) float32 -> (B, O) float32 (matches GRUModel.forward)."""
    w_ih0, w_ih_rest, w_hh, b_ih, b_hh, fc_w, fc_b = params
    B, T, I = x.shape
    L, H, H3 = w_hh.shape
    O = fc_w.shape[1]
    G = 128                                   # one full lane group per gate
    Bp = ((B + 7) // 8) * 8                   # sublane-aligned batch
    assert H <= G and O <= G and H3 == 3 * H

    # ---- layout plumbing (all outside the kernel, trace time) ----
    # time-major rows, batch zero-padded to a sublane boundary: row = t*Bp + b
    x_tm = jnp.transpose(x, (1, 0, 2))                                 # (T, B, I)
    x_tm = jnp.pad(x_tm, ((0, 0), (0, Bp - B), (0, 0)))                # (T, Bp, I)
    x2d = x_tm.reshape(T * Bp, I)

    # gate-padded weights: each gate in its own 128-lane group (zero pad lanes)
    w_ih0_p = _pad_gate_groups(w_ih0, H, G)                            # (I, 3G)
    w_ih_p = _pad_gate_groups(w_ih_rest, H, G)                         # (L-1, H, 3G)
    w_hh_p = _pad_gate_groups(w_hh, H, G)                              # (L, H, 3G)

    # trace-time bias folding: b_ih fully absorbed into the gx path; b_hh's r/z columns
    # folded in too; only the n-gate b_hh stays separate (needed inside r * (...)).
    b_gx = b_ih.at[:, :2 * H].add(b_hh[:, :2 * H])                     # (L, 3H)
    b_gx_p = _pad_gate_groups(b_gx, H, G)[:, None, :]                  # (L, 1, 3G)
    b_hn_p = jnp.pad(b_hh[:, 2 * H:], ((0, 0), (0, G - H)))[:, None, :]  # (L, 1, G)

    fc_w_p = jnp.pad(fc_w, ((0, 0), (0, G - O)))                       # (H, G)
    fc_b_p = jnp.pad(fc_b, ((0, 0), (0, G - O)))                       # (1, G)

    vmem = pl.BlockSpec(memory_space=pltpu.MemorySpace.VMEM)
    out_p = pl.pallas_call(
        _gru_kernel,
        out_shape=jax.ShapeDtypeStruct((Bp, G), jnp.float32),
        in_specs=[vmem] * 8,
        out_specs=vmem,
    )(x2d, w_ih0_p, w_ih_p, w_hh_p, b_gx_p, b_hn_p, fc_w_p, fc_b_p)
    return out_p[:B, :O]


def init_params(key, input_size=1, hidden_size=32, num_layers=4, output_size=1):
    """Deterministic synthetic parameters (PyTorch-style uniform(-1/sqrt(H), 1/sqrt(H)))."""
    H, L = hidden_size, num_layers
    bound = 1.0 / (H ** 0.5)
    ks = jax.random.split(key, 8)
    u = lambda k, shape: jax.random.uniform(k, shape, jnp.float32, -bound, bound)
    w_ih0 = u(ks[0], (input_size, 3 * H))          # layer 0 input weights (transposed)
    w_ih_rest = u(ks[1], (L - 1, H, 3 * H))        # layers 1..L-1
    w_hh = u(ks[2], (L, H, 3 * H))
    b_ih = u(ks[3], (L, 3 * H))
    b_hh = u(ks[4], (L, 3 * H))
    fc_w = u(ks[5], (H, output_size))
    fc_b = u(ks[6], (1, output_size))
    return (w_ih0, w_ih_rest, w_hh, b_ih, b_hh, fc_w, fc_b)


def gru_model_reference(x, params):
    """Pure-JAX reference of the same math (PyTorch GRU convention), for sanity check."""
    w_ih0, w_ih_rest, w_hh, b_ih, b_hh, fc_w, fc_b = params
    B, T, _ = x.shape
    L, H, _ = w_hh.shape
    seq = x
    for layer in range(L):
        w_ih = w_ih0 if layer == 0 else w_ih_rest[layer - 1]
        h = jnp.zeros((B, H), jnp.float32)
        outs = []
        for t in range(T):
            gx = seq[:, t, :] @ w_ih + b_ih[layer]
            gh = h @ w_hh[layer] + b_hh[layer]
            r = jax.nn.sigmoid(gx[:, :H] + gh[:, :H])
            z = jax.nn.sigmoid(gx[:, H:2 * H] + gh[:, H:2 * H])
            n = jnp.tanh(gx[:, 2 * H:] + r * gh[:, 2 * H:])
            h = (1.0 - z) * n + z * h
            outs.append(h)
        seq = jnp.stack(outs, axis=1)
    return seq[:, -1, :] @ fc_w + fc_b


if __name__ == "__main__":
    key = jax.random.PRNGKey(0)
    k_x, k_p = jax.random.split(key)

    B, T, I = 2, 8, 1          # batch, seq, input_size (matches GRUModel defaults)
    H, L, O = 32, 4, 1

    x = jax.random.normal(k_x, (B, T, I), dtype=jnp.float32)
    params = init_params(k_p, input_size=I, hidden_size=H, num_layers=L, output_size=O)

    fwd = jax.jit(gru_model_forward)
    out = jax.block_until_ready(fwd(x, params))
    ref = jax.block_until_ready(gru_model_reference(x, params))

    assert out.shape == (B, O), out.shape
    assert jnp.allclose(out, ref, rtol=1e-4, atol=1e-4), (out, ref)
    print("KERNEL_OK")
</pallas_src>

<mosaic_0001>
module attributes {stable_mosaic.version = 11 : i64} {
  func.func @_gru_kernel(%arg0: memref<64x1xf32, #tpu.memory_space<vmem>>, %arg1: memref<1x384xf32, #tpu.memory_space<vmem>>, %arg2: memref<3x32x384xf32, #tpu.memory_space<vmem>>, %arg3: memref<4x32x384xf32, #tpu.memory_space<vmem>>, %arg4: memref<4x1x384xf32, #tpu.memory_space<vmem>>, %arg5: memref<4x1x128xf32, #tpu.memory_space<vmem>>, %arg6: memref<32x128xf32, #tpu.memory_space<vmem>>, %arg7: memref<1x128xf32, #tpu.memory_space<vmem>>, %arg8: memref<8x128xf32, #tpu.memory_space<vmem>>) attributes {dimension_semantics = [], scalar_prefetch = 0 : i64, scratch_operands = 0 : i64, tpu.core_type = #tpu.core_type<tc>} {
    %cst = arith.constant 0.000000e+00 : f32
    %0 = vector.broadcast %cst : f32 to vector<8x32xf32>
    %cst_0 = arith.constant 0.000000e+00 : f32
    %1 = vector.broadcast %cst_0 : f32 to vector<8x32xf32>
    %cst_1 = arith.constant 0.000000e+00 : f32
    %2 = vector.broadcast %cst_1 : f32 to vector<8x32xf32>
    %cst_2 = arith.constant 0.000000e+00 : f32
    %3 = vector.broadcast %cst_2 : f32 to vector<8x32xf32>
    %c0 = arith.constant 0 : index
    %c0_3 = arith.constant 0 : index
    %4 = vector.load %arg0[%c0, %c0_3] : memref<64x1xf32, #tpu.memory_space<vmem>>, vector<8x1xf32>
    %c0_4 = arith.constant 0 : index
    %c0_5 = arith.constant 0 : index
    %5 = vector.load %arg1[%c0_4, %c0_5] : memref<1x384xf32, #tpu.memory_space<vmem>>, vector<1x384xf32>
    %6 = vector.broadcast %4 : vector<8x1xf32> to vector<8x384xf32>
    %7 = vector.broadcast %5 : vector<1x384xf32> to vector<8x384xf32>
    %8 = arith.mulf %6, %7 : vector<8x384xf32>
    %c0_6 = arith.constant 0 : index
    %c0_7 = arith.constant 0 : index
    %c0_8 = arith.constant 0 : index
    %9 = vector.load %arg4[%c0_6, %c0_7, %c0_8] : memref<4x1x384xf32, #tpu.memory_space<vmem>>, vector<1x1x384xf32>
    %10 = vector.shape_cast %9 : vector<1x1x384xf32> to vector<1x384xf32>
    %11 = vector.broadcast %10 : vector<1x384xf32> to vector<8x384xf32>
    %12 = arith.addf %8, %11 : vector<8x384xf32>
    %c0_9 = arith.constant 0 : index
    %c0_10 = arith.constant 0 : index
    %c0_11 = arith.constant 0 : index
    %13 = vector.load %arg3[%c0_9, %c0_10, %c0_11] : memref<4x32x384xf32, #tpu.memory_space<vmem>>, vector<1x32x384xf32>
    %14 = vector.shape_cast %13 : vector<1x32x384xf32> to vector<32x384xf32>
    %cst_12 = arith.constant dense<0.000000e+00> : vector<8x384xf32>
    %15 = tpu.matmul %0, %14, %cst_12 {dimension_numbers = #tpu.dot_dimension_numbers<[1], [0], [0], [1], [0, 0, 1, 1], [], []>} : vector<8x32xf32>, vector<32x384xf32>, vector<8x384xf32> -> vector<8x384xf32>
    %16 = vector.extract_strided_slice %12 {offsets = [0, 0], sizes = [8, 32], strides = [1, 1]} : vector<8x384xf32> to vector<8x32xf32>
    %17 = vector.extract_strided_slice %15 {offsets = [0, 0], sizes = [8, 32], strides = [1, 1]} : vector<8x384xf32> to vector<8x32xf32>
    %18 = arith.addf %16, %17 : vector<8x32xf32>
    %19 = vector.extract_strided_slice %12 {offsets = [0, 128], sizes = [8, 32], strides = [1, 1]} : vector<8x384xf32> to vector<8x32xf32>
    %20 = vector.extract_strided_slice %15 {offsets = [0, 128], sizes = [8, 32], strides = [1, 1]} : vector<8x384xf32> to vector<8x32xf32>
    %21 = arith.addf %19, %20 : vector<8x32xf32>
    %cst_13 = arith.constant 5.000000e-01 : f32
    %22 = vector.broadcast %cst_13 : f32 to vector<8x32xf32>
    %23 = arith.mulf %22, %18 : vector<8x32xf32>
    %24 = math.tanh %23 : vector<8x32xf32>
    %cst_14 = arith.constant 5.000000e-01 : f32
    %25 = vector.broadcast %cst_14 : f32 to vector<8x32xf32>
    %26 = arith.mulf %25, %24 : vector<8x32xf32>
    %cst_15 = arith.constant 5.000000e-01 : f32
    %27 = vector.broadcast %cst_15 : f32 to vector<8x32xf32>
    %28 = arith.addf %26, %27 : vector<8x32xf32>
    %cst_16 = arith.constant 5.000000e-01 : f32
    %29 = vector.broadcast %cst_16 : f32 to vector<8x32xf32>
    %30 = arith.mulf %29, %21 : vector<8x32xf32>
    %31 = math.tanh %30 : vector<8x32xf32>
    %cst_17 = arith.constant 5.000000e-01 : f32
    %32 = vector.broadcast %cst_17 : f32 to vector<8x32xf32>
    %33 = arith.mulf %32, %31 : vector<8x32xf32>
    %cst_18 = arith.constant 5.000000e-01 : f32
    %34 = vector.broadcast %cst_18 : f32 to vector<8x32xf32>
    %35 = arith.addf %33, %34 : vector<8x32xf32>
    %36 = vector.extract_strided_slice %15 {offsets = [0, 256], sizes = [8, 32], strides = [1, 1]} : vector<8x384xf32> to vector<8x32xf32>
    %c0_19 = arith.constant 0 : index
    %c0_20 = arith.constant 0 : index
    %c0_21 = arith.constant 0 : index
    %37 = vector.load %arg5[%c0_19, %c0_20, %c0_21] : memref<4x1x128xf32, #tpu.memory_space<vmem>>, vector<1x1x128xf32>
    %38 = vector.shape_cast %37 : vector<1x1x128xf32> to vector<1x128xf32>
    %39 = vector.extract_strided_slice %38 {offsets = [0, 0], sizes = [1, 32], strides = [1, 1]} : vector<1x128xf32> to vector<1x32xf32>
    %40 = vector.broadcast %39 : vector<1x32xf32> to vector<8x32xf32>
    %41 = arith.addf %36, %40 : vector<8x32xf32>
    %42 = vector.extract_strided_slice %12 {offsets = [0, 256], sizes = [8, 32], strides = [1, 1]} : vector<8x384xf32> to vector<8x32xf32>
    %43 = arith.mulf %28, %41 : vector<8x32xf32>
    %44 = arith.addf %42, %43 : vector<8x32xf32>
    %45 = math.tanh %44 : vector<8x32xf32>
    %46 = arith.subf %0, %45 : vector<8x32xf32>
    %47 = arith.mulf %35, %46 : vector<8x32xf32>
    %48 = arith.addf %45, %47 : vector<8x32xf32>
    %c8 = arith.constant 8 : index
    %c0_22 = arith.constant 0 : index
    %49 = vector.load %arg0[%c8, %c0_22] : memref<64x1xf32, #tpu.memory_space<vmem>>, vector<8x1xf32>
    %c0_23 = arith.constant 0 : index
    %c0_24 = arith.constant 0 : index
    %50 = vector.load %arg1[%c0_23, %c0_24] : memref<1x384xf32, #tpu.memory_space<vmem>>, vector<1x384xf32>
    %51 = vector.broadcast %49 : vector<8x1xf32> to vector<8x384xf32>
    %52 = vector.broadcast %50 : vector<1x384xf32> to vector<8x384xf32>
    %53 = arith.mulf %51, %52 : vector<8x384xf32>
    %c0_25 = arith.constant 0 : index
    %c0_26 = arith.constant 0 : index
    %c0_27 = arith.constant 0 : index
    %54 = vector.load %arg4[%c0_25, %c0_26, %c0_27] : memref<4x1x384xf32, #tpu.memory_space<vmem>>, vector<1x1x384xf32>
    %55 = vector.shape_cast %54 : vector<1x1x384xf32> to vector<1x384xf32>
    %56 = vector.broadcast %55 : vector<1x384xf32> to vector<8x384xf32>
    %57 = arith.addf %53, %56 : vector<8x384xf32>
    %c0_28 = arith.constant 0 : index
    %c0_29 = arith.constant 0 : index
    %c0_30 = arith.constant 0 : index
    %58 = vector.load %arg3[%c0_28, %c0_29, %c0_30] : memref<4x32x384xf32, #tpu.memory_space<vmem>>, vector<1x32x384xf32>
    %59 = vector.shape_cast %58 : vector<1x32x384xf32> to vector<32x384xf32>
    %cst_31 = arith.constant dense<0.000000e+00> : vector<8x384xf32>
    %60 = tpu.matmul %48, %59, %cst_31 {dimension_numbers = #tpu.dot_dimension_numbers<[1], [0], [0], [1], [0, 0, 1, 1], [], []>} : vector<8x32xf32>, vector<32x384xf32>, vector<8x384xf32> -> vector<8x384xf32>
    %61 = vector.extract_strided_slice %57 {offsets = [0, 0], sizes = [8, 32], strides = [1, 1]} : vector<8x384xf32> to vector<8x32xf32>
    %62 = vector.extract_strided_slice %60 {offsets = [0, 0], sizes = [8, 32], strides = [1, 1]} : vector<8x384xf32> to vector<8x32xf32>
    %63 = arith.addf %61, %62 : vector<8x32xf32>
    %64 = vector.extract_strided_slice %57 {offsets = [0, 128], sizes = [8, 32], strides = [1, 1]} : vector<8x384xf32> to vector<8x32xf32>
    %65 = vector.extract_strided_slice %60 {offsets = [0, 128], sizes = [8, 32], strides = [1, 1]} : vector<8x384xf32> to vector<8x32xf32>
    %66 = arith.addf %64, %65 : vector<8x32xf32>
    %cst_32 = arith.constant 5.000000e-01 : f32
    %67 = vector.broadcast %cst_32 : f32 to vector<8x32xf32>
    %68 = arith.mulf %67, %63 : vector<8x32xf32>
    %69 = math.tanh %68 : vector<8x32xf32>
    %cst_33 = arith.constant 5.000000e-01 : f32
    %70 = vector.broadcast %cst_33 : f32 to vector<8x32xf32>
    %71 = arith.mulf %70, %69 : vector<8x32xf32>
    %cst_34 = arith.constant 5.000000e-01 : f32
    %72 = vector.broadcast %cst_34 : f32 to vector<8x32xf32>
    %73 = arith.addf %71, %72 : vector<8x32xf32>
    %cst_35 = arith.constant 5.000000e-01 : f32
    %74 = vector.broadcast %cst_35 : f32 to vector<8x32xf32>
    %75 = arith.mulf %74, %66 : vector<8x32xf32>
    %76 = math.tanh %75 : vector<8x32xf32>
    %cst_36 = arith.constant 5.000000e-01 : f32
    %77 = vector.broadcast %cst_36 : f32 to vector<8x32xf32>
    %78 = arith.mulf %77, %76 : vector<8x32xf32>
    %cst_37 = arith.constant 5.000000e-01 : f32
    %79 = vector.broadcast %cst_37 : f32 to vector<8x32xf32>
    %80 = arith.addf %78, %79 : vector<8x32xf32>
    %81 = vector.extract_strided_slice %60 {offsets = [0, 256], sizes = [8, 32], strides = [1, 1]} : vector<8x384xf32> to vector<8x32xf32>
    %c0_38 = arith.constant 0 : index
    %c0_39 = arith.constant 0 : index
    %c0_40 = arith.constant 0 : index
    %82 = vector.load %arg5[%c0_38, %c0_39, %c0_40] : memref<4x1x128xf32, #tpu.memory_space<vmem>>, vector<1x1x128xf32>
    %83 = vector.shape_cast %82 : vector<1x1x128xf32> to vector<1x128xf32>
    %84 = vector.extract_strided_slice %83 {offsets = [0, 0], sizes = [1, 32], strides = [1, 1]} : vector<1x128xf32> to vector<1x32xf32>
    %85 = vector.broadcast %84 : vector<1x32xf32> to vector<8x32xf32>
    %86 = arith.addf %81, %85 : vector<8x32xf32>
    %87 = vector.extract_strided_slice %57 {offsets = [0, 256], sizes = [8, 32], strides = [1, 1]} : vector<8x384xf32> to vector<8x32xf32>
    %88 = arith.mulf %73, %86 : vector<8x32xf32>
    %89 = arith.addf %87, %88 : vector<8x32xf32>
    %90 = math.tanh %89 : vector<8x32xf32>
    %91 = arith.subf %48, %90 : vector<8x32xf32>
    %92 = arith.mulf %80, %91 : vector<8x32xf32>
    %93 = arith.addf %90, %92 : vector<8x32xf32>
    %c0_41 = arith.constant 0 : index
    %c0_42 = arith.constant 0 : index
    %c0_43 = arith.constant 0 : index
    %94 = vector.load %arg2[%c0_41, %c0_42, %c0_43] : memref<3x32x384xf32, #tpu.memory_space<vmem>>, vector<1x32x384xf32>
    %95 = vector.shape_cast %94 : vector<1x32x384xf32> to vector<32x384xf32>
    %cst_44 = arith.constant dense<0.000000e+00> : vector<8x384xf32>
    %96 = tpu.matmul %48, %95, %cst_44 {dimension_numbers = #tpu.dot_dimension_numbers<[1], [0], [0], [1], [0, 0, 1, 1], [], []>} : vector<8x32xf32>, vector<32x384xf32>, vector<8x384xf32> -> vector<8x384xf32>
    %c1 = arith.constant 1 : index
    %c0_45 = arith.constant 0 : index
    %c0_46 = arith.constant 0 : index
    %97 = vector.load %arg4[%c1, %c0_45, %c0_46] : memref<4x1x384xf32, #tpu.memory_space<vmem>>, vector<1x1x384xf32>
    %98 = vector.shape_cast %97 : vector<1x1x384xf32> to vector<1x384xf32>
    %99 = vector.broadcast %98 : vector<1x384xf32> to vector<8x384xf32>
    %100 = arith.addf %96, %99 : vector<8x384xf32>
    %c1_47 = arith.constant 1 : index
    %c0_48 = arith.constant 0 : index
    %c0_49 = arith.constant 0 : index
    %101 = vector.load %arg3[%c1_47, %c0_48, %c0_49] : memref<4x32x384xf32, #tpu.memory_space<vmem>>, vector<1x32x384xf32>
    %102 = vector.shape_cast %101 : vector<1x32x384xf32> to vector<32x384xf32>
    %cst_50 = arith.constant dense<0.000000e+00> : vector<8x384xf32>
    %103 = tpu.matmul %1, %102, %cst_50 {dimension_numbers = #tpu.dot_dimension_numbers<[1], [0], [0], [1], [0, 0, 1, 1], [], []>} : vector<8x32xf32>, vector<32x384xf32>, vector<8x384xf32> -> vector<8x384xf32>
    %104 = vector.extract_strided_slice %100 {offsets = [0, 0], sizes = [8, 32], strides = [1, 1]} : vector<8x384xf32> to vector<8x32xf32>
    %105 = vector.extract_strided_slice %103 {offsets = [0, 0], sizes = [8, 32], strides = [1, 1]} : vector<8x384xf32> to vector<8x32xf32>
    %106 = arith.addf %104, %105 : vector<8x32xf32>
    %107 = vector.extract_strided_slice %100 {offsets = [0, 128], sizes = [8, 32], strides = [1, 1]} : vector<8x384xf32> to vector<8x32xf32>
    %108 = vector.extract_strided_slice %103 {offsets = [0, 128], sizes = [8, 32], strides = [1, 1]} : vector<8x384xf32> to vector<8x32xf32>
    %109 = arith.addf %107, %108 : vector<8x32xf32>
    %cst_51 = arith.constant 5.000000e-01 : f32
    %110 = vector.broadcast %cst_51 : f32 to vector<8x32xf32>
    %111 = arith.mulf %110, %106 : vector<8x32xf32>
    %112 = math.tanh %111 : vector<8x32xf32>
    %cst_52 = arith.constant 5.000000e-01 : f32
    %113 = vector.broadcast %cst_52 : f32 to vector<8x32xf32>
    %114 = arith.mulf %113, %112 : vector<8x32xf32>
    %cst_53 = arith.constant 5.000000e-01 : f32
    %115 = vector.broadcast %cst_53 : f32 to vector<8x32xf32>
    %116 = arith.addf %114, %115 : vector<8x32xf32>
    %cst_54 = arith.constant 5.000000e-01 : f32
    %117 = vector.broadcast %cst_54 : f32 to vector<8x32xf32>
    %118 = arith.mulf %117, %109 : vector<8x32xf32>
    %119 = math.tanh %118 : vector<8x32xf32>
    %cst_55 = arith.constant 5.000000e-01 : f32
    %120 = vector.broadcast %cst_55 : f32 to vector<8x32xf32>
    %121 = arith.mulf %120, %119 : vector<8x32xf32>
    %cst_56 = arith.constant 5.000000e-01 : f32
    %122 = vector.broadcast %cst_56 : f32 to vector<8x32xf32>
    %123 = arith.addf %121, %122 : vector<8x32xf32>
    %124 = vector.extract_strided_slice %103 {offsets = [0, 256], sizes = [8, 32], strides = [1, 1]} : vector<8x384xf32> to vector<8x32xf32>
    %c1_57 = arith.constant 1 : index
    %c0_58 = arith.constant 0 : index
    %c0_59 = arith.constant 0 : index
    %125 = vector.load %arg5[%c1_57, %c0_58, %c0_59] : memref<4x1x128xf32, #tpu.memory_space<vmem>>, vector<1x1x128xf32>
    %126 = vector.shape_cast %125 : vector<1x1x128xf32> to vector<1x128xf32>
    %127 = vector.extract_strided_slice %126 {offsets = [0, 0], sizes = [1, 32], strides = [1, 1]} : vector<1x128xf32> to vector<1x32xf32>
    %128 = vector.broadcast %127 : vector<1x32xf32> to vector<8x32xf32>
    %129 = arith.addf %124, %128 : vector<8x32xf32>
    %130 = vector.extract_strided_slice %100 {offsets = [0, 256], sizes = [8, 32], strides = [1, 1]} : vector<8x384xf32> to vector<8x32xf32>
    %131 = arith.mulf %116, %129 : vector<8x32xf32>
    %132 = arith.addf %130, %131 : vector<8x32xf32>
    %133 = math.tanh %132 : vector<8x32xf32>
    %134 = arith.subf %1, %133 : vector<8x32xf32>
    %135 = arith.mulf %123, %134 : vector<8x32xf32>
    %136 = arith.addf %133, %135 : vector<8x32xf32>
    %c16 = arith.constant 16 : index
    %c0_60 = arith.constant 0 : index
    %137 = vector.load %arg0[%c16, %c0_60] : memref<64x1xf32, #tpu.memory_space<vmem>>, vector<8x1xf32>
    %c0_61 = arith.constant 0 : index
    %c0_62 = arith.constant 0 : index
    %138 = vector.load %arg1[%c0_61, %c0_62] : memref<1x384xf32, #tpu.memory_space<vmem>>, vector<1x384xf32>
    %139 = vector.broadcast %137 : vector<8x1xf32> to vector<8x384xf32>
    %140 = vector.broadcast %138 : vector<1x384xf32> to vector<8x384xf32>
    %141 = arith.mulf %139, %140 : vector<8x384xf32>
    %c0_63 = arith.constant 0 : index
    %c0_64 = arith.constant 0 : index
    %c0_65 = arith.constant 0 : index
    %142 = vector.load %arg4[%c0_63, %c0_64, %c0_65] : memref<4x1x384xf32, #tpu.memory_space<vmem>>, vector<1x1x384xf32>
    %143 = vector.shape_cast %142 : vector<1x1x384xf32> to vector<1x384xf32>
    %144 = vector.broadcast %143 : vector<1x384xf32> to vector<8x384xf32>
    %145 = arith.addf %141, %144 : vector<8x384xf32>
    %c0_66 = arith.constant 0 : index
    %c0_67 = arith.constant 0 : index
    %c0_68 = arith.constant 0 : index
    %146 = vector.load %arg3[%c0_66, %c0_67, %c0_68] : memref<4x32x384xf32, #tpu.memory_space<vmem>>, vector<1x32x384xf32>
    %147 = vector.shape_cast %146 : vector<1x32x384xf32> to vector<32x384xf32>
    %cst_69 = arith.constant dense<0.000000e+00> : vector<8x384xf32>
    %148 = tpu.matmul %93, %147, %cst_69 {dimension_numbers = #tpu.dot_dimension_numbers<[1], [0], [0], [1], [0, 0, 1, 1], [], []>} : vector<8x32xf32>, vector<32x384xf32>, vector<8x384xf32> -> vector<8x384xf32>
    %149 = vector.extract_strided_slice %145 {offsets = [0, 0], sizes = [8, 32], strides = [1, 1]} : vector<8x384xf32> to vector<8x32xf32>
    %150 = vector.extract_strided_slice %148 {offsets = [0, 0], sizes = [8, 32], strides = [1, 1]} : vector<8x384xf32> to vector<8x32xf32>
    %151 = arith.addf %149, %150 : vector<8x32xf32>
    %152 = vector.extract_strided_slice %145 {offsets = [0, 128], sizes = [8, 32], strides = [1, 1]} : vector<8x384xf32> to vector<8x32xf32>
    %153 = vector.extract_strided_slice %148 {offsets = [0, 128], sizes = [8, 32], strides = [1, 1]} : vector<8x384xf32> to vector<8x32xf32>
    %154 = arith.addf %152, %153 : vector<8x32xf32>
    %cst_70 = arith.constant 5.000000e-01 : f32
    %155 = vector.broadcast %cst_70 : f32 to vector<8x32xf32>
    %156 = arith.mulf %155, %151 : vector<8x32xf32>
    %157 = math.tanh %156 : vector<8x32xf32>
    %cst_71 = arith.constant 5.000000e-01 : f32
    %158 = vector.broadcast %cst_71 : f32 to vector<8x32xf32>
    %159 = arith.mulf %158, %157 : vector<8x32xf32>
    %cst_72 = arith.constant 5.000000e-01 : f32
    %160 = vector.broadcast %cst_72 : f32 to vector<8x32xf32>
    %161 = arith.addf %159, %160 : vector<8x32xf32>
    %cst_73 = arith.constant 5.000000e-01 : f32
    %162 = vector.broadcast %cst_73 : f32 to vector<8x32xf32>
    %163 = arith.mulf %162, %154 : vector<8x32xf32>
    %164 = math.tanh %163 : vector<8x32xf32>
    %cst_74 = arith.constant 5.000000e-01 : f32
    %165 = vector.broadcast %cst_74 : f32 to vector<8x32xf32>
    %166 = arith.mulf %165, %164 : vector<8x32xf32>
    %cst_75 = arith.constant 5.000000e-01 : f32
    %167 = vector.broadcast %cst_75 : f32 to vector<8x32xf32>
    %168 = arith.addf %166, %167 : vector<8x32xf32>
    %169 = vector.extract_strided_slice %148 {offsets = [0, 256], sizes = [8, 32], strides = [1, 1]} : vector<8x384xf32> to vector<8x32xf32>
    %c0_76 = arith.constant 0 : index
    %c0_77 = arith.constant 0 : index
    %c0_78 = arith.constant 0 : index
    %170 = vector.load %arg5[%c0_76, %c0_77, %c0_78] : memref<4x1x128xf32, #tpu.memory_space<vmem>>, vector<1x1x128xf32>
    %171 = vector.shape_cast %170 : vector<1x1x128xf32> to vector<1x128xf32>
    %172 = vector.extract_strided_slice %171 {offsets = [0, 0], sizes = [1, 32], strides = [1, 1]} : vector<1x128xf32> to vector<1x32xf32>
    %173 = vector.broadcast %172 : vector<1x32xf32> to vector<8x32xf32>
    %174 = arith.addf %169, %173 : vector<8x32xf32>
    %175 = vector.extract_strided_slice %145 {offsets = [0, 256], sizes = [8, 32], strides = [1, 1]} : vector<8x384xf32> to vector<8x32xf32>
    %176 = arith.mulf %161, %174 : vector<8x32xf32>
    %177 = arith.addf %175, %176 : vector<8x32xf32>
    %178 = math.tanh %177 : vector<8x32xf32>
    %179 = arith.subf %93, %178 : vector<8x32xf32>
    %180 = arith.mulf %168, %179 : vector<8x32xf32>
    %181 = arith.addf %178, %180 : vector<8x32xf32>
    %c0_79 = arith.constant 0 : index
    %c0_80 = arith.constant 0 : index
    %c0_81 = arith.constant 0 : index
    %182 = vector.load %arg2[%c0_79, %c0_80, %c0_81] : memref<3x32x384xf32, #tpu.memory_space<vmem>>, vector<1x32x384xf32>
    %183 = vector.shape_cast %182 : vector<1x32x384xf32> to vector<32x384xf32>
    %cst_82 = arith.constant dense<0.000000e+00> : vector<8x384xf32>
    %184 = tpu.matmul %93, %183, %cst_82 {dimension_numbers = #tpu.dot_dimension_numbers<[1], [0], [0], [1], [0, 0, 1, 1], [], []>} : vector<8x32xf32>, vector<32x384xf32>, vector<8x384xf32> -> vector<8x384xf32>
    %c1_83 = arith.constant 1 : index
    %c0_84 = arith.constant 0 : index
    %c0_85 = arith.constant 0 : index
    %185 = vector.load %arg4[%c1_83, %c0_84, %c0_85] : memref<4x1x384xf32, #tpu.memory_space<vmem>>, vector<1x1x384xf32>
    %186 = vector.shape_cast %185 : vector<1x1x384xf32> to vector<1x384xf32>
    %187 = vector.broadcast %186 : vector<1x384xf32> to vector<8x384xf32>
    %188 = arith.addf %184, %187 : vector<8x384xf32>
    %c1_86 = arith.constant 1 : index
    %c0_87 = arith.constant 0 : index
    %c0_88 = arith.constant 0 : index
    %189 = vector.load %arg3[%c1_86, %c0_87, %c0_88] : memref<4x32x384xf32, #tpu.memory_space<vmem>>, vector<1x32x384xf32>
    %190 = vector.shape_cast %189 : vector<1x32x384xf32> to vector<32x384xf32>
    %cst_89 = arith.constant dense<0.000000e+00> : vector<8x384xf32>
    %191 = tpu.matmul %136, %190, %cst_89 {dimension_numbers = #tpu.dot_dimension_numbers<[1], [0], [0], [1], [0, 0, 1, 1], [], []>} : vector<8x32xf32>, vector<32x384xf32>, vector<8x384xf32> -> vector<8x384xf32>
    %192 = vector.extract_strided_slice %188 {offsets = [0, 0], sizes = [8, 32], strides = [1, 1]} : vector<8x384xf32> to vector<8x32xf32>
    %193 = vector.extract_strided_slice %191 {offsets = [0, 0], sizes = [8, 32], strides = [1, 1]} : vector<8x384xf32> to vector<8x32xf32>
    %194 = arith.addf %192, %193 : vector<8x32xf32>
    %195 = vector.extract_strided_slice %188 {offsets = [0, 128], sizes = [8, 32], strides = [1, 1]} : vector<8x384xf32> to vector<8x32xf32>
    %196 = vector.extract_strided_slice %191 {offsets = [0, 128], sizes = [8, 32], strides = [1, 1]} : vector<8x384xf32> to vector<8x32xf32>
    %197 = arith.addf %195, %196 : vector<8x32xf32>
    %cst_90 = arith.constant 5.000000e-01 : f32
    %198 = vector.broadcast %cst_90 : f32 to vector<8x32xf32>
    %199 = arith.mulf %198, %194 : vector<8x32xf32>
    %200 = math.tanh %199 : vector<8x32xf32>
    %cst_91 = arith.constant 5.000000e-01 : f32
    %201 = vector.broadcast %cst_91 : f32 to vector<8x32xf32>
    %202 = arith.mulf %201, %200 : vector<8x32xf32>
    %cst_92 = arith.constant 5.000000e-01 : f32
    %203 = vector.broadcast %cst_92 : f32 to vector<8x32xf32>
    %204 = arith.addf %202, %203 : vector<8x32xf32>
    %cst_93 = arith.constant 5.000000e-01 : f32
    %205 = vector.broadcast %cst_93 : f32 to vector<8x32xf32>
    %206 = arith.mulf %205, %197 : vector<8x32xf32>
    %207 = math.tanh %206 : vector<8x32xf32>
    %cst_94 = arith.constant 5.000000e-01 : f32
    %208 = vector.broadcast %cst_94 : f32 to vector<8x32xf32>
    %209 = arith.mulf %208, %207 : vector<8x32xf32>
    %cst_95 = arith.constant 5.000000e-01 : f32
    %210 = vector.broadcast %cst_95 : f32 to vector<8x32xf32>
    %211 = arith.addf %209, %210 : vector<8x32xf32>
    %212 = vector.extract_strided_slice %191 {offsets = [0, 256], sizes = [8, 32], strides = [1, 1]} : vector<8x384xf32> to vector<8x32xf32>
    %c1_96 = arith.constant 1 : index
    %c0_97 = arith.constant 0 : index
    %c0_98 = arith.constant 0 : index
    %213 = vector.load %arg5[%c1_96, %c0_97, %c0_98] : memref<4x1x128xf32, #tpu.memory_space<vmem>>, vector<1x1x128xf32>
    %214 = vector.shape_cast %213 : vector<1x1x128xf32> to vector<1x128xf32>
    %215 = vector.extract_strided_slice %214 {offsets = [0, 0], sizes = [1, 32], strides = [1, 1]} : vector<1x128xf32> to vector<1x32xf32>
    %216 = vector.broadcast %215 : vector<1x32xf32> to vector<8x32xf32>
    %217 = arith.addf %212, %216 : vector<8x32xf32>
    %218 = vector.extract_strided_slice %188 {offsets = [0, 256], sizes = [8, 32], strides = [1, 1]} : vector<8x384xf32> to vector<8x32xf32>
    %219 = arith.mulf %204, %217 : vector<8x32xf32>
    %220 = arith.addf %218, %219 : vector<8x32xf32>
    %221 = math.tanh %220 : vector<8x32xf32>
    %222 = arith.subf %136, %221 : vector<8x32xf32>
    %223 = arith.mulf %211, %222 : vector<8x32xf32>
    %224 = arith.addf %221, %223 : vector<8x32xf32>
    %c1_99 = arith.constant 1 : index
    %c0_100 = arith.constant 0 : index
    %c0_101 = arith.constant 0 : index
    %225 = vector.load %arg2[%c1_99, %c0_100, %c0_101] : memref<3x32x384xf32, #tpu.memory_space<vmem>>, vector<1x32x384xf32>
    %226 = vector.shape_cast %225 : vector<1x32x384xf32> to vector<32x384xf32>
    %cst_102 = arith.constant dense<0.000000e+00> : vector<8x384xf32>
    %227 = tpu.matmul %136, %226, %cst_102 {dimension_numbers = #tpu.dot_dimension_numbers<[1], [0], [0], [1], [0, 0, 1, 1], [], []>} : vector<8x32xf32>, vector<32x384xf32>, vector<8x384xf32> -> vector<8x384xf32>
    %c2 = arith.constant 2 : index
    %c0_103 = arith.constant 0 : index
    %c0_104 = arith.constant 0 : index
    %228 = vector.load %arg4[%c2, %c0_103, %c0_104] : memref<4x1x384xf32, #tpu.memory_space<vmem>>, vector<1x1x384xf32>
    %229 = vector.shape_cast %228 : vector<1x1x384xf32> to vector<1x384xf32>
    %230 = vector.broadcast %229 : vector<1x384xf32> to vector<8x384xf32>
    %231 = arith.addf %227, %230 : vector<8x384xf32>
    %c2_105 = arith.constant 2 : index
    %c0_106 = arith.constant 0 : index
    %c0_107 = arith.constant 0 : index
    %232 = vector.load %arg3[%c2_105, %c0_106, %c0_107] : memref<4x32x384xf32, #tpu.memory_space<vmem>>, vector<1x32x384xf32>
    %233 = vector.shape_cast %232 : vector<1x32x384xf32> to vector<32x384xf32>
    %cst_108 = arith.constant dense<0.000000e+00> : vector<8x384xf32>
    %234 = tpu.matmul %2, %233, %cst_108 {dimension_numbers = #tpu.dot_dimension_numbers<[1], [0], [0], [1], [0, 0, 1, 1], [], []>} : vector<8x32xf32>, vector<32x384xf32>, vector<8x384xf32> -> vector<8x384xf32>
    %235 = vector.extract_strided_slice %231 {offsets = [0, 0], sizes = [8, 32], strides = [1, 1]} : vector<8x384xf32> to vector<8x32xf32>
    %236 = vector.extract_strided_slice %234 {offsets = [0, 0], sizes = [8, 32], strides = [1, 1]} : vector<8x384xf32> to vector<8x32xf32>
    %237 = arith.addf %235, %236 : vector<8x32xf32>
    %238 = vector.extract_strided_slice %231 {offsets = [0, 128], sizes = [8, 32], strides = [1, 1]} : vector<8x384xf32> to vector<8x32xf32>
    %239 = vector.extract_strided_slice %234 {offsets = [0, 128], sizes = [8, 32], strides = [1, 1]} : vector<8x384xf32> to vector<8x32xf32>
    %240 = arith.addf %238, %239 : vector<8x32xf32>
    %cst_109 = arith.constant 5.000000e-01 : f32
    %241 = vector.broadcast %cst_109 : f32 to vector<8x32xf32>
    %242 = arith.mulf %241, %237 : vector<8x32xf32>
    %243 = math.tanh %242 : vector<8x32xf32>
    %cst_110 = arith.constant 5.000000e-01 : f32
    %244 = vector.broadcast %cst_110 : f32 to vector<8x32xf32>
    %245 = arith.mulf %244, %243 : vector<8x32xf32>
    %cst_111 = arith.constant 5.000000e-01 : f32
    %246 = vector.broadcast %cst_111 : f32 to vector<8x32xf32>
    %247 = arith.addf %245, %246 : vector<8x32xf32>
    %cst_112 = arith.constant 5.000000e-01 : f32
    %248 = vector.broadcast %cst_112 : f32 to vector<8x32xf32>
    %249 = arith.mulf %248, %240 : vector<8x32xf32>
    %250 = math.tanh %249 : vector<8x32xf32>
    %cst_113 = arith.constant 5.000000e-01 : f32
    %251 = vector.broadcast %cst_113 : f32 to vector<8x32xf32>
    %252 = arith.mulf %251, %250 : vector<8x32xf32>
    %cst_114 = arith.constant 5.000000e-01 : f32
    %253 = vector.broadcast %cst_114 : f32 to vector<8x32xf32>
    %254 = arith.addf %252, %253 : vector<8x32xf32>
    %255 = vector.extract_strided_slice %234 {offsets = [0, 256], sizes = [8, 32], strides = [1, 1]} : vector<8x384xf32> to vector<8x32xf32>
    %c2_115 = arith.constant 2 : index
    %c0_116 = arith.constant 0 : index
    %c0_117 = arith.constant 0 : index
    %256 = vector.load %arg5[%c2_115, %c0_116, %c0_117] : memref<4x1x128xf32, #tpu.memory_space<vmem>>, vector<1x1x128xf32>
    %257 = vector.shape_cast %256 : vector<1x1x128xf32> to vector<1x128xf32>
    %258 = vector.extract_strided_slice %257 {offsets = [0, 0], sizes = [1, 32], strides = [1, 1]} : vector<1x128xf32> to vector<1x32xf32>
    %259 = vector.broadcast %258 : vector<1x32xf32> to vector<8x32xf32>
    %260 = arith.addf %255, %259 : vector<8x32xf32>
    %261 = vector.extract_strided_slice %231 {offsets = [0, 256], sizes = [8, 32], strides = [1, 1]} : vector<8x384xf32> to vector<8x32xf32>
    %262 = arith.mulf %247, %260 : vector<8x32xf32>
    %263 = arith.addf %261, %262 : vector<8x32xf32>
    %264 = math.tanh %263 : vector<8x32xf32>
    %265 = arith.subf %2, %264 : vector<8x32xf32>
    %266 = arith.mulf %254, %265 : vector<8x32xf32>
    %267 = arith.addf %264, %266 : vector<8x32xf32>
    %c24 = arith.constant 24 : index
    %c0_118 = arith.constant 0 : index
    %268 = vector.load %arg0[%c24, %c0_118] : memref<64x1xf32, #tpu.memory_space<vmem>>, vector<8x1xf32>
    %c0_119 = arith.constant 0 : index
    %c0_120 = arith.constant 0 : index
    %269 = vector.load %arg1[%c0_119, %c0_120] : memref<1x384xf32, #tpu.memory_space<vmem>>, vector<1x384xf32>
    %270 = vector.broadcast %268 : vector<8x1xf32> to vector<8x384xf32>
    %271 = vector.broadcast %269 : vector<1x384xf32> to vector<8x384xf32>
    %272 = arith.mulf %270, %271 : vector<8x384xf32>
    %c0_121 = arith.constant 0 : index
    %c0_122 = arith.constant 0 : index
    %c0_123 = arith.constant 0 : index
    %273 = vector.load %arg4[%c0_121, %c0_122, %c0_123] : memref<4x1x384xf32, #tpu.memory_space<vmem>>, vector<1x1x384xf32>
    %274 = vector.shape_cast %273 : vector<1x1x384xf32> to vector<1x384xf32>
    %275 = vector.broadcast %274 : vector<1x384xf32> to vector<8x384xf32>
    %276 = arith.addf %272, %275 : vector<8x384xf32>
    %c0_124 = arith.constant 0 : index
    %c0_125 = arith.constant 0 : index
    %c0_126 = arith.constant 0 : index
    %277 = vector.load %arg3[%c0_124, %c0_125, %c0_126] : memref<4x32x384xf32, #tpu.memory_space<vmem>>, vector<1x32x384xf32>
    %278 = vector.shape_cast %277 : vector<1x32x384xf32> to vector<32x384xf32>
    %cst_127 = arith.constant dense<0.000000e+00> : vector<8x384xf32>
    %279 = tpu.matmul %181, %278, %cst_127 {dimension_numbers = #tpu.dot_dimension_numbers<[1], [0], [0], [1], [0, 0, 1, 1], [], []>} : vector<8x32xf32>, vector<32x384xf32>, vector<8x384xf32> -> vector<8x384xf32>
    %280 = vector.extract_strided_slice %276 {offsets = [0, 0], sizes = [8, 32], strides = [1, 1]} : vector<8x384xf32> to vector<8x32xf32>
    %281 = vector.extract_strided_slice %279 {offsets = [0, 0], sizes = [8, 32], strides = [1, 1]} : vector<8x384xf32> to vector<8x32xf32>
    %282 = arith.addf %280, %281 : vector<8x32xf32>
    %283 = vector.extract_strided_slice %276 {offsets = [0, 128], sizes = [8, 32], strides = [1, 1]} : vector<8x384xf32> to vector<8x32xf32>
    %284 = vector.extract_strided_slice %279 {offsets = [0, 128], sizes = [8, 32], strides = [1, 1]} : vector<8x384xf32> to vector<8x32xf32>
    %285 = arith.addf %283, %284 : vector<8x32xf32>
    %cst_128 = arith.constant 5.000000e-01 : f32
    %286 = vector.broadcast %cst_128 : f32 to vector<8x32xf32>
    %287 = arith.mulf %286, %282 : vector<8x32xf32>
    %288 = math.tanh %287 : vector<8x32xf32>
    %cst_129 = arith.constant 5.000000e-01 : f32
    %289 = vector.broadcast %cst_129 : f32 to vector<8x32xf32>
    %290 = arith.mulf %289, %288 : vector<8x32xf32>
    %cst_130 = arith.constant 5.000000e-01 : f32
    %291 = vector.broadcast %cst_130 : f32 to vector<8x32xf32>
    %292 = arith.addf %290, %291 : vector<8x32xf32>
    %cst_131 = arith.constant 5.000000e-01 : f32
    %293 = vector.broadcast %cst_131 : f32 to vector<8x32xf32>
    %294 = arith.mulf %293, %285 : vector<8x32xf32>
    %295 = math.tanh %294 : vector<8x32xf32>
    %cst_132 = arith.constant 5.000000e-01 : f32
    %296 = vector.broadcast %cst_132 : f32 to vector<8x32xf32>
    %297 = arith.mulf %296, %295 : vector<8x32xf32>
    %cst_133 = arith.constant 5.000000e-01 : f32
    %298 = vector.broadcast %cst_133 : f32 to vector<8x32xf32>
    %299 = arith.addf %297, %298 : vector<8x32xf32>
    %300 = vector.extract_strided_slice %279 {offsets = [0, 256], sizes = [8, 32], strides = [1, 1]} : vector<8x384xf32> to vector<8x32xf32>
    %c0_134 = arith.constant 0 : index
    %c0_135 = arith.constant 0 : index
    %c0_136 = arith.constant 0 : index
    %301 = vector.load %arg5[%c0_134, %c0_135, %c0_136] : memref<4x1x128xf32, #tpu.memory_space<vmem>>, vector<1x1x128xf32>
    %302 = vector.shape_cast %301 : vector<1x1x128xf32> to vector<1x128xf32>
    %303 = vector.extract_strided_slice %302 {offsets = [0, 0], sizes = [1, 32], strides = [1, 1]} : vector<1x128xf32> to vector<1x32xf32>
    %304 = vector.broadcast %303 : vector<1x32xf32> to vector<8x32xf32>
    %305 = arith.addf %300, %304 : vector<8x32xf32>
    %306 = vector.extract_strided_slice %276 {offsets = [0, 256], sizes = [8, 32], strides = [1, 1]} : vector<8x384xf32> to vector<8x32xf32>
    %307 = arith.mulf %292, %305 : vector<8x32xf32>
    %308 = arith.addf %306, %307 : vector<8x32xf32>
    %309 = math.tanh %308 : vector<8x32xf32>
    %310 = arith.subf %181, %309 : vector<8x32xf32>
    %311 = arith.mulf %299, %310 : vector<8x32xf32>
    %312 = arith.addf %309, %311 : vector<8x32xf32>
    %c0_137 = arith.constant 0 : index
    %c0_138 = arith.constant 0 : index
    %c0_139 = arith.constant 0 : index
    %313 = vector.load %arg2[%c0_137, %c0_138, %c0_139] : memref<3x32x384xf32, #tpu.memory_space<vmem>>, vector<1x32x384xf32>
    %314 = vector.shape_cast %313 : vector<1x32x384xf32> to vector<32x384xf32>
    %cst_140 = arith.constant dense<0.000000e+00> : vector<8x384xf32>
    %315 = tpu.matmul %181, %314, %cst_140 {dimension_numbers = #tpu.dot_dimension_numbers<[1], [0], [0], [1], [0, 0, 1, 1], [], []>} : vector<8x32xf32>, vector<32x384xf32>, vector<8x384xf32> -> vector<8x384xf32>
    %c1_141 = arith.constant 1 : index
    %c0_142 = arith.constant 0 : index
    %c0_143 = arith.constant 0 : index
    %316 = vector.load %arg4[%c1_141, %c0_142, %c0_143] : memref<4x1x384xf32, #tpu.memory_space<vmem>>, vector<1x1x384xf32>
    %317 = vector.shape_cast %316 : vector<1x1x384xf32> to vector<1x384xf32>
    %318 = vector.broadcast %317 : vector<1x384xf32> to vector<8x384xf32>
    %319 = arith.addf %315, %318 : vector<8x384xf32>
    %c1_144 = arith.constant 1 : index
    %c0_145 = arith.constant 0 : index
    %c0_146 = arith.constant 0 : index
    %320 = vector.load %arg3[%c1_144, %c0_145, %c0_146] : memref<4x32x384xf32, #tpu.memory_space<vmem>>, vector<1x32x384xf32>
    %321 = vector.shape_cast %320 : vector<1x32x384xf32> to vector<32x384xf32>
    %cst_147 = arith.constant dense<0.000000e+00> : vector<8x384xf32>
    %322 = tpu.matmul %224, %321, %cst_147 {dimension_numbers = #tpu.dot_dimension_numbers<[1], [0], [0], [1], [0, 0, 1, 1], [], []>} : vector<8x32xf32>, vector<32x384xf32>, vector<8x384xf32> -> vector<8x384xf32>
    %323 = vector.extract_strided_slice %319 {offsets = [0, 0], sizes = [8, 32], strides = [1, 1]} : vector<8x384xf32> to vector<8x32xf32>
    %324 = vector.extract_strided_slice %322 {offsets = [0, 0], sizes = [8, 32], strides = [1, 1]} : vector<8x384xf32> to vector<8x32xf32>
    %325 = arith.addf %323, %324 : vector<8x32xf32>
    %326 = vector.extract_strided_slice %319 {offsets = [0, 128], sizes = [8, 32], strides = [1, 1]} : vector<8x384xf32> to vector<8x32xf32>
    %327 = vector.extract_strided_slice %322 {offsets = [0, 128], sizes = [8, 32], strides = [1, 1]} : vector<8x384xf32> to vector<8x32xf32>
    %328 = arith.addf %326, %327 : vector<8x32xf32>
    %cst_148 = arith.constant 5.000000e-01 : f32
    %329 = vector.broadcast %cst_148 : f32 to vector<8x32xf32>
    %330 = arith.mulf %329, %325 : vector<8x32xf32>
    %331 = math.tanh %330 : vector<8x32xf32>
    %cst_149 = arith.constant 5.000000e-01 : f32
    %332 = vector.broadcast %cst_149 : f32 to vector<8x32xf32>
    %333 = arith.mulf %332, %331 : vector<8x32xf32>
    %cst_150 = arith.constant 5.000000e-01 : f32
    %334 = vector.broadcast %cst_150 : f32 to vector<8x32xf32>
    %335 = arith.addf %333, %334 : vector<8x32xf32>
    %cst_151 = arith.constant 5.000000e-01 : f32
    %336 = vector.broadcast %cst_151 : f32 to vector<8x32xf32>
    %337 = arith.mulf %336, %328 : vector<8x32xf32>
    %338 = math.tanh %337 : vector<8x32xf32>
    %cst_152 = arith.constant 5.000000e-01 : f32
    %339 = vector.broadcast %cst_152 : f32 to vector<8x32xf32>
    %340 = arith.mulf %339, %338 : vector<8x32xf32>
    %cst_153 = arith.constant 5.000000e-01 : f32
    %341 = vector.broadcast %cst_153 : f32 to vector<8x32xf32>
    %342 = arith.addf %340, %341 : vector<8x32xf32>
    %343 = vector.extract_strided_slice %322 {offsets = [0, 256], sizes = [8, 32], strides = [1, 1]} : vector<8x384xf32> to vector<8x32xf32>
    %c1_154 = arith.constant 1 : index
    %c0_155 = arith.constant 0 : index
    %c0_156 = arith.constant 0 : index
    %344 = vector.load %arg5[%c1_154, %c0_155, %c0_156] : memref<4x1x128xf32, #tpu.memory_space<vmem>>, vector<1x1x128xf32>
    %345 = vector.shape_cast %344 : vector<1x1x128xf32> to vector<1x128xf32>
    %346 = vector.extract_strided_slice %345 {offsets = [0, 0], sizes = [1, 32], strides = [1, 1]} : vector<1x128xf32> to vector<1x32xf32>
    %347 = vector.broadcast %346 : vector<1x32xf32> to vector<8x32xf32>
    %348 = arith.addf %343, %347 : vector<8x32xf32>
    %349 = vector.extract_strided_slice %319 {offsets = [0, 256], sizes = [8, 32], strides = [1, 1]} : vector<8x384xf32> to vector<8x32xf32>
    %350 = arith.mulf %335, %348 : vector<8x32xf32>
    %351 = arith.addf %349, %350 : vector<8x32xf32>
    %352 = math.tanh %351 : vector<8x32xf32>
    %353 = arith.subf %224, %352 : vector<8x32xf32>
    %354 = arith.mulf %342, %353 : vector<8x32xf32>
    %355 = arith.addf %352, %354 : vector<8x32xf32>
    %c1_157 = arith.constant 1 : index
    %c0_158 = arith.constant 0 : index
    %c0_159 = arith.constant 0 : index
    %356 = vector.load %arg2[%c1_157, %c0_158, %c0_159] : memref<3x32x384xf32, #tpu.memory_space<vmem>>, vector<1x32x384xf32>
    %357 = vector.shape_cast %356 : vector<1x32x384xf32> to vector<32x384xf32>
    %cst_160 = arith.constant dense<0.000000e+00> : vector<8x384xf32>
    %358 = tpu.matmul %224, %357, %cst_160 {dimension_numbers = #tpu.dot_dimension_numbers<[1], [0], [0], [1], [0, 0, 1, 1], [], []>} : vector<8x32xf32>, vector<32x384xf32>, vector<8x384xf32> -> vector<8x384xf32>
    %c2_161 = arith.constant 2 : index
    %c0_162 = arith.constant 0 : index
    %c0_163 = arith.constant 0 : index
    %359 = vector.load %arg4[%c2_161, %c0_162, %c0_163] : memref<4x1x384xf32, #tpu.memory_space<vmem>>, vector<1x1x384xf32>
    %360 = vector.shape_cast %359 : vector<1x1x384xf32> to vector<1x384xf32>
    %361 = vector.broadcast %360 : vector<1x384xf32> to vector<8x384xf32>
    %362 = arith.addf %358, %361 : vector<8x384xf32>
    %c2_164 = arith.constant 2 : index
    %c0_165 = arith.constant 0 : index
    %c0_166 = arith.constant 0 : index
    %363 = vector.load %arg3[%c2_164, %c0_165, %c0_166] : memref<4x32x384xf32, #tpu.memory_space<vmem>>, vector<1x32x384xf32>
    %364 = vector.shape_cast %363 : vector<1x32x384xf32> to vector<32x384xf32>
    %cst_167 = arith.constant dense<0.000000e+00> : vector<8x384xf32>
    %365 = tpu.matmul %267, %364, %cst_167 {dimension_numbers = #tpu.dot_dimension_numbers<[1], [0], [0], [1], [0, 0, 1, 1], [], []>} : vector<8x32xf32>, vector<32x384xf32>, vector<8x384xf32> -> vector<8x384xf32>
    %366 = vector.extract_strided_slice %362 {offsets = [0, 0], sizes = [8, 32], strides = [1, 1]} : vector<8x384xf32> to vector<8x32xf32>
    %367 = vector.extract_strided_slice %365 {offsets = [0, 0], sizes = [8, 32], strides = [1, 1]} : vector<8x384xf32> to vector<8x32xf32>
    %368 = arith.addf %366, %367 : vector<8x32xf32>
    %369 = vector.extract_strided_slice %362 {offsets = [0, 128], sizes = [8, 32], strides = [1, 1]} : vector<8x384xf32> to vector<8x32xf32>
    %370 = vector.extract_strided_slice %365 {offsets = [0, 128], sizes = [8, 32], strides = [1, 1]} : vector<8x384xf32> to vector<8x32xf32>
    %371 = arith.addf %369, %370 : vector<8x32xf32>
    %cst_168 = arith.constant 5.000000e-01 : f32
    %372 = vector.broadcast %cst_168 : f32 to vector<8x32xf32>
    %373 = arith.mulf %372, %368 : vector<8x32xf32>
    %374 = math.tanh %373 : vector<8x32xf32>
    %cst_169 = arith.constant 5.000000e-01 : f32
    %375 = vector.broadcast %cst_169 : f32 to vector<8x32xf32>
    %376 = arith.mulf %375, %374 : vector<8x32xf32>
    %cst_170 = arith.constant 5.000000e-01 : f32
    %377 = vector.broadcast %cst_170 : f32 to vector<8x32xf32>
    %378 = arith.addf %376, %377 : vector<8x32xf32>
    %cst_171 = arith.constant 5.000000e-01 : f32
    %379 = vector.broadcast %cst_171 : f32 to vector<8x32xf32>
    %380 = arith.mulf %379, %371 : vector<8x32xf32>
    %381 = math.tanh %380 : vector<8x32xf32>
    %cst_172 = arith.constant 5.000000e-01 : f32
    %382 = vector.broadcast %cst_172 : f32 to vector<8x32xf32>
    %383 = arith.mulf %382, %381 : vector<8x32xf32>
    %cst_173 = arith.constant 5.000000e-01 : f32
    %384 = vector.broadcast %cst_173 : f32 to vector<8x32xf32>
    %385 = arith.addf %383, %384 : vector<8x32xf32>
    %386 = vector.extract_strided_slice %365 {offsets = [0, 256], sizes = [8, 32], strides = [1, 1]} : vector<8x384xf32> to vector<8x32xf32>
    %c2_174 = arith.constant 2 : index
    %c0_175 = arith.constant 0 : index
    %c0_176 = arith.constant 0 : index
    %387 = vector.load %arg5[%c2_174, %c0_175, %c0_176] : memref<4x1x128xf32, #tpu.memory_space<vmem>>, vector<1x1x128xf32>
    %388 = vector.shape_cast %387 : vector<1x1x128xf32> to vector<1x128xf32>
    %389 = vector.extract_strided_slice %388 {offsets = [0, 0], sizes = [1, 32], strides = [1, 1]} : vector<1x128xf32> to vector<1x32xf32>
    %390 = vector.broadcast %389 : vector<1x32xf32> to vector<8x32xf32>
    %391 = arith.addf %386, %390 : vector<8x32xf32>
    %392 = vector.extract_strided_slice %362 {offsets = [0, 256], sizes = [8, 32], strides = [1, 1]} : vector<8x384xf32> to vector<8x32xf32>
    %393 = arith.mulf %378, %391 : vector<8x32xf32>
    %394 = arith.addf %392, %393 : vector<8x32xf32>
    %395 = math.tanh %394 : vector<8x32xf32>
    %396 = arith.subf %267, %395 : vector<8x32xf32>
    %397 = arith.mulf %385, %396 : vector<8x32xf32>
    %398 = arith.addf %395, %397 : vector<8x32xf32>
    %c2_177 = arith.constant 2 : index
    %c0_178 = arith.constant 0 : index
    %c0_179 = arith.constant 0 : index
    %399 = vector.load %arg2[%c2_177, %c0_178, %c0_179] : memref<3x32x384xf32, #tpu.memory_space<vmem>>, vector<1x32x384xf32>
    %400 = vector.shape_cast %399 : vector<1x32x384xf32> to vector<32x384xf32>
    %cst_180 = arith.constant dense<0.000000e+00> : vector<8x384xf32>
    %401 = tpu.matmul %267, %400, %cst_180 {dimension_numbers = #tpu.dot_dimension_numbers<[1], [0], [0], [1], [0, 0, 1, 1], [], []>} : vector<8x32xf32>, vector<32x384xf32>, vector<8x384xf32> -> vector<8x384xf32>
    %c3 = arith.constant 3 : index
    %c0_181 = arith.constant 0 : index
    %c0_182 = arith.constant 0 : index
    %402 = vector.load %arg4[%c3, %c0_181, %c0_182] : memref<4x1x384xf32, #tpu.memory_space<vmem>>, vector<1x1x384xf32>
    %403 = vector.shape_cast %402 : vector<1x1x384xf32> to vector<1x384xf32>
    %404 = vector.broadcast %403 : vector<1x384xf32> to vector<8x384xf32>
    %405 = arith.addf %401, %404 : vector<8x384xf32>
    %c3_183 = arith.constant 3 : index
    %c0_184 = arith.constant 0 : index
    %c0_185 = arith.constant 0 : index
    %406 = vector.load %arg3[%c3_183, %c0_184, %c0_185] : memref<4x32x384xf32, #tpu.memory_space<vmem>>, vector<1x32x384xf32>
    %407 = vector.shape_cast %406 : vector<1x32x384xf32> to vector<32x384xf32>
    %cst_186 = arith.constant dense<0.000000e+00> : vector<8x384xf32>
    %408 = tpu.matmul %3, %407, %cst_186 {dimension_numbers = #tpu.dot_dimension_numbers<[1], [0], [0], [1], [0, 0, 1, 1], [], []>} : vector<8x32xf32>, vector<32x384xf32>, vector<8x384xf32> -> vector<8x384xf32>
    %409 = vector.extract_strided_slice %405 {offsets = [0, 0], sizes = [8, 32], strides = [1, 1]} : vector<8x384xf32> to vector<8x32xf32>
    %410 = vector.extract_strided_slice %408 {offsets = [0, 0], sizes = [8, 32], strides = [1, 1]} : vector<8x384xf32> to vector<8x32xf32>
    %411 = arith.addf %409, %410 : vector<8x32xf32>
    %412 = vector.extract_strided_slice %405 {offsets = [0, 128], sizes = [8, 32], strides = [1, 1]} : vector<8x384xf32> to vector<8x32xf32>
    %413 = vector.extract_strided_slice %408 {offsets = [0, 128], sizes = [8, 32], strides = [1, 1]} : vector<8x384xf32> to vector<8x32xf32>
    %414 = arith.addf %412, %413 : vector<8x32xf32>
    %cst_187 = arith.constant 5.000000e-01 : f32
    %415 = vector.broadcast %cst_187 : f32 to vector<8x32xf32>
    %416 = arith.mulf %415, %411 : vector<8x32xf32>
    %417 = math.tanh %416 : vector<8x32xf32>
    %cst_188 = arith.constant 5.000000e-01 : f32
    %418 = vector.broadcast %cst_188 : f32 to vector<8x32xf32>
    %419 = arith.mulf %418, %417 : vector<8x32xf32>
    %cst_189 = arith.constant 5.000000e-01 : f32
    %420 = vector.broadcast %cst_189 : f32 to vector<8x32xf32>
    %421 = arith.addf %419, %420 : vector<8x32xf32>
    %cst_190 = arith.constant 5.000000e-01 : f32
    %422 = vector.broadcast %cst_190 : f32 to vector<8x32xf32>
    %423 = arith.mulf %422, %414 : vector<8x32xf32>
    %424 = math.tanh %423 : vector<8x32xf32>
    %cst_191 = arith.constant 5.000000e-01 : f32
    %425 = vector.broadcast %cst_191 : f32 to vector<8x32xf32>
    %426 = arith.mulf %425, %424 : vector<8x32xf32>
    %cst_192 = arith.constant 5.000000e-01 : f32
    %427 = vector.broadcast %cst_192 : f32 to vector<8x32xf32>
    %428 = arith.addf %426, %427 : vector<8x32xf32>
    %429 = vector.extract_strided_slice %408 {offsets = [0, 256], sizes = [8, 32], strides = [1, 1]} : vector<8x384xf32> to vector<8x32xf32>
    %c3_193 = arith.constant 3 : index
    %c0_194 = arith.constant 0 : index
    %c0_195 = arith.constant 0 : index
    %430 = vector.load %arg5[%c3_193, %c0_194, %c0_195] : memref<4x1x128xf32, #tpu.memory_space<vmem>>, vector<1x1x128xf32>
    %431 = vector.shape_cast %430 : vector<1x1x128xf32> to vector<1x128xf32>
    %432 = vector.extract_strided_slice %431 {offsets = [0, 0], sizes = [1, 32], strides = [1, 1]} : vector<1x128xf32> to vector<1x32xf32>
    %433 = vector.broadcast %432 : vector<1x32xf32> to vector<8x32xf32>
    %434 = arith.addf %429, %433 : vector<8x32xf32>
    %435 = vector.extract_strided_slice %405 {offsets = [0, 256], sizes = [8, 32], strides = [1, 1]} : vector<8x384xf32> to vector<8x32xf32>
    %436 = arith.mulf %421, %434 : vector<8x32xf32>
    %437 = arith.addf %435, %436 : vector<8x32xf32>
    %438 = math.tanh %437 : vector<8x32xf32>
    %439 = arith.subf %3, %438 : vector<8x32xf32>
    %440 = arith.mulf %428, %439 : vector<8x32xf32>
    %441 = arith.addf %438, %440 : vector<8x32xf32>
    %c32 = arith.constant 32 : index
    %c0_196 = arith.constant 0 : index
    %442 = vector.load %arg0[%c32, %c0_196] : memref<64x1xf32, #tpu.memory_space<vmem>>, vector<8x1xf32>
    %c0_197 = arith.constant 0 : index
    %c0_198 = arith.constant 0 : index
    %443 = vector.load %arg1[%c0_197, %c0_198] : memref<1x384xf32, #tpu.memory_space<vmem>>, vector<1x384xf32>
    %444 = vector.broadcast %442 : vector<8x1xf32> to vector<8x384xf32>
    %445 = vector.broadcast %443 : vector<1x384xf32> to vector<8x384xf32>
    %446 = arith.mulf %444, %445 : vector<8x384xf32>
    %c0_199 = arith.constant 0 : index
    %c0_200 = arith.constant 0 : index
    %c0_201 = arith.constant 0 : index
    %447 = vector.load %arg4[%c0_199, %c0_200, %c0_201] : memref<4x1x384xf32, #tpu.memory_space<vmem>>, vector<1x1x384xf32>
    %448 = vector.shape_cast %447 : vector<1x1x384xf32> to vector<1x384xf32>
    %449 = vector.broadcast %448 : vector<1x384xf32> to vector<8x384xf32>
    %450 = arith.addf %446, %449 : vector<8x384xf32>
    %c0_202 = arith.constant 0 : index
    %c0_203 = arith.constant 0 : index
    %c0_204 = arith.constant 0 : index
    %451 = vector.load %arg3[%c0_202, %c0_203, %c0_204] : memref<4x32x384xf32, #tpu.memory_space<vmem>>, vector<1x32x384xf32>
    %452 = vector.shape_cast %451 : vector<1x32x384xf32> to vector<32x384xf32>
    %cst_205 = arith.constant dense<0.000000e+00> : vector<8x384xf32>
    %453 = tpu.matmul %312, %452, %cst_205 {dimension_numbers = #tpu.dot_dimension_numbers<[1], [0], [0], [1], [0, 0, 1, 1], [], []>} : vector<8x32xf32>, vector<32x384xf32>, vector<8x384xf32> -> vector<8x384xf32>
    %454 = vector.extract_strided_slice %450 {offsets = [0, 0], sizes = [8, 32], strides = [1, 1]} : vector<8x384xf32> to vector<8x32xf32>
    %455 = vector.extract_strided_slice %453 {offsets = [0, 0], sizes = [8, 32], strides = [1, 1]} : vector<8x384xf32> to vector<8x32xf32>
    %456 = arith.addf %454, %455 : vector<8x32xf32>
    %457 = vector.extract_strided_slice %450 {offsets = [0, 128], sizes = [8, 32], strides = [1, 1]} : vector<8x384xf32> to vector<8x32xf32>
    %458 = vector.extract_strided_slice %453 {offsets = [0, 128], sizes = [8, 32], strides = [1, 1]} : vector<8x384xf32> to vector<8x32xf32>
    %459 = arith.addf %457, %458 : vector<8x32xf32>
    %cst_206 = arith.constant 5.000000e-01 : f32
    %460 = vector.broadcast %cst_206 : f32 to vector<8x32xf32>
    %461 = arith.mulf %460, %456 : vector<8x32xf32>
    %462 = math.tanh %461 : vector<8x32xf32>
    %cst_207 = arith.constant 5.000000e-01 : f32
    %463 = vector.broadcast %cst_207 : f32 to vector<8x32xf32>
    %464 = arith.mulf %463, %462 : vector<8x32xf32>
    %cst_208 = arith.constant 5.000000e-01 : f32
    %465 = vector.broadcast %cst_208 : f32 to vector<8x32xf32>
    %466 = arith.addf %464, %465 : vector<8x32xf32>
    %cst_209 = arith.constant 5.000000e-01 : f32
    %467 = vector.broadcast %cst_209 : f32 to vector<8x32xf32>
    %468 = arith.mulf %467, %459 : vector<8x32xf32>
    %469 = math.tanh %468 : vector<8x32xf32>
    %cst_210 = arith.constant 5.000000e-01 : f32
    %470 = vector.broadcast %cst_210 : f32 to vector<8x32xf32>
    %471 = arith.mulf %470, %469 : vector<8x32xf32>
    %cst_211 = arith.constant 5.000000e-01 : f32
    %472 = vector.broadcast %cst_211 : f32 to vector<8x32xf32>
    %473 = arith.addf %471, %472 : vector<8x32xf32>
    %474 = vector.extract_strided_slice %453 {offsets = [0, 256], sizes = [8, 32], strides = [1, 1]} : vector<8x384xf32> to vector<8x32xf32>
    %c0_212 = arith.constant 0 : index
    %c0_213 = arith.constant 0 : index
    %c0_214 = arith.constant 0 : index
    %475 = vector.load %arg5[%c0_212, %c0_213, %c0_214] : memref<4x1x128xf32, #tpu.memory_space<vmem>>, vector<1x1x128xf32>
    %476 = vector.shape_cast %475 : vector<1x1x128xf32> to vector<1x128xf32>
    %477 = vector.extract_strided_slice %476 {offsets = [0, 0], sizes = [1, 32], strides = [1, 1]} : vector<1x128xf32> to vector<1x32xf32>
    %478 = vector.broadcast %477 : vector<1x32xf32> to vector<8x32xf32>
    %479 = arith.addf %474, %478 : vector<8x32xf32>
    %480 = vector.extract_strided_slice %450 {offsets = [0, 256], sizes = [8, 32], strides = [1, 1]} : vector<8x384xf32> to vector<8x32xf32>
    %481 = arith.mulf %466, %479 : vector<8x32xf32>
    %482 = arith.addf %480, %481 : vector<8x32xf32>
    %483 = math.tanh %482 : vector<8x32xf32>
    %484 = arith.subf %312, %483 : vector<8x32xf32>
    %485 = arith.mulf %473, %484 : vector<8x32xf32>
    %486 = arith.addf %483, %485 : vector<8x32xf32>
    %c0_215 = arith.constant 0 : index
    %c0_216 = arith.constant 0 : index
    %c0_217 = arith.constant 0 : index
    %487 = vector.load %arg2[%c0_215, %c0_216, %c0_217] : memref<3x32x384xf32, #tpu.memory_space<vmem>>, vector<1x32x384xf32>
    %488 = vector.shape_cast %487 : vector<1x32x384xf32> to vector<32x384xf32>
    %cst_218 = arith.constant dense<0.000000e+00> : vector<8x384xf32>
    %489 = tpu.matmul %312, %488, %cst_218 {dimension_numbers = #tpu.dot_dimension_numbers<[1], [0], [0], [1], [0, 0, 1, 1], [], []>} : vector<8x32xf32>, vector<32x384xf32>, vector<8x384xf32> -> vector<8x384xf32>
    %c1_219 = arith.constant 1 : index
    %c0_220 = arith.constant 0 : index
    %c0_221 = arith.constant 0 : index
    %490 = vector.load %arg4[%c1_219, %c0_220, %c0_221] : memref<4x1x384xf32, #tpu.memory_space<vmem>>, vector<1x1x384xf32>
    %491 = vector.shape_cast %490 : vector<1x1x384xf32> to vector<1x384xf32>
    %492 = vector.broadcast %491 : vector<1x384xf32> to vector<8x384xf32>
    %493 = arith.addf %489, %492 : vector<8x384xf32>
    %c1_222 = arith.constant 1 : index
    %c0_223 = arith.constant 0 : index
    %c0_224 = arith.constant 0 : index
    %494 = vector.load %arg3[%c1_222, %c0_223, %c0_224] : memref<4x32x384xf32, #tpu.memory_space<vmem>>, vector<1x32x384xf32>
    %495 = vector.shape_cast %494 : vector<1x32x384xf32> to vector<32x384xf32>
    %cst_225 = arith.constant dense<0.000000e+00> : vector<8x384xf32>
    %496 = tpu.matmul %355, %495, %cst_225 {dimension_numbers = #tpu.dot_dimension_numbers<[1], [0], [0], [1], [0, 0, 1, 1], [], []>} : vector<8x32xf32>, vector<32x384xf32>, vector<8x384xf32> -> vector<8x384xf32>
    %497 = vector.extract_strided_slice %493 {offsets = [0, 0], sizes = [8, 32], strides = [1, 1]} : vector<8x384xf32> to vector<8x32xf32>
    %498 = vector.extract_strided_slice %496 {offsets = [0, 0], sizes = [8, 32], strides = [1, 1]} : vector<8x384xf32> to vector<8x32xf32>
    %499 = arith.addf %497, %498 : vector<8x32xf32>
    %500 = vector.extract_strided_slice %493 {offsets = [0, 128], sizes = [8, 32], strides = [1, 1]} : vector<8x384xf32> to vector<8x32xf32>
    %501 = vector.extract_strided_slice %496 {offsets = [0, 128], sizes = [8, 32], strides = [1, 1]} : vector<8x384xf32> to vector<8x32xf32>
    %502 = arith.addf %500, %501 : vector<8x32xf32>
    %cst_226 = arith.constant 5.000000e-01 : f32
    %503 = vector.broadcast %cst_226 : f32 to vector<8x32xf32>
    %504 = arith.mulf %503, %499 : vector<8x32xf32>
    %505 = math.tanh %504 : vector<8x32xf32>
    %cst_227 = arith.constant 5.000000e-01 : f32
    %506 = vector.broadcast %cst_227 : f32 to vector<8x32xf32>
    %507 = arith.mulf %506, %505 : vector<8x32xf32>
    %cst_228 = arith.constant 5.000000e-01 : f32
    %508 = vector.broadcast %cst_228 : f32 to vector<8x32xf32>
    %509 = arith.addf %507, %508 : vector<8x32xf32>
    %cst_229 = arith.constant 5.000000e-01 : f32
    %510 = vector.broadcast %cst_229 : f32 to vector<8x32xf32>
    %511 = arith.mulf %510, %502 : vector<8x32xf32>
    %512 = math.tanh %511 : vector<8x32xf32>
    %cst_230 = arith.constant 5.000000e-01 : f32
    %513 = vector.broadcast %cst_230 : f32 to vector<8x32xf32>
    %514 = arith.mulf %513, %512 : vector<8x32xf32>
    %cst_231 = arith.constant 5.000000e-01 : f32
    %515 = vector.broadcast %cst_231 : f32 to vector<8x32xf32>
    %516 = arith.addf %514, %515 : vector<8x32xf32>
    %517 = vector.extract_strided_slice %496 {offsets = [0, 256], sizes = [8, 32], strides = [1, 1]} : vector<8x384xf32> to vector<8x32xf32>
    %c1_232 = arith.constant 1 : index
    %c0_233 = arith.constant 0 : index
    %c0_234 = arith.constant 0 : index
    %518 = vector.load %arg5[%c1_232, %c0_233, %c0_234] : memref<4x1x128xf32, #tpu.memory_space<vmem>>, vector<1x1x128xf32>
    %519 = vector.shape_cast %518 : vector<1x1x128xf32> to vector<1x128xf32>
    %520 = vector.extract_strided_slice %519 {offsets = [0, 0], sizes = [1, 32], strides = [1, 1]} : vector<1x128xf32> to vector<1x32xf32>
    %521 = vector.broadcast %520 : vector<1x32xf32> to vector<8x32xf32>
    %522 = arith.addf %517, %521 : vector<8x32xf32>
    %523 = vector.extract_strided_slice %493 {offsets = [0, 256], sizes = [8, 32], strides = [1, 1]} : vector<8x384xf32> to vector<8x32xf32>
    %524 = arith.mulf %509, %522 : vector<8x32xf32>
    %525 = arith.addf %523, %524 : vector<8x32xf32>
    %526 = math.tanh %525 : vector<8x32xf32>
    %527 = arith.subf %355, %526 : vector<8x32xf32>
    %528 = arith.mulf %516, %527 : vector<8x32xf32>
    %529 = arith.addf %526, %528 : vector<8x32xf32>
    %c1_235 = arith.constant 1 : index
    %c0_236 = arith.constant 0 : index
    %c0_237 = arith.constant 0 : index
    %530 = vector.load %arg2[%c1_235, %c0_236, %c0_237] : memref<3x32x384xf32, #tpu.memory_space<vmem>>, vector<1x32x384xf32>
    %531 = vector.shape_cast %530 : vector<1x32x384xf32> to vector<32x384xf32>
    %cst_238 = arith.constant dense<0.000000e+00> : vector<8x384xf32>
    %532 = tpu.matmul %355, %531, %cst_238 {dimension_numbers = #tpu.dot_dimension_numbers<[1], [0], [0], [1], [0, 0, 1, 1], [], []>} : vector<8x32xf32>, vector<32x384xf32>, vector<8x384xf32> -> vector<8x384xf32>
    %c2_239 = arith.constant 2 : index
    %c0_240 = arith.constant 0 : index
    %c0_241 = arith.constant 0 : index
    %533 = vector.load %arg4[%c2_239, %c0_240, %c0_241] : memref<4x1x384xf32, #tpu.memory_space<vmem>>, vector<1x1x384xf32>
    %534 = vector.shape_cast %533 : vector<1x1x384xf32> to vector<1x384xf32>
    %535 = vector.broadcast %534 : vector<1x384xf32> to vector<8x384xf32>
    %536 = arith.addf %532, %535 : vector<8x384xf32>
    %c2_242 = arith.constant 2 : index
    %c0_243 = arith.constant 0 : index
    %c0_244 = arith.constant 0 : index
    %537 = vector.load %arg3[%c2_242, %c0_243, %c0_244] : memref<4x32x384xf32, #tpu.memory_space<vmem>>, vector<1x32x384xf32>
    %538 = vector.shape_cast %537 : vector<1x32x384xf32> to vector<32x384xf32>
    %cst_245 = arith.constant dense<0.000000e+00> : vector<8x384xf32>
    %539 = tpu.matmul %398, %538, %cst_245 {dimension_numbers = #tpu.dot_dimension_numbers<[1], [0], [0], [1], [0, 0, 1, 1], [], []>} : vector<8x32xf32>, vector<32x384xf32>, vector<8x384xf32> -> vector<8x384xf32>
    %540 = vector.extract_strided_slice %536 {offsets = [0, 0], sizes = [8, 32], strides = [1, 1]} : vector<8x384xf32> to vector<8x32xf32>
    %541 = vector.extract_strided_slice %539 {offsets = [0, 0], sizes = [8, 32], strides = [1, 1]} : vector<8x384xf32> to vector<8x32xf32>
    %542 = arith.addf %540, %541 : vector<8x32xf32>
    %543 = vector.extract_strided_slice %536 {offsets = [0, 128], sizes = [8, 32], strides = [1, 1]} : vector<8x384xf32> to vector<8x32xf32>
    %544 = vector.extract_strided_slice %539 {offsets = [0, 128], sizes = [8, 32], strides = [1, 1]} : vector<8x384xf32> to vector<8x32xf32>
    %545 = arith.addf %543, %544 : vector<8x32xf32>
    %cst_246 = arith.constant 5.000000e-01 : f32
    %546 = vector.broadcast %cst_246 : f32 to vector<8x32xf32>
    %547 = arith.mulf %546, %542 : vector<8x32xf32>
    %548 = math.tanh %547 : vector<8x32xf32>
    %cst_247 = arith.constant 5.000000e-01 : f32
    %549 = vector.broadcast %cst_247 : f32 to vector<8x32xf32>
    %550 = arith.mulf %549, %548 : vector<8x32xf32>
    %cst_248 = arith.constant 5.000000e-01 : f32
    %551 = vector.broadcast %cst_248 : f32 to vector<8x32xf32>
    %552 = arith.addf %550, %551 : vector<8x32xf32>
    %cst_249 = arith.constant 5.000000e-01 : f32
    %553 = vector.broadcast %cst_249 : f32 to vector<8x32xf32>
    %554 = arith.mulf %553, %545 : vector<8x32xf32>
    %555 = math.tanh %554 : vector<8x32xf32>
    %cst_250 = arith.constant 5.000000e-01 : f32
    %556 = vector.broadcast %cst_250 : f32 to vector<8x32xf32>
    %557 = arith.mulf %556, %555 : vector<8x32xf32>
    %cst_251 = arith.constant 5.000000e-01 : f32
    %558 = vector.broadcast %cst_251 : f32 to vector<8x32xf32>
    %559 = arith.addf %557, %558 : vector<8x32xf32>
    %560 = vector.extract_strided_slice %539 {offsets = [0, 256], sizes = [8, 32], strides = [1, 1]} : vector<8x384xf32> to vector<8x32xf32>
    %c2_252 = arith.constant 2 : index
    %c0_253 = arith.constant 0 : index
    %c0_254 = arith.constant 0 : index
    %561 = vector.load %arg5[%c2_252, %c0_253, %c0_254] : memref<4x1x128xf32, #tpu.memory_space<vmem>>, vector<1x1x128xf32>
    %562 = vector.shape_cast %561 : vector<1x1x128xf32> to vector<1x128xf32>
    %563 = vector.extract_strided_slice %562 {offsets = [0, 0], sizes = [1, 32], strides = [1, 1]} : vector<1x128xf32> to vector<1x32xf32>
    %564 = vector.broadcast %563 : vector<1x32xf32> to vector<8x32xf32>
    %565 = arith.addf %560, %564 : vector<8x32xf32>
    %566 = vector.extract_strided_slice %536 {offsets = [0, 256], sizes = [8, 32], strides = [1, 1]} : vector<8x384xf32> to vector<8x32xf32>
    %567 = arith.mulf %552, %565 : vector<8x32xf32>
    %568 = arith.addf %566, %567 : vector<8x32xf32>
    %569 = math.tanh %568 : vector<8x32xf32>
    %570 = arith.subf %398, %569 : vector<8x32xf32>
    %571 = arith.mulf %559, %570 : vector<8x32xf32>
    %572 = arith.addf %569, %571 : vector<8x32xf32>
    %c2_255 = arith.constant 2 : index
    %c0_256 = arith.constant 0 : index
    %c0_257 = arith.constant 0 : index
    %573 = vector.load %arg2[%c2_255, %c0_256, %c0_257] : memref<3x32x384xf32, #tpu.memory_space<vmem>>, vector<1x32x384xf32>
    %574 = vector.shape_cast %573 : vector<1x32x384xf32> to vector<32x384xf32>
    %cst_258 = arith.constant dense<0.000000e+00> : vector<8x384xf32>
    %575 = tpu.matmul %398, %574, %cst_258 {dimension_numbers = #tpu.dot_dimension_numbers<[1], [0], [0], [1], [0, 0, 1, 1], [], []>} : vector<8x32xf32>, vector<32x384xf32>, vector<8x384xf32> -> vector<8x384xf32>
    %c3_259 = arith.constant 3 : index
    %c0_260 = arith.constant 0 : index
    %c0_261 = arith.constant 0 : index
    %576 = vector.load %arg4[%c3_259, %c0_260, %c0_261] : memref<4x1x384xf32, #tpu.memory_space<vmem>>, vector<1x1x384xf32>
    %577 = vector.shape_cast %576 : vector<1x1x384xf32> to vector<1x384xf32>
    %578 = vector.broadcast %577 : vector<1x384xf32> to vector<8x384xf32>
    %579 = arith.addf %575, %578 : vector<8x384xf32>
    %c3_262 = arith.constant 3 : index
    %c0_263 = arith.constant 0 : index
    %c0_264 = arith.constant 0 : index
    %580 = vector.load %arg3[%c3_262, %c0_263, %c0_264] : memref<4x32x384xf32, #tpu.memory_space<vmem>>, vector<1x32x384xf32>
    %581 = vector.shape_cast %580 : vector<1x32x384xf32> to vector<32x384xf32>
    %cst_265 = arith.constant dense<0.000000e+00> : vector<8x384xf32>
    %582 = tpu.matmul %441, %581, %cst_265 {dimension_numbers = #tpu.dot_dimension_numbers<[1], [0], [0], [1], [0, 0, 1, 1], [], []>} : vector<8x32xf32>, vector<32x384xf32>, vector<8x384xf32> -> vector<8x384xf32>
    %583 = vector.extract_strided_slice %579 {offsets = [0, 0], sizes = [8, 32], strides = [1, 1]} : vector<8x384xf32> to vector<8x32xf32>
    %584 = vector.extract_strided_slice %582 {offsets = [0, 0], sizes = [8, 32], strides = [1, 1]} : vector<8x384xf32> to vector<8x32xf32>
    %585 = arith.addf %583, %584 : vector<8x32xf32>
    %586 = vector.extract_strided_slice %579 {offsets = [0, 128], sizes = [8, 32], strides = [1, 1]} : vector<8x384xf32> to vector<8x32xf32>
    %587 = vector.extract_strided_slice %582 {offsets = [0, 128], sizes = [8, 32], strides = [1, 1]} : vector<8x384xf32> to vector<8x32xf32>
    %588 = arith.addf %586, %587 : vector<8x32xf32>
    %cst_266 = arith.constant 5.000000e-01 : f32
    %589 = vector.broadcast %cst_266 : f32 to vector<8x32xf32>
    %590 = arith.mulf %589, %585 : vector<8x32xf32>
    %591 = math.tanh %590 : vector<8x32xf32>
    %cst_267 = arith.constant 5.000000e-01 : f32
    %592 = vector.broadcast %cst_267 : f32 to vector<8x32xf32>
    %593 = arith.mulf %592, %591 : vector<8x32xf32>
    %cst_268 = arith.constant 5.000000e-01 : f32
    %594 = vector.broadcast %cst_268 : f32 to vector<8x32xf32>
    %595 = arith.addf %593, %594 : vector<8x32xf32>
    %cst_269 = arith.constant 5.000000e-01 : f32
    %596 = vector.broadcast %cst_269 : f32 to vector<8x32xf32>
    %597 = arith.mulf %596, %588 : vector<8x32xf32>
    %598 = math.tanh %597 : vector<8x32xf32>
    %cst_270 = arith.constant 5.000000e-01 : f32
    %599 = vector.broadcast %cst_270 : f32 to vector<8x32xf32>
    %600 = arith.mulf %599, %598 : vector<8x32xf32>
    %cst_271 = arith.constant 5.000000e-01 : f32
    %601 = vector.broadcast %cst_271 : f32 to vector<8x32xf32>
    %602 = arith.addf %600, %601 : vector<8x32xf32>
    %603 = vector.extract_strided_slice %582 {offsets = [0, 256], sizes = [8, 32], strides = [1, 1]} : vector<8x384xf32> to vector<8x32xf32>
    %c3_272 = arith.constant 3 : index
    %c0_273 = arith.constant 0 : index
    %c0_274 = arith.constant 0 : index
    %604 = vector.load %arg5[%c3_272, %c0_273, %c0_274] : memref<4x1x128xf32, #tpu.memory_space<vmem>>, vector<1x1x128xf32>
    %605 = vector.shape_cast %604 : vector<1x1x128xf32> to vector<1x128xf32>
    %606 = vector.extract_strided_slice %605 {offsets = [0, 0], sizes = [1, 32], strides = [1, 1]} : vector<1x128xf32> to vector<1x32xf32>
    %607 = vector.broadcast %606 : vector<1x32xf32> to vector<8x32xf32>
    %608 = arith.addf %603, %607 : vector<8x32xf32>
    %609 = vector.extract_strided_slice %579 {offsets = [0, 256], sizes = [8, 32], strides = [1, 1]} : vector<8x384xf32> to vector<8x32xf32>
    %610 = arith.mulf %595, %608 : vector<8x32xf32>
    %611 = arith.addf %609, %610 : vector<8x32xf32>
    %612 = math.tanh %611 : vector<8x32xf32>
    %613 = arith.subf %441, %612 : vector<8x32xf32>
    %614 = arith.mulf %602, %613 : vector<8x32xf32>
    %615 = arith.addf %612, %614 : vector<8x32xf32>
    %c40 = arith.constant 40 : index
    %c0_275 = arith.constant 0 : index
    %616 = vector.load %arg0[%c40, %c0_275] : memref<64x1xf32, #tpu.memory_space<vmem>>, vector<8x1xf32>
    %c0_276 = arith.constant 0 : index
    %c0_277 = arith.constant 0 : index
    %617 = vector.load %arg1[%c0_276, %c0_277] : memref<1x384xf32, #tpu.memory_space<vmem>>, vector<1x384xf32>
    %618 = vector.broadcast %616 : vector<8x1xf32> to vector<8x384xf32>
    %619 = vector.broadcast %617 : vector<1x384xf32> to vector<8x384xf32>
    %620 = arith.mulf %618, %619 : vector<8x384xf32>
    %c0_278 = arith.constant 0 : index
    %c0_279 = arith.constant 0 : index
    %c0_280 = arith.constant 0 : index
    %621 = vector.load %arg4[%c0_278, %c0_279, %c0_280] : memref<4x1x384xf32, #tpu.memory_space<vmem>>, vector<1x1x384xf32>
    %622 = vector.shape_cast %621 : vector<1x1x384xf32> to vector<1x384xf32>
    %623 = vector.broadcast %622 : vector<1x384xf32> to vector<8x384xf32>
    %624 = arith.addf %620, %623 : vector<8x384xf32>
    %c0_281 = arith.constant 0 : index
    %c0_282 = arith.constant 0 : index
    %c0_283 = arith.constant 0 : index
    %625 = vector.load %arg3[%c0_281, %c0_282, %c0_283] : memref<4x32x384xf32, #tpu.memory_space<vmem>>, vector<1x32x384xf32>
    %626 = vector.shape_cast %625 : vector<1x32x384xf32> to vector<32x384xf32>
    %cst_284 = arith.constant dense<0.000000e+00> : vector<8x384xf32>
    %627 = tpu.matmul %486, %626, %cst_284 {dimension_numbers = #tpu.dot_dimension_numbers<[1], [0], [0], [1], [0, 0, 1, 1], [], []>} : vector<8x32xf32>, vector<32x384xf32>, vector<8x384xf32> -> vector<8x384xf32>
    %628 = vector.extract_strided_slice %624 {offsets = [0, 0], sizes = [8, 32], strides = [1, 1]} : vector<8x384xf32> to vector<8x32xf32>
    %629 = vector.extract_strided_slice %627 {offsets = [0, 0], sizes = [8, 32], strides = [1, 1]} : vector<8x384xf32> to vector<8x32xf32>
    %630 = arith.addf %628, %629 : vector<8x32xf32>
    %631 = vector.extract_strided_slice %624 {offsets = [0, 128], sizes = [8, 32], strides = [1, 1]} : vector<8x384xf32> to vector<8x32xf32>
    %632 = vector.extract_strided_slice %627 {offsets = [0, 128], sizes = [8, 32], strides = [1, 1]} : vector<8x384xf32> to vector<8x32xf32>
    %633 = arith.addf %631, %632 : vector<8x32xf32>
    %cst_285 = arith.constant 5.000000e-01 : f32
    %634 = vector.broadcast %cst_285 : f32 to vector<8x32xf32>
    %635 = arith.mulf %634, %630 : vector<8x32xf32>
    %636 = math.tanh %635 : vector<8x32xf32>
    %cst_286 = arith.constant 5.000000e-01 : f32
    %637 = vector.broadcast %cst_286 : f32 to vector<8x32xf32>
    %638 = arith.mulf %637, %636 : vector<8x32xf32>
    %cst_287 = arith.constant 5.000000e-01 : f32
    %639 = vector.broadcast %cst_287 : f32 to vector<8x32xf32>
    %640 = arith.addf %638, %639 : vector<8x32xf32>
    %cst_288 = arith.constant 5.000000e-01 : f32
    %641 = vector.broadcast %cst_288 : f32 to vector<8x32xf32>
    %642 = arith.mulf %641, %633 : vector<8x32xf32>
    %643 = math.tanh %642 : vector<8x32xf32>
    %cst_289 = arith.constant 5.000000e-01 : f32
    %644 = vector.broadcast %cst_289 : f32 to vector<8x32xf32>
    %645 = arith.mulf %644, %643 : vector<8x32xf32>
    %cst_290 = arith.constant 5.000000e-01 : f32
    %646 = vector.broadcast %cst_290 : f32 to vector<8x32xf32>
    %647 = arith.addf %645, %646 : vector<8x32xf32>
    %648 = vector.extract_strided_slice %627 {offsets = [0, 256], sizes = [8, 32], strides = [1, 1]} : vector<8x384xf32> to vector<8x32xf32>
    %c0_291 = arith.constant 0 : index
    %c0_292 = arith.constant 0 : index
    %c0_293 = arith.constant 0 : index
    %649 = vector.load %arg5[%c0_291, %c0_292, %c0_293] : memref<4x1x128xf32, #tpu.memory_space<vmem>>, vector<1x1x128xf32>
    %650 = vector.shape_cast %649 : vector<1x1x128xf32> to vector<1x128xf32>
    %651 = vector.extract_strided_slice %650 {offsets = [0, 0], sizes = [1, 32], strides = [1, 1]} : vector<1x128xf32> to vector<1x32xf32>
    %652 = vector.broadcast %651 : vector<1x32xf32> to vector<8x32xf32>
    %653 = arith.addf %648, %652 : vector<8x32xf32>
    %654 = vector.extract_strided_slice %624 {offsets = [0, 256], sizes = [8, 32], strides = [1, 1]} : vector<8x384xf32> to vector<8x32xf32>
    %655 = arith.mulf %640, %653 : vector<8x32xf32>
    %656 = arith.addf %654, %655 : vector<8x32xf32>
    %657 = math.tanh %656 : vector<8x32xf32>
    %658 = arith.subf %486, %657 : vector<8x32xf32>
    %659 = arith.mulf %647, %658 : vector<8x32xf32>
    %660 = arith.addf %657, %659 : vector<8x32xf32>
    %c0_294 = arith.constant 0 : index
    %c0_295 = arith.constant 0 : index
    %c0_296 = arith.constant 0 : index
    %661 = vector.load %arg2[%c0_294, %c0_295, %c0_296] : memref<3x32x384xf32, #tpu.memory_space<vmem>>, vector<1x32x384xf32>
    %662 = vector.shape_cast %661 : vector<1x32x384xf32> to vector<32x384xf32>
    %cst_297 = arith.constant dense<0.000000e+00> : vector<8x384xf32>
    %663 = tpu.matmul %486, %662, %cst_297 {dimension_numbers = #tpu.dot_dimension_numbers<[1], [0], [0], [1], [0, 0, 1, 1], [], []>} : vector<8x32xf32>, vector<32x384xf32>, vector<8x384xf32> -> vector<8x384xf32>
    %c1_298 = arith.constant 1 : index
    %c0_299 = arith.constant 0 : index
    %c0_300 = arith.constant 0 : index
    %664 = vector.load %arg4[%c1_298, %c0_299, %c0_300] : memref<4x1x384xf32, #tpu.memory_space<vmem>>, vector<1x1x384xf32>
    %665 = vector.shape_cast %664 : vector<1x1x384xf32> to vector<1x384xf32>
    %666 = vector.broadcast %665 : vector<1x384xf32> to vector<8x384xf32>
    %667 = arith.addf %663, %666 : vector<8x384xf32>
    %c1_301 = arith.constant 1 : index
    %c0_302 = arith.constant 0 : index
    %c0_303 = arith.constant 0 : index
    %668 = vector.load %arg3[%c1_301, %c0_302, %c0_303] : memref<4x32x384xf32, #tpu.memory_space<vmem>>, vector<1x32x384xf32>
    %669 = vector.shape_cast %668 : vector<1x32x384xf32> to vector<32x384xf32>
    %cst_304 = arith.constant dense<0.000000e+00> : vector<8x384xf32>
    %670 = tpu.matmul %529, %669, %cst_304 {dimension_numbers = #tpu.dot_dimension_numbers<[1], [0], [0], [1], [0, 0, 1, 1], [], []>} : vector<8x32xf32>, vector<32x384xf32>, vector<8x384xf32> -> vector<8x384xf32>
    %671 = vector.extract_strided_slice %667 {offsets = [0, 0], sizes = [8, 32], strides = [1, 1]} : vector<8x384xf32> to vector<8x32xf32>
    %672 = vector.extract_strided_slice %670 {offsets = [0, 0], sizes = [8, 32], strides = [1, 1]} : vector<8x384xf32> to vector<8x32xf32>
    %673 = arith.addf %671, %672 : vector<8x32xf32>
    %674 = vector.extract_strided_slice %667 {offsets = [0, 128], sizes = [8, 32], strides = [1, 1]} : vector<8x384xf32> to vector<8x32xf32>
    %675 = vector.extract_strided_slice %670 {offsets = [0, 128], sizes = [8, 32], strides = [1, 1]} : vector<8x384xf32> to vector<8x32xf32>
    %676 = arith.addf %674, %675 : vector<8x32xf32>
    %cst_305 = arith.constant 5.000000e-01 : f32
    %677 = vector.broadcast %cst_305 : f32 to vector<8x32xf32>
    %678 = arith.mulf %677, %673 : vector<8x32xf32>
    %679 = math.tanh %678 : vector<8x32xf32>
    %cst_306 = arith.constant 5.000000e-01 : f32
    %680 = vector.broadcast %cst_306 : f32 to vector<8x32xf32>
    %681 = arith.mulf %680, %679 : vector<8x32xf32>
    %cst_307 = arith.constant 5.000000e-01 : f32
    %682 = vector.broadcast %cst_307 : f32 to vector<8x32xf32>
    %683 = arith.addf %681, %682 : vector<8x32xf32>
    %cst_308 = arith.constant 5.000000e-01 : f32
    %684 = vector.broadcast %cst_308 : f32 to vector<8x32xf32>
    %685 = arith.mulf %684, %676 : vector<8x32xf32>
    %686 = math.tanh %685 : vector<8x32xf32>
    %cst_309 = arith.constant 5.000000e-01 : f32
    %687 = vector.broadcast %cst_309 : f32 to vector<8x32xf32>
    %688 = arith.mulf %687, %686 : vector<8x32xf32>
    %cst_310 = arith.constant 5.000000e-01 : f32
    %689 = vector.broadcast %cst_310 : f32 to vector<8x32xf32>
    %690 = arith.addf %688, %689 : vector<8x32xf32>
    %691 = vector.extract_strided_slice %670 {offsets = [0, 256], sizes = [8, 32], strides = [1, 1]} : vector<8x384xf32> to vector<8x32xf32>
    %c1_311 = arith.constant 1 : index
    %c0_312 = arith.constant 0 : index
    %c0_313 = arith.constant 0 : index
    %692 = vector.load %arg5[%c1_311, %c0_312, %c0_313] : memref<4x1x128xf32, #tpu.memory_space<vmem>>, vector<1x1x128xf32>
    %693 = vector.shape_cast %692 : vector<1x1x128xf32> to vector<1x128xf32>
    %694 = vector.extract_strided_slice %693 {offsets = [0, 0], sizes = [1, 32], strides = [1, 1]} : vector<1x128xf32> to vector<1x32xf32>
    %695 = vector.broadcast %694 : vector<1x32xf32> to vector<8x32xf32>
    %696 = arith.addf %691, %695 : vector<8x32xf32>
    %697 = vector.extract_strided_slice %667 {offsets = [0, 256], sizes = [8, 32], strides = [1, 1]} : vector<8x384xf32> to vector<8x32xf32>
    %698 = arith.mulf %683, %696 : vector<8x32xf32>
    %699 = arith.addf %697, %698 : vector<8x32xf32>
    %700 = math.tanh %699 : vector<8x32xf32>
    %701 = arith.subf %529, %700 : vector<8x32xf32>
    %702 = arith.mulf %690, %701 : vector<8x32xf32>
    %703 = arith.addf %700, %702 : vector<8x32xf32>
    %c1_314 = arith.constant 1 : index
    %c0_315 = arith.constant 0 : index
    %c0_316 = arith.constant 0 : index
    %704 = vector.load %arg2[%c1_314, %c0_315, %c0_316] : memref<3x32x384xf32, #tpu.memory_space<vmem>>, vector<1x32x384xf32>
    %705 = vector.shape_cast %704 : vector<1x32x384xf32> to vector<32x384xf32>
    %cst_317 = arith.constant dense<0.000000e+00> : vector<8x384xf32>
    %706 = tpu.matmul %529, %705, %cst_317 {dimension_numbers = #tpu.dot_dimension_numbers<[1], [0], [0], [1], [0, 0, 1, 1], [], []>} : vector<8x32xf32>, vector<32x384xf32>, vector<8x384xf32> -> vector<8x384xf32>
    %c2_318 = arith.constant 2 : index
    %c0_319 = arith.constant 0 : index
    %c0_320 = arith.constant 0 : index
    %707 = vector.load %arg4[%c2_318, %c0_319, %c0_320] : memref<4x1x384xf32, #tpu.memory_space<vmem>>, vector<1x1x384xf32>
    %708 = vector.shape_cast %707 : vector<1x1x384xf32> to vector<1x384xf32>
    %709 = vector.broadcast %708 : vector<1x384xf32> to vector<8x384xf32>
    %710 = arith.addf %706, %709 : vector<8x384xf32>
    %c2_321 = arith.constant 2 : index
    %c0_322 = arith.constant 0 : index
    %c0_323 = arith.constant 0 : index
    %711 = vector.load %arg3[%c2_321, %c0_322, %c0_323] : memref<4x32x384xf32, #tpu.memory_space<vmem>>, vector<1x32x384xf32>
    %712 = vector.shape_cast %711 : vector<1x32x384xf32> to vector<32x384xf32>
    %cst_324 = arith.constant dense<0.000000e+00> : vector<8x384xf32>
    %713 = tpu.matmul %572, %712, %cst_324 {dimension_numbers = #tpu.dot_dimension_numbers<[1], [0], [0], [1], [0, 0, 1, 1], [], []>} : vector<8x32xf32>, vector<32x384xf32>, vector<8x384xf32> -> vector<8x384xf32>
    %714 = vector.extract_strided_slice %710 {offsets = [0, 0], sizes = [8, 32], strides = [1, 1]} : vector<8x384xf32> to vector<8x32xf32>
    %715 = vector.extract_strided_slice %713 {offsets = [0, 0], sizes = [8, 32], strides = [1, 1]} : vector<8x384xf32> to vector<8x32xf32>
    %716 = arith.addf %714, %715 : vector<8x32xf32>
    %717 = vector.extract_strided_slice %710 {offsets = [0, 128], sizes = [8, 32], strides = [1, 1]} : vector<8x384xf32> to vector<8x32xf32>
    %718 = vector.extract_strided_slice %713 {offsets = [0, 128], sizes = [8, 32], strides = [1, 1]} : vector<8x384xf32> to vector<8x32xf32>
    %719 = arith.addf %717, %718 : vector<8x32xf32>
    %cst_325 = arith.constant 5.000000e-01 : f32
    %720 = vector.broadcast %cst_325 : f32 to vector<8x32xf32>
    %721 = arith.mulf %720, %716 : vector<8x32xf32>
    %722 = math.tanh %721 : vector<8x32xf32>
    %cst_326 = arith.constant 5.000000e-01 : f32
    %723 = vector.broadcast %cst_326 : f32 to vector<8x32xf32>
    %724 = arith.mulf %723, %722 : vector<8x32xf32>
    %cst_327 = arith.constant 5.000000e-01 : f32
    %725 = vector.broadcast %cst_327 : f32 to vector<8x32xf32>
    %726 = arith.addf %724, %725 : vector<8x32xf32>
    %cst_328 = arith.constant 5.000000e-01 : f32
    %727 = vector.broadcast %cst_328 : f32 to vector<8x32xf32>
    %728 = arith.mulf %727, %719 : vector<8x32xf32>
    %729 = math.tanh %728 : vector<8x32xf32>
    %cst_329 = arith.constant 5.000000e-01 : f32
    %730 = vector.broadcast %cst_329 : f32 to vector<8x32xf32>
    %731 = arith.mulf %730, %729 : vector<8x32xf32>
    %cst_330 = arith.constant 5.000000e-01 : f32
    %732 = vector.broadcast %cst_330 : f32 to vector<8x32xf32>
    %733 = arith.addf %731, %732 : vector<8x32xf32>
    %734 = vector.extract_strided_slice %713 {offsets = [0, 256], sizes = [8, 32], strides = [1, 1]} : vector<8x384xf32> to vector<8x32xf32>
    %c2_331 = arith.constant 2 : index
    %c0_332 = arith.constant 0 : index
    %c0_333 = arith.constant 0 : index
    %735 = vector.load %arg5[%c2_331, %c0_332, %c0_333] : memref<4x1x128xf32, #tpu.memory_space<vmem>>, vector<1x1x128xf32>
    %736 = vector.shape_cast %735 : vector<1x1x128xf32> to vector<1x128xf32>
    %737 = vector.extract_strided_slice %736 {offsets = [0, 0], sizes = [1, 32], strides = [1, 1]} : vector<1x128xf32> to vector<1x32xf32>
    %738 = vector.broadcast %737 : vector<1x32xf32> to vector<8x32xf32>
    %739 = arith.addf %734, %738 : vector<8x32xf32>
    %740 = vector.extract_strided_slice %710 {offsets = [0, 256], sizes = [8, 32], strides = [1, 1]} : vector<8x384xf32> to vector<8x32xf32>
    %741 = arith.mulf %726, %739 : vector<8x32xf32>
    %742 = arith.addf %740, %741 : vector<8x32xf32>
    %743 = math.tanh %742 : vector<8x32xf32>
    %744 = arith.subf %572, %743 : vector<8x32xf32>
    %745 = arith.mulf %733, %744 : vector<8x32xf32>
    %746 = arith.addf %743, %745 : vector<8x32xf32>
    %c2_334 = arith.constant 2 : index
    %c0_335 = arith.constant 0 : index
    %c0_336 = arith.constant 0 : index
    %747 = vector.load %arg2[%c2_334, %c0_335, %c0_336] : memref<3x32x384xf32, #tpu.memory_space<vmem>>, vector<1x32x384xf32>
    %748 = vector.shape_cast %747 : vector<1x32x384xf32> to vector<32x384xf32>
    %cst_337 = arith.constant dense<0.000000e+00> : vector<8x384xf32>
    %749 = tpu.matmul %572, %748, %cst_337 {dimension_numbers = #tpu.dot_dimension_numbers<[1], [0], [0], [1], [0, 0, 1, 1], [], []>} : vector<8x32xf32>, vector<32x384xf32>, vector<8x384xf32> -> vector<8x384xf32>
    %c3_338 = arith.constant 3 : index
    %c0_339 = arith.constant 0 : index
    %c0_340 = arith.constant 0 : index
    %750 = vector.load %arg4[%c3_338, %c0_339, %c0_340] : memref<4x1x384xf32, #tpu.memory_space<vmem>>, vector<1x1x384xf32>
    %751 = vector.shape_cast %750 : vector<1x1x384xf32> to vector<1x384xf32>
    %752 = vector.broadcast %751 : vector<1x384xf32> to vector<8x384xf32>
    %753 = arith.addf %749, %752 : vector<8x384xf32>
    %c3_341 = arith.constant 3 : index
    %c0_342 = arith.constant 0 : index
    %c0_343 = arith.constant 0 : index
    %754 = vector.load %arg3[%c3_341, %c0_342, %c0_343] : memref<4x32x384xf32, #tpu.memory_space<vmem>>, vector<1x32x384xf32>
    %755 = vector.shape_cast %754 : vector<1x32x384xf32> to vector<32x384xf32>
    %cst_344 = arith.constant dense<0.000000e+00> : vector<8x384xf32>
    %756 = tpu.matmul %615, %755, %cst_344 {dimension_numbers = #tpu.dot_dimension_numbers<[1], [0], [0], [1], [0, 0, 1, 1], [], []>} : vector<8x32xf32>, vector<32x384xf32>, vector<8x384xf32> -> vector<8x384xf32>
    %757 = vector.extract_strided_slice %753 {offsets = [0, 0], sizes = [8, 32], strides = [1, 1]} : vector<8x384xf32> to vector<8x32xf32>
    %758 = vector.extract_strided_slice %756 {offsets = [0, 0], sizes = [8, 32], strides = [1, 1]} : vector<8x384xf32> to vector<8x32xf32>
    %759 = arith.addf %757, %758 : vector<8x32xf32>
    %760 = vector.extract_strided_slice %753 {offsets = [0, 128], sizes = [8, 32], strides = [1, 1]} : vector<8x384xf32> to vector<8x32xf32>
    %761 = vector.extract_strided_slice %756 {offsets = [0, 128], sizes = [8, 32], strides = [1, 1]} : vector<8x384xf32> to vector<8x32xf32>
    %762 = arith.addf %760, %761 : vector<8x32xf32>
    %cst_345 = arith.constant 5.000000e-01 : f32
    %763 = vector.broadcast %cst_345 : f32 to vector<8x32xf32>
    %764 = arith.mulf %763, %759 : vector<8x32xf32>
    %765 = math.tanh %764 : vector<8x32xf32>
    %cst_346 = arith.constant 5.000000e-01 : f32
    %766 = vector.broadcast %cst_346 : f32 to vector<8x32xf32>
    %767 = arith.mulf %766, %765 : vector<8x32xf32>
    %cst_347 = arith.constant 5.000000e-01 : f32
    %768 = vector.broadcast %cst_347 : f32 to vector<8x32xf32>
    %769 = arith.addf %767, %768 : vector<8x32xf32>
    %cst_348 = arith.constant 5.000000e-01 : f32
    %770 = vector.broadcast %cst_348 : f32 to vector<8x32xf32>
    %771 = arith.mulf %770, %762 : vector<8x32xf32>
    %772 = math.tanh %771 : vector<8x32xf32>
    %cst_349 = arith.constant 5.000000e-01 : f32
    %773 = vector.broadcast %cst_349 : f32 to vector<8x32xf32>
    %774 = arith.mulf %773, %772 : vector<8x32xf32>
    %cst_350 = arith.constant 5.000000e-01 : f32
    %775 = vector.broadcast %cst_350 : f32 to vector<8x32xf32>
    %776 = arith.addf %774, %775 : vector<8x32xf32>
    %777 = vector.extract_strided_slice %756 {offsets = [0, 256], sizes = [8, 32], strides = [1, 1]} : vector<8x384xf32> to vector<8x32xf32>
    %c3_351 = arith.constant 3 : index
    %c0_352 = arith.constant 0 : index
    %c0_353 = arith.constant 0 : index
    %778 = vector.load %arg5[%c3_351, %c0_352, %c0_353] : memref<4x1x128xf32, #tpu.memory_space<vmem>>, vector<1x1x128xf32>
    %779 = vector.shape_cast %778 : vector<1x1x128xf32> to vector<1x128xf32>
    %780 = vector.extract_strided_slice %779 {offsets = [0, 0], sizes = [1, 32], strides = [1, 1]} : vector<1x128xf32> to vector<1x32xf32>
    %781 = vector.broadcast %780 : vector<1x32xf32> to vector<8x32xf32>
    %782 = arith.addf %777, %781 : vector<8x32xf32>
    %783 = vector.extract_strided_slice %753 {offsets = [0, 256], sizes = [8, 32], strides = [1, 1]} : vector<8x384xf32> to vector<8x32xf32>
    %784 = arith.mulf %769, %782 : vector<8x32xf32>
    %785 = arith.addf %783, %784 : vector<8x32xf32>
    %786 = math.tanh %785 : vector<8x32xf32>
    %787 = arith.subf %615, %786 : vector<8x32xf32>
    %788 = arith.mulf %776, %787 : vector<8x32xf32>
    %789 = arith.addf %786, %788 : vector<8x32xf32>
    %c48 = arith.constant 48 : index
    %c0_354 = arith.constant 0 : index
    %790 = vector.load %arg0[%c48, %c0_354] : memref<64x1xf32, #tpu.memory_space<vmem>>, vector<8x1xf32>
    %c0_355 = arith.constant 0 : index
    %c0_356 = arith.constant 0 : index
    %791 = vector.load %arg1[%c0_355, %c0_356] : memref<1x384xf32, #tpu.memory_space<vmem>>, vector<1x384xf32>
    %792 = vector.broadcast %790 : vector<8x1xf32> to vector<8x384xf32>
    %793 = vector.broadcast %791 : vector<1x384xf32> to vector<8x384xf32>
    %794 = arith.mulf %792, %793 : vector<8x384xf32>
    %c0_357 = arith.constant 0 : index
    %c0_358 = arith.constant 0 : index
    %c0_359 = arith.constant 0 : index
    %795 = vector.load %arg4[%c0_357, %c0_358, %c0_359] : memref<4x1x384xf32, #tpu.memory_space<vmem>>, vector<1x1x384xf32>
    %796 = vector.shape_cast %795 : vector<1x1x384xf32> to vector<1x384xf32>
    %797 = vector.broadcast %796 : vector<1x384xf32> to vector<8x384xf32>
    %798 = arith.addf %794, %797 : vector<8x384xf32>
    %c0_360 = arith.constant 0 : index
    %c0_361 = arith.constant 0 : index
    %c0_362 = arith.constant 0 : index
    %799 = vector.load %arg3[%c0_360, %c0_361, %c0_362] : memref<4x32x384xf32, #tpu.memory_space<vmem>>, vector<1x32x384xf32>
    %800 = vector.shape_cast %799 : vector<1x32x384xf32> to vector<32x384xf32>
    %cst_363 = arith.constant dense<0.000000e+00> : vector<8x384xf32>
    %801 = tpu.matmul %660, %800, %cst_363 {dimension_numbers = #tpu.dot_dimension_numbers<[1], [0], [0], [1], [0, 0, 1, 1], [], []>} : vector<8x32xf32>, vector<32x384xf32>, vector<8x384xf32> -> vector<8x384xf32>
    %802 = vector.extract_strided_slice %798 {offsets = [0, 0], sizes = [8, 32], strides = [1, 1]} : vector<8x384xf32> to vector<8x32xf32>
    %803 = vector.extract_strided_slice %801 {offsets = [0, 0], sizes = [8, 32], strides = [1, 1]} : vector<8x384xf32> to vector<8x32xf32>
    %804 = arith.addf %802, %803 : vector<8x32xf32>
    %805 = vector.extract_strided_slice %798 {offsets = [0, 128], sizes = [8, 32], strides = [1, 1]} : vector<8x384xf32> to vector<8x32xf32>
    %806 = vector.extract_strided_slice %801 {offsets = [0, 128], sizes = [8, 32], strides = [1, 1]} : vector<8x384xf32> to vector<8x32xf32>
    %807 = arith.addf %805, %806 : vector<8x32xf32>
    %cst_364 = arith.constant 5.000000e-01 : f32
    %808 = vector.broadcast %cst_364 : f32 to vector<8x32xf32>
    %809 = arith.mulf %808, %804 : vector<8x32xf32>
    %810 = math.tanh %809 : vector<8x32xf32>
    %cst_365 = arith.constant 5.000000e-01 : f32
    %811 = vector.broadcast %cst_365 : f32 to vector<8x32xf32>
    %812 = arith.mulf %811, %810 : vector<8x32xf32>
    %cst_366 = arith.constant 5.000000e-01 : f32
    %813 = vector.broadcast %cst_366 : f32 to vector<8x32xf32>
    %814 = arith.addf %812, %813 : vector<8x32xf32>
    %cst_367 = arith.constant 5.000000e-01 : f32
    %815 = vector.broadcast %cst_367 : f32 to vector<8x32xf32>
    %816 = arith.mulf %815, %807 : vector<8x32xf32>
    %817 = math.tanh %816 : vector<8x32xf32>
    %cst_368 = arith.constant 5.000000e-01 : f32
    %818 = vector.broadcast %cst_368 : f32 to vector<8x32xf32>
    %819 = arith.mulf %818, %817 : vector<8x32xf32>
    %cst_369 = arith.constant 5.000000e-01 : f32
    %820 = vector.broadcast %cst_369 : f32 to vector<8x32xf32>
    %821 = arith.addf %819, %820 : vector<8x32xf32>
    %822 = vector.extract_strided_slice %801 {offsets = [0, 256], sizes = [8, 32], strides = [1, 1]} : vector<8x384xf32> to vector<8x32xf32>
    %c0_370 = arith.constant 0 : index
    %c0_371 = arith.constant 0 : index
    %c0_372 = arith.constant 0 : index
    %823 = vector.load %arg5[%c0_370, %c0_371, %c0_372] : memref<4x1x128xf32, #tpu.memory_space<vmem>>, vector<1x1x128xf32>
    %824 = vector.shape_cast %823 : vector<1x1x128xf32> to vector<1x128xf32>
    %825 = vector.extract_strided_slice %824 {offsets = [0, 0], sizes = [1, 32], strides = [1, 1]} : vector<1x128xf32> to vector<1x32xf32>
    %826 = vector.broadcast %825 : vector<1x32xf32> to vector<8x32xf32>
    %827 = arith.addf %822, %826 : vector<8x32xf32>
    %828 = vector.extract_strided_slice %798 {offsets = [0, 256], sizes = [8, 32], strides = [1, 1]} : vector<8x384xf32> to vector<8x32xf32>
    %829 = arith.mulf %814, %827 : vector<8x32xf32>
    %830 = arith.addf %828, %829 : vector<8x32xf32>
    %831 = math.tanh %830 : vector<8x32xf32>
    %832 = arith.subf %660, %831 : vector<8x32xf32>
    %833 = arith.mulf %821, %832 : vector<8x32xf32>
    %834 = arith.addf %831, %833 : vector<8x32xf32>
    %c0_373 = arith.constant 0 : index
    %c0_374 = arith.constant 0 : index
    %c0_375 = arith.constant 0 : index
    %835 = vector.load %arg2[%c0_373, %c0_374, %c0_375] : memref<3x32x384xf32, #tpu.memory_space<vmem>>, vector<1x32x384xf32>
    %836 = vector.shape_cast %835 : vector<1x32x384xf32> to vector<32x384xf32>
    %cst_376 = arith.constant dense<0.000000e+00> : vector<8x384xf32>
    %837 = tpu.matmul %660, %836, %cst_376 {dimension_numbers = #tpu.dot_dimension_numbers<[1], [0], [0], [1], [0, 0, 1, 1], [], []>} : vector<8x32xf32>, vector<32x384xf32>, vector<8x384xf32> -> vector<8x384xf32>
    %c1_377 = arith.constant 1 : index
    %c0_378 = arith.constant 0 : index
    %c0_379 = arith.constant 0 : index
    %838 = vector.load %arg4[%c1_377, %c0_378, %c0_379] : memref<4x1x384xf32, #tpu.memory_space<vmem>>, vector<1x1x384xf32>
    %839 = vector.shape_cast %838 : vector<1x1x384xf32> to vector<1x384xf32>
    %840 = vector.broadcast %839 : vector<1x384xf32> to vector<8x384xf32>
    %841 = arith.addf %837, %840 : vector<8x384xf32>
    %c1_380 = arith.constant 1 : index
    %c0_381 = arith.constant 0 : index
    %c0_382 = arith.constant 0 : index
    %842 = vector.load %arg3[%c1_380, %c0_381, %c0_382] : memref<4x32x384xf32, #tpu.memory_space<vmem>>, vector<1x32x384xf32>
    %843 = vector.shape_cast %842 : vector<1x32x384xf32> to vector<32x384xf32>
    %cst_383 = arith.constant dense<0.000000e+00> : vector<8x384xf32>
    %844 = tpu.matmul %703, %843, %cst_383 {dimension_numbers = #tpu.dot_dimension_numbers<[1], [0], [0], [1], [0, 0, 1, 1], [], []>} : vector<8x32xf32>, vector<32x384xf32>, vector<8x384xf32> -> vector<8x384xf32>
    %845 = vector.extract_strided_slice %841 {offsets = [0, 0], sizes = [8, 32], strides = [1, 1]} : vector<8x384xf32> to vector<8x32xf32>
    %846 = vector.extract_strided_slice %844 {offsets = [0, 0], sizes = [8, 32], strides = [1, 1]} : vector<8x384xf32> to vector<8x32xf32>
    %847 = arith.addf %845, %846 : vector<8x32xf32>
    %848 = vector.extract_strided_slice %841 {offsets = [0, 128], sizes = [8, 32], strides = [1, 1]} : vector<8x384xf32> to vector<8x32xf32>
    %849 = vector.extract_strided_slice %844 {offsets = [0, 128], sizes = [8, 32], strides = [1, 1]} : vector<8x384xf32> to vector<8x32xf32>
    %850 = arith.addf %848, %849 : vector<8x32xf32>
    %cst_384 = arith.constant 5.000000e-01 : f32
    %851 = vector.broadcast %cst_384 : f32 to vector<8x32xf32>
    %852 = arith.mulf %851, %847 : vector<8x32xf32>
    %853 = math.tanh %852 : vector<8x32xf32>
    %cst_385 = arith.constant 5.000000e-01 : f32
    %854 = vector.broadcast %cst_385 : f32 to vector<8x32xf32>
    %855 = arith.mulf %854, %853 : vector<8x32xf32>
    %cst_386 = arith.constant 5.000000e-01 : f32
    %856 = vector.broadcast %cst_386 : f32 to vector<8x32xf32>
    %857 = arith.addf %855, %856 : vector<8x32xf32>
    %cst_387 = arith.constant 5.000000e-01 : f32
    %858 = vector.broadcast %cst_387 : f32 to vector<8x32xf32>
    %859 = arith.mulf %858, %850 : vector<8x32xf32>
    %860 = math.tanh %859 : vector<8x32xf32>
    %cst_388 = arith.constant 5.000000e-01 : f32
    %861 = vector.broadcast %cst_388 : f32 to vector<8x32xf32>
    %862 = arith.mulf %861, %860 : vector<8x32xf32>
    %cst_389 = arith.constant 5.000000e-01 : f32
    %863 = vector.broadcast %cst_389 : f32 to vector<8x32xf32>
    %864 = arith.addf %862, %863 : vector<8x32xf32>
    %865 = vector.extract_strided_slice %844 {offsets = [0, 256], sizes = [8, 32], strides = [1, 1]} : vector<8x384xf32> to vector<8x32xf32>
    %c1_390 = arith.constant 1 : index
    %c0_391 = arith.constant 0 : index
    %c0_392 = arith.constant 0 : index
    %866 = vector.load %arg5[%c1_390, %c0_391, %c0_392] : memref<4x1x128xf32, #tpu.memory_space<vmem>>, vector<1x1x128xf32>
    %867 = vector.shape_cast %866 : vector<1x1x128xf32> to vector<1x128xf32>
    %868 = vector.extract_strided_slice %867 {offsets = [0, 0], sizes = [1, 32], strides = [1, 1]} : vector<1x128xf32> to vector<1x32xf32>
    %869 = vector.broadcast %868 : vector<1x32xf32> to vector<8x32xf32>
    %870 = arith.addf %865, %869 : vector<8x32xf32>
    %871 = vector.extract_strided_slice %841 {offsets = [0, 256], sizes = [8, 32], strides = [1, 1]} : vector<8x384xf32> to vector<8x32xf32>
    %872 = arith.mulf %857, %870 : vector<8x32xf32>
    %873 = arith.addf %871, %872 : vector<8x32xf32>
    %874 = math.tanh %873 : vector<8x32xf32>
    %875 = arith.subf %703, %874 : vector<8x32xf32>
    %876 = arith.mulf %864, %875 : vector<8x32xf32>
    %877 = arith.addf %874, %876 : vector<8x32xf32>
    %c1_393 = arith.constant 1 : index
    %c0_394 = arith.constant 0 : index
    %c0_395 = arith.constant 0 : index
    %878 = vector.load %arg2[%c1_393, %c0_394, %c0_395] : memref<3x32x384xf32, #tpu.memory_space<vmem>>, vector<1x32x384xf32>
    %879 = vector.shape_cast %878 : vector<1x32x384xf32> to vector<32x384xf32>
    %cst_396 = arith.constant dense<0.000000e+00> : vector<8x384xf32>
    %880 = tpu.matmul %703, %879, %cst_396 {dimension_numbers = #tpu.dot_dimension_numbers<[1], [0], [0], [1], [0, 0, 1, 1], [], []>} : vector<8x32xf32>, vector<32x384xf32>, vector<8x384xf32> -> vector<8x384xf32>
    %c2_397 = arith.constant 2 : index
    %c0_398 = arith.constant 0 : index
    %c0_399 = arith.constant 0 : index
    %881 = vector.load %arg4[%c2_397, %c0_398, %c0_399] : memref<4x1x384xf32, #tpu.memory_space<vmem>>, vector<1x1x384xf32>
    %882 = vector.shape_cast %881 : vector<1x1x384xf32> to vector<1x384xf32>
    %883 = vector.broadcast %882 : vector<1x384xf32> to vector<8x384xf32>
    %884 = arith.addf %880, %883 : vector<8x384xf32>
    %c2_400 = arith.constant 2 : index
    %c0_401 = arith.constant 0 : index
    %c0_402 = arith.constant 0 : index
    %885 = vector.load %arg3[%c2_400, %c0_401, %c0_402] : memref<4x32x384xf32, #tpu.memory_space<vmem>>, vector<1x32x384xf32>
    %886 = vector.shape_cast %885 : vector<1x32x384xf32> to vector<32x384xf32>
    %cst_403 = arith.constant dense<0.000000e+00> : vector<8x384xf32>
    %887 = tpu.matmul %746, %886, %cst_403 {dimension_numbers = #tpu.dot_dimension_numbers<[1], [0], [0], [1], [0, 0, 1, 1], [], []>} : vector<8x32xf32>, vector<32x384xf32>, vector<8x384xf32> -> vector<8x384xf32>
    %888 = vector.extract_strided_slice %884 {offsets = [0, 0], sizes = [8, 32], strides = [1, 1]} : vector<8x384xf32> to vector<8x32xf32>
    %889 = vector.extract_strided_slice %887 {offsets = [0, 0], sizes = [8, 32], strides = [1, 1]} : vector<8x384xf32> to vector<8x32xf32>
    %890 = arith.addf %888, %889 : vector<8x32xf32>
    %891 = vector.extract_strided_slice %884 {offsets = [0, 128], sizes = [8, 32], strides = [1, 1]} : vector<8x384xf32> to vector<8x32xf32>
    %892 = vector.extract_strided_slice %887 {offsets = [0, 128], sizes = [8, 32], strides = [1, 1]} : vector<8x384xf32> to vector<8x32xf32>
    %893 = arith.addf %891, %892 : vector<8x32xf32>
    %cst_404 = arith.constant 5.000000e-01 : f32
    %894 = vector.broadcast %cst_404 : f32 to vector<8x32xf32>
    %895 = arith.mulf %894, %890 : vector<8x32xf32>
    %896 = math.tanh %895 : vector<8x32xf32>
    %cst_405 = arith.constant 5.000000e-01 : f32
    %897 = vector.broadcast %cst_405 : f32 to vector<8x32xf32>
    %898 = arith.mulf %897, %896 : vector<8x32xf32>
    %cst_406 = arith.constant 5.000000e-01 : f32
    %899 = vector.broadcast %cst_406 : f32 to vector<8x32xf32>
    %900 = arith.addf %898, %899 : vector<8x32xf32>
    %cst_407 = arith.constant 5.000000e-01 : f32
    %901 = vector.broadcast %cst_407 : f32 to vector<8x32xf32>
    %902 = arith.mulf %901, %893 : vector<8x32xf32>
    %903 = math.tanh %902 : vector<8x32xf32>
    %cst_408 = arith.constant 5.000000e-01 : f32
    %904 = vector.broadcast %cst_408 : f32 to vector<8x32xf32>
    %905 = arith.mulf %904, %903 : vector<8x32xf32>
    %cst_409 = arith.constant 5.000000e-01 : f32
    %906 = vector.broadcast %cst_409 : f32 to vector<8x32xf32>
    %907 = arith.addf %905, %906 : vector<8x32xf32>
    %908 = vector.extract_strided_slice %887 {offsets = [0, 256], sizes = [8, 32], strides = [1, 1]} : vector<8x384xf32> to vector<8x32xf32>
    %c2_410 = arith.constant 2 : index
    %c0_411 = arith.constant 0 : index
    %c0_412 = arith.constant 0 : index
    %909 = vector.load %arg5[%c2_410, %c0_411, %c0_412] : memref<4x1x128xf32, #tpu.memory_space<vmem>>, vector<1x1x128xf32>
    %910 = vector.shape_cast %909 : vector<1x1x128xf32> to vector<1x128xf32>
    %911 = vector.extract_strided_slice %910 {offsets = [0, 0], sizes = [1, 32], strides = [1, 1]} : vector<1x128xf32> to vector<1x32xf32>
    %912 = vector.broadcast %911 : vector<1x32xf32> to vector<8x32xf32>
    %913 = arith.addf %908, %912 : vector<8x32xf32>
    %914 = vector.extract_strided_slice %884 {offsets = [0, 256], sizes = [8, 32], strides = [1, 1]} : vector<8x384xf32> to vector<8x32xf32>
    %915 = arith.mulf %900, %913 : vector<8x32xf32>
    %916 = arith.addf %914, %915 : vector<8x32xf32>
    %917 = math.tanh %916 : vector<8x32xf32>
    %918 = arith.subf %746, %917 : vector<8x32xf32>
    %919 = arith.mulf %907, %918 : vector<8x32xf32>
    %920 = arith.addf %917, %919 : vector<8x32xf32>
    %c2_413 = arith.constant 2 : index
    %c0_414 = arith.constant 0 : index
    %c0_415 = arith.constant 0 : index
    %921 = vector.load %arg2[%c2_413, %c0_414, %c0_415] : memref<3x32x384xf32, #tpu.memory_space<vmem>>, vector<1x32x384xf32>
    %922 = vector.shape_cast %921 : vector<1x32x384xf32> to vector<32x384xf32>
    %cst_416 = arith.constant dense<0.000000e+00> : vector<8x384xf32>
    %923 = tpu.matmul %746, %922, %cst_416 {dimension_numbers = #tpu.dot_dimension_numbers<[1], [0], [0], [1], [0, 0, 1, 1], [], []>} : vector<8x32xf32>, vector<32x384xf32>, vector<8x384xf32> -> vector<8x384xf32>
    %c3_417 = arith.constant 3 : index
    %c0_418 = arith.constant 0 : index
    %c0_419 = arith.constant 0 : index
    %924 = vector.load %arg4[%c3_417, %c0_418, %c0_419] : memref<4x1x384xf32, #tpu.memory_space<vmem>>, vector<1x1x384xf32>
    %925 = vector.shape_cast %924 : vector<1x1x384xf32> to vector<1x384xf32>
    %926 = vector.broadcast %925 : vector<1x384xf32> to vector<8x384xf32>
    %927 = arith.addf %923, %926 : vector<8x384xf32>
    %c3_420 = arith.constant 3 : index
    %c0_421 = arith.constant 0 : index
    %c0_422 = arith.constant 0 : index
    %928 = vector.load %arg3[%c3_420, %c0_421, %c0_422] : memref<4x32x384xf32, #tpu.memory_space<vmem>>, vector<1x32x384xf32>
    %929 = vector.shape_cast %928 : vector<1x32x384xf32> to vector<32x384xf32>
    %cst_423 = arith.constant dense<0.000000e+00> : vector<8x384xf32>
    %930 = tpu.matmul %789, %929, %cst_423 {dimension_numbers = #tpu.dot_dimension_numbers<[1], [0], [0], [1], [0, 0, 1, 1], [], []>} : vector<8x32xf32>, vector<32x384xf32>, vector<8x384xf32> -> vector<8x384xf32>
    %931 = vector.extract_strided_slice %927 {offsets = [0, 0], sizes = [8, 32], strides = [1, 1]} : vector<8x384xf32> to vector<8x32xf32>
    %932 = vector.extract_strided_slice %930 {offsets = [0, 0], sizes = [8, 32], strides = [1, 1]} : vector<8x384xf32> to vector<8x32xf32>
    %933 = arith.addf %931, %932 : vector<8x32xf32>
    %934 = vector.extract_strided_slice %927 {offsets = [0, 128], sizes = [8, 32], strides = [1, 1]} : vector<8x384xf32> to vector<8x32xf32>
    %935 = vector.extract_strided_slice %930 {offsets = [0, 128], sizes = [8, 32], strides = [1, 1]} : vector<8x384xf32> to vector<8x32xf32>
    %936 = arith.addf %934, %935 : vector<8x32xf32>
    %cst_424 = arith.constant 5.000000e-01 : f32
    %937 = vector.broadcast %cst_424 : f32 to vector<8x32xf32>
    %938 = arith.mulf %937, %933 : vector<8x32xf32>
    %939 = math.tanh %938 : vector<8x32xf32>
    %cst_425 = arith.constant 5.000000e-01 : f32
    %940 = vector.broadcast %cst_425 : f32 to vector<8x32xf32>
    %941 = arith.mulf %940, %939 : vector<8x32xf32>
    %cst_426 = arith.constant 5.000000e-01 : f32
    %942 = vector.broadcast %cst_426 : f32 to vector<8x32xf32>
    %943 = arith.addf %941, %942 : vector<8x32xf32>
    %cst_427 = arith.constant 5.000000e-01 : f32
    %944 = vector.broadcast %cst_427 : f32 to vector<8x32xf32>
    %945 = arith.mulf %944, %936 : vector<8x32xf32>
    %946 = math.tanh %945 : vector<8x32xf32>
    %cst_428 = arith.constant 5.000000e-01 : f32
    %947 = vector.broadcast %cst_428 : f32 to vector<8x32xf32>
    %948 = arith.mulf %947, %946 : vector<8x32xf32>
    %cst_429 = arith.constant 5.000000e-01 : f32
    %949 = vector.broadcast %cst_429 : f32 to vector<8x32xf32>
    %950 = arith.addf %948, %949 : vector<8x32xf32>
    %951 = vector.extract_strided_slice %930 {offsets = [0, 256], sizes = [8, 32], strides = [1, 1]} : vector<8x384xf32> to vector<8x32xf32>
    %c3_430 = arith.constant 3 : index
    %c0_431 = arith.constant 0 : index
    %c0_432 = arith.constant 0 : index
    %952 = vector.load %arg5[%c3_430, %c0_431, %c0_432] : memref<4x1x128xf32, #tpu.memory_space<vmem>>, vector<1x1x128xf32>
    %953 = vector.shape_cast %952 : vector<1x1x128xf32> to vector<1x128xf32>
    %954 = vector.extract_strided_slice %953 {offsets = [0, 0], sizes = [1, 32], strides = [1, 1]} : vector<1x128xf32> to vector<1x32xf32>
    %955 = vector.broadcast %954 : vector<1x32xf32> to vector<8x32xf32>
    %956 = arith.addf %951, %955 : vector<8x32xf32>
    %957 = vector.extract_strided_slice %927 {offsets = [0, 256], sizes = [8, 32], strides = [1, 1]} : vector<8x384xf32> to vector<8x32xf32>
    %958 = arith.mulf %943, %956 : vector<8x32xf32>
    %959 = arith.addf %957, %958 : vector<8x32xf32>
    %960 = math.tanh %959 : vector<8x32xf32>
    %961 = arith.subf %789, %960 : vector<8x32xf32>
    %962 = arith.mulf %950, %961 : vector<8x32xf32>
    %963 = arith.addf %960, %962 : vector<8x32xf32>
    %c56 = arith.constant 56 : index
    %c0_433 = arith.constant 0 : index
    %964 = vector.load %arg0[%c56, %c0_433] : memref<64x1xf32, #tpu.memory_space<vmem>>, vector<8x1xf32>
    %c0_434 = arith.constant 0 : index
    %c0_435 = arith.constant 0 : index
    %965 = vector.load %arg1[%c0_434, %c0_435] : memref<1x384xf32, #tpu.memory_space<vmem>>, vector<1x384xf32>
    %966 = vector.broadcast %964 : vector<8x1xf32> to vector<8x384xf32>
    %967 = vector.broadcast %965 : vector<1x384xf32> to vector<8x384xf32>
    %968 = arith.mulf %966, %967 : vector<8x384xf32>
    %c0_436 = arith.constant 0 : index
    %c0_437 = arith.constant 0 : index
    %c0_438 = arith.constant 0 : index
    %969 = vector.load %arg4[%c0_436, %c0_437, %c0_438] : memref<4x1x384xf32, #tpu.memory_space<vmem>>, vector<1x1x384xf32>
    %970 = vector.shape_cast %969 : vector<1x1x384xf32> to vector<1x384xf32>
    %971 = vector.broadcast %970 : vector<1x384xf32> to vector<8x384xf32>
    %972 = arith.addf %968, %971 : vector<8x384xf32>
    %c0_439 = arith.constant 0 : index
    %c0_440 = arith.constant 0 : index
    %c0_441 = arith.constant 0 : index
    %973 = vector.load %arg3[%c0_439, %c0_440, %c0_441] : memref<4x32x384xf32, #tpu.memory_space<vmem>>, vector<1x32x384xf32>
    %974 = vector.shape_cast %973 : vector<1x32x384xf32> to vector<32x384xf32>
    %cst_442 = arith.constant dense<0.000000e+00> : vector<8x384xf32>
    %975 = tpu.matmul %834, %974, %cst_442 {dimension_numbers = #tpu.dot_dimension_numbers<[1], [0], [0], [1], [0, 0, 1, 1], [], []>} : vector<8x32xf32>, vector<32x384xf32>, vector<8x384xf32> -> vector<8x384xf32>
    %976 = vector.extract_strided_slice %972 {offsets = [0, 0], sizes = [8, 32], strides = [1, 1]} : vector<8x384xf32> to vector<8x32xf32>
    %977 = vector.extract_strided_slice %975 {offsets = [0, 0], sizes = [8, 32], strides = [1, 1]} : vector<8x384xf32> to vector<8x32xf32>
    %978 = arith.addf %976, %977 : vector<8x32xf32>
    %979 = vector.extract_strided_slice %972 {offsets = [0, 128], sizes = [8, 32], strides = [1, 1]} : vector<8x384xf32> to vector<8x32xf32>
    %980 = vector.extract_strided_slice %975 {offsets = [0, 128], sizes = [8, 32], strides = [1, 1]} : vector<8x384xf32> to vector<8x32xf32>
    %981 = arith.addf %979, %980 : vector<8x32xf32>
    %cst_443 = arith.constant 5.000000e-01 : f32
    %982 = vector.broadcast %cst_443 : f32 to vector<8x32xf32>
    %983 = arith.mulf %982, %978 : vector<8x32xf32>
    %984 = math.tanh %983 : vector<8x32xf32>
    %cst_444 = arith.constant 5.000000e-01 : f32
    %985 = vector.broadcast %cst_444 : f32 to vector<8x32xf32>
    %986 = arith.mulf %985, %984 : vector<8x32xf32>
    %cst_445 = arith.constant 5.000000e-01 : f32
    %987 = vector.broadcast %cst_445 : f32 to vector<8x32xf32>
    %988 = arith.addf %986, %987 : vector<8x32xf32>
    %cst_446 = arith.constant 5.000000e-01 : f32
    %989 = vector.broadcast %cst_446 : f32 to vector<8x32xf32>
    %990 = arith.mulf %989, %981 : vector<8x32xf32>
    %991 = math.tanh %990 : vector<8x32xf32>
    %cst_447 = arith.constant 5.000000e-01 : f32
    %992 = vector.broadcast %cst_447 : f32 to vector<8x32xf32>
    %993 = arith.mulf %992, %991 : vector<8x32xf32>
    %cst_448 = arith.constant 5.000000e-01 : f32
    %994 = vector.broadcast %cst_448 : f32 to vector<8x32xf32>
    %995 = arith.addf %993, %994 : vector<8x32xf32>
    %996 = vector.extract_strided_slice %975 {offsets = [0, 256], sizes = [8, 32], strides = [1, 1]} : vector<8x384xf32> to vector<8x32xf32>
    %c0_449 = arith.constant 0 : index
    %c0_450 = arith.constant 0 : index
    %c0_451 = arith.constant 0 : index
    %997 = vector.load %arg5[%c0_449, %c0_450, %c0_451] : memref<4x1x128xf32, #tpu.memory_space<vmem>>, vector<1x1x128xf32>
    %998 = vector.shape_cast %997 : vector<1x1x128xf32> to vector<1x128xf32>
    %999 = vector.extract_strided_slice %998 {offsets = [0, 0], sizes = [1, 32], strides = [1, 1]} : vector<1x128xf32> to vector<1x32xf32>
    %1000 = vector.broadcast %999 : vector<1x32xf32> to vector<8x32xf32>
    %1001 = arith.addf %996, %1000 : vector<8x32xf32>
    %1002 = vector.extract_strided_slice %972 {offsets = [0, 256], sizes = [8, 32], strides = [1, 1]} : vector<8x384xf32> to vector<8x32xf32>
    %1003 = arith.mulf %988, %1001 : vector<8x32xf32>
    %1004 = arith.addf %1002, %1003 : vector<8x32xf32>
    %1005 = math.tanh %1004 : vector<8x32xf32>
    %1006 = arith.subf %834, %1005 : vector<8x32xf32>
    %1007 = arith.mulf %995, %1006 : vector<8x32xf32>
    %1008 = arith.addf %1005, %1007 : vector<8x32xf32>
    %c0_452 = arith.constant 0 : index
    %c0_453 = arith.constant 0 : index
    %c0_454 = arith.constant 0 : index
    %1009 = vector.load %arg2[%c0_452, %c0_453, %c0_454] : memref<3x32x384xf32, #tpu.memory_space<vmem>>, vector<1x32x384xf32>
    %1010 = vector.shape_cast %1009 : vector<1x32x384xf32> to vector<32x384xf32>
    %cst_455 = arith.constant dense<0.000000e+00> : vector<8x384xf32>
    %1011 = tpu.matmul %834, %1010, %cst_455 {dimension_numbers = #tpu.dot_dimension_numbers<[1], [0], [0], [1], [0, 0, 1, 1], [], []>} : vector<8x32xf32>, vector<32x384xf32>, vector<8x384xf32> -> vector<8x384xf32>
    %c1_456 = arith.constant 1 : index
    %c0_457 = arith.constant 0 : index
    %c0_458 = arith.constant 0 : index
    %1012 = vector.load %arg4[%c1_456, %c0_457, %c0_458] : memref<4x1x384xf32, #tpu.memory_space<vmem>>, vector<1x1x384xf32>
    %1013 = vector.shape_cast %1012 : vector<1x1x384xf32> to vector<1x384xf32>
    %1014 = vector.broadcast %1013 : vector<1x384xf32> to vector<8x384xf32>
    %1015 = arith.addf %1011, %1014 : vector<8x384xf32>
    %c1_459 = arith.constant 1 : index
    %c0_460 = arith.constant 0 : index
    %c0_461 = arith.constant 0 : index
    %1016 = vector.load %arg3[%c1_459, %c0_460, %c0_461] : memref<4x32x384xf32, #tpu.memory_space<vmem>>, vector<1x32x384xf32>
    %1017 = vector.shape_cast %1016 : vector<1x32x384xf32> to vector<32x384xf32>
    %cst_462 = arith.constant dense<0.000000e+00> : vector<8x384xf32>
    %1018 = tpu.matmul %877, %1017, %cst_462 {dimension_numbers = #tpu.dot_dimension_numbers<[1], [0], [0], [1], [0, 0, 1, 1], [], []>} : vector<8x32xf32>, vector<32x384xf32>, vector<8x384xf32> -> vector<8x384xf32>
    %1019 = vector.extract_strided_slice %1015 {offsets = [0, 0], sizes = [8, 32], strides = [1, 1]} : vector<8x384xf32> to vector<8x32xf32>
    %1020 = vector.extract_strided_slice %1018 {offsets = [0, 0], sizes = [8, 32], strides = [1, 1]} : vector<8x384xf32> to vector<8x32xf32>
    %1021 = arith.addf %1019, %1020 : vector<8x32xf32>
    %1022 = vector.extract_strided_slice %1015 {offsets = [0, 128], sizes = [8, 32], strides = [1, 1]} : vector<8x384xf32> to vector<8x32xf32>
    %1023 = vector.extract_strided_slice %1018 {offsets = [0, 128], sizes = [8, 32], strides = [1, 1]} : vector<8x384xf32> to vector<8x32xf32>
    %1024 = arith.addf %1022, %1023 : vector<8x32xf32>
    %cst_463 = arith.constant 5.000000e-01 : f32
    %1025 = vector.broadcast %cst_463 : f32 to vector<8x32xf32>
    %1026 = arith.mulf %1025, %1021 : vector<8x32xf32>
    %1027 = math.tanh %1026 : vector<8x32xf32>
    %cst_464 = arith.constant 5.000000e-01 : f32
    %1028 = vector.broadcast %cst_464 : f32 to vector<8x32xf32>
    %1029 = arith.mulf %1028, %1027 : vector<8x32xf32>
    %cst_465 = arith.constant 5.000000e-01 : f32
    %1030 = vector.broadcast %cst_465 : f32 to vector<8x32xf32>
    %1031 = arith.addf %1029, %1030 : vector<8x32xf32>
    %cst_466 = arith.constant 5.000000e-01 : f32
    %1032 = vector.broadcast %cst_466 : f32 to vector<8x32xf32>
    %1033 = arith.mulf %1032, %1024 : vector<8x32xf32>
    %1034 = math.tanh %1033 : vector<8x32xf32>
    %cst_467 = arith.constant 5.000000e-01 : f32
    %1035 = vector.broadcast %cst_467 : f32 to vector<8x32xf32>
    %1036 = arith.mulf %1035, %1034 : vector<8x32xf32>
    %cst_468 = arith.constant 5.000000e-01 : f32
    %1037 = vector.broadcast %cst_468 : f32 to vector<8x32xf32>
    %1038 = arith.addf %1036, %1037 : vector<8x32xf32>
    %1039 = vector.extract_strided_slice %1018 {offsets = [0, 256], sizes = [8, 32], strides = [1, 1]} : vector<8x384xf32> to vector<8x32xf32>
    %c1_469 = arith.constant 1 : index
    %c0_470 = arith.constant 0 : index
    %c0_471 = arith.constant 0 : index
    %1040 = vector.load %arg5[%c1_469, %c0_470, %c0_471] : memref<4x1x128xf32, #tpu.memory_space<vmem>>, vector<1x1x128xf32>
    %1041 = vector.shape_cast %1040 : vector<1x1x128xf32> to vector<1x128xf32>
    %1042 = vector.extract_strided_slice %1041 {offsets = [0, 0], sizes = [1, 32], strides = [1, 1]} : vector<1x128xf32> to vector<1x32xf32>
    %1043 = vector.broadcast %1042 : vector<1x32xf32> to vector<8x32xf32>
    %1044 = arith.addf %1039, %1043 : vector<8x32xf32>
    %1045 = vector.extract_strided_slice %1015 {offsets = [0, 256], sizes = [8, 32], strides = [1, 1]} : vector<8x384xf32> to vector<8x32xf32>
    %1046 = arith.mulf %1031, %1044 : vector<8x32xf32>
    %1047 = arith.addf %1045, %1046 : vector<8x32xf32>
    %1048 = math.tanh %1047 : vector<8x32xf32>
    %1049 = arith.subf %877, %1048 : vector<8x32xf32>
    %1050 = arith.mulf %1038, %1049 : vector<8x32xf32>
    %1051 = arith.addf %1048, %1050 : vector<8x32xf32>
    %c1_472 = arith.constant 1 : index
    %c0_473 = arith.constant 0 : index
    %c0_474 = arith.constant 0 : index
    %1052 = vector.load %arg2[%c1_472, %c0_473, %c0_474] : memref<3x32x384xf32, #tpu.memory_space<vmem>>, vector<1x32x384xf32>
    %1053 = vector.shape_cast %1052 : vector<1x32x384xf32> to vector<32x384xf32>
    %cst_475 = arith.constant dense<0.000000e+00> : vector<8x384xf32>
    %1054 = tpu.matmul %877, %1053, %cst_475 {dimension_numbers = #tpu.dot_dimension_numbers<[1], [0], [0], [1], [0, 0, 1, 1], [], []>} : vector<8x32xf32>, vector<32x384xf32>, vector<8x384xf32> -> vector<8x384xf32>
    %c2_476 = arith.constant 2 : index
    %c0_477 = arith.constant 0 : index
    %c0_478 = arith.constant 0 : index
    %1055 = vector.load %arg4[%c2_476, %c0_477, %c0_478] : memref<4x1x384xf32, #tpu.memory_space<vmem>>, vector<1x1x384xf32>
    %1056 = vector.shape_cast %1055 : vector<1x1x384xf32> to vector<1x384xf32>
    %1057 = vector.broadcast %1056 : vector<1x384xf32> to vector<8x384xf32>
    %1058 = arith.addf %1054, %1057 : vector<8x384xf32>
    %c2_479 = arith.constant 2 : index
    %c0_480 = arith.constant 0 : index
    %c0_481 = arith.constant 0 : index
    %1059 = vector.load %arg3[%c2_479, %c0_480, %c0_481] : memref<4x32x384xf32, #tpu.memory_space<vmem>>, vector<1x32x384xf32>
    %1060 = vector.shape_cast %1059 : vector<1x32x384xf32> to vector<32x384xf32>
    %cst_482 = arith.constant dense<0.000000e+00> : vector<8x384xf32>
    %1061 = tpu.matmul %920, %1060, %cst_482 {dimension_numbers = #tpu.dot_dimension_numbers<[1], [0], [0], [1], [0, 0, 1, 1], [], []>} : vector<8x32xf32>, vector<32x384xf32>, vector<8x384xf32> -> vector<8x384xf32>
    %1062 = vector.extract_strided_slice %1058 {offsets = [0, 0], sizes = [8, 32], strides = [1, 1]} : vector<8x384xf32> to vector<8x32xf32>
    %1063 = vector.extract_strided_slice %1061 {offsets = [0, 0], sizes = [8, 32], strides = [1, 1]} : vector<8x384xf32> to vector<8x32xf32>
    %1064 = arith.addf %1062, %1063 : vector<8x32xf32>
    %1065 = vector.extract_strided_slice %1058 {offsets = [0, 128], sizes = [8, 32], strides = [1, 1]} : vector<8x384xf32> to vector<8x32xf32>
    %1066 = vector.extract_strided_slice %1061 {offsets = [0, 128], sizes = [8, 32], strides = [1, 1]} : vector<8x384xf32> to vector<8x32xf32>
    %1067 = arith.addf %1065, %1066 : vector<8x32xf32>
    %cst_483 = arith.constant 5.000000e-01 : f32
    %1068 = vector.broadcast %cst_483 : f32 to vector<8x32xf32>
    %1069 = arith.mulf %1068, %1064 : vector<8x32xf32>
    %1070 = math.tanh %1069 : vector<8x32xf32>
    %cst_484 = arith.constant 5.000000e-01 : f32
    %1071 = vector.broadcast %cst_484 : f32 to vector<8x32xf32>
    %1072 = arith.mulf %1071, %1070 : vector<8x32xf32>
    %cst_485 = arith.constant 5.000000e-01 : f32
    %1073 = vector.broadcast %cst_485 : f32 to vector<8x32xf32>
    %1074 = arith.addf %1072, %1073 : vector<8x32xf32>
    %cst_486 = arith.constant 5.000000e-01 : f32
    %1075 = vector.broadcast %cst_486 : f32 to vector<8x32xf32>
    %1076 = arith.mulf %1075, %1067 : vector<8x32xf32>
    %1077 = math.tanh %1076 : vector<8x32xf32>
    %cst_487 = arith.constant 5.000000e-01 : f32
    %1078 = vector.broadcast %cst_487 : f32 to vector<8x32xf32>
    %1079 = arith.mulf %1078, %1077 : vector<8x32xf32>
    %cst_488 = arith.constant 5.000000e-01 : f32
    %1080 = vector.broadcast %cst_488 : f32 to vector<8x32xf32>
    %1081 = arith.addf %1079, %1080 : vector<8x32xf32>
    %1082 = vector.extract_strided_slice %1061 {offsets = [0, 256], sizes = [8, 32], strides = [1, 1]} : vector<8x384xf32> to vector<8x32xf32>
    %c2_489 = arith.constant 2 : index
    %c0_490 = arith.constant 0 : index
    %c0_491 = arith.constant 0 : index
    %1083 = vector.load %arg5[%c2_489, %c0_490, %c0_491] : memref<4x1x128xf32, #tpu.memory_space<vmem>>, vector<1x1x128xf32>
    %1084 = vector.shape_cast %1083 : vector<1x1x128xf32> to vector<1x128xf32>
    %1085 = vector.extract_strided_slice %1084 {offsets = [0, 0], sizes = [1, 32], strides = [1, 1]} : vector<1x128xf32> to vector<1x32xf32>
    %1086 = vector.broadcast %1085 : vector<1x32xf32> to vector<8x32xf32>
    %1087 = arith.addf %1082, %1086 : vector<8x32xf32>
    %1088 = vector.extract_strided_slice %1058 {offsets = [0, 256], sizes = [8, 32], strides = [1, 1]} : vector<8x384xf32> to vector<8x32xf32>
    %1089 = arith.mulf %1074, %1087 : vector<8x32xf32>
    %1090 = arith.addf %1088, %1089 : vector<8x32xf32>
    %1091 = math.tanh %1090 : vector<8x32xf32>
    %1092 = arith.subf %920, %1091 : vector<8x32xf32>
    %1093 = arith.mulf %1081, %1092 : vector<8x32xf32>
    %1094 = arith.addf %1091, %1093 : vector<8x32xf32>
    %c2_492 = arith.constant 2 : index
    %c0_493 = arith.constant 0 : index
    %c0_494 = arith.constant 0 : index
    %1095 = vector.load %arg2[%c2_492, %c0_493, %c0_494] : memref<3x32x384xf32, #tpu.memory_space<vmem>>, vector<1x32x384xf32>
    %1096 = vector.shape_cast %1095 : vector<1x32x384xf32> to vector<32x384xf32>
    %cst_495 = arith.constant dense<0.000000e+00> : vector<8x384xf32>
    %1097 = tpu.matmul %920, %1096, %cst_495 {dimension_numbers = #tpu.dot_dimension_numbers<[1], [0], [0], [1], [0, 0, 1, 1], [], []>} : vector<8x32xf32>, vector<32x384xf32>, vector<8x384xf32> -> vector<8x384xf32>
    %c3_496 = arith.constant 3 : index
    %c0_497 = arith.constant 0 : index
    %c0_498 = arith.constant 0 : index
    %1098 = vector.load %arg4[%c3_496, %c0_497, %c0_498] : memref<4x1x384xf32, #tpu.memory_space<vmem>>, vector<1x1x384xf32>
    %1099 = vector.shape_cast %1098 : vector<1x1x384xf32> to vector<1x384xf32>
    %1100 = vector.broadcast %1099 : vector<1x384xf32> to vector<8x384xf32>
    %1101 = arith.addf %1097, %1100 : vector<8x384xf32>
    %c3_499 = arith.constant 3 : index
    %c0_500 = arith.constant 0 : index
    %c0_501 = arith.constant 0 : index
    %1102 = vector.load %arg3[%c3_499, %c0_500, %c0_501] : memref<4x32x384xf32, #tpu.memory_space<vmem>>, vector<1x32x384xf32>
    %1103 = vector.shape_cast %1102 : vector<1x32x384xf32> to vector<32x384xf32>
    %cst_502 = arith.constant dense<0.000000e+00> : vector<8x384xf32>
    %1104 = tpu.matmul %963, %1103, %cst_502 {dimension_numbers = #tpu.dot_dimension_numbers<[1], [0], [0], [1], [0, 0, 1, 1], [], []>} : vector<8x32xf32>, vector<32x384xf32>, vector<8x384xf32> -> vector<8x384xf32>
    %1105 = vector.extract_strided_slice %1101 {offsets = [0, 0], sizes = [8, 32], strides = [1, 1]} : vector<8x384xf32> to vector<8x32xf32>
    %1106 = vector.extract_strided_slice %1104 {offsets = [0, 0], sizes = [8, 32], strides = [1, 1]} : vector<8x384xf32> to vector<8x32xf32>
    %1107 = arith.addf %1105, %1106 : vector<8x32xf32>
    %1108 = vector.extract_strided_slice %1101 {offsets = [0, 128], sizes = [8, 32], strides = [1, 1]} : vector<8x384xf32> to vector<8x32xf32>
    %1109 = vector.extract_strided_slice %1104 {offsets = [0, 128], sizes = [8, 32], strides = [1, 1]} : vector<8x384xf32> to vector<8x32xf32>
    %1110 = arith.addf %1108, %1109 : vector<8x32xf32>
    %cst_503 = arith.constant 5.000000e-01 : f32
    %1111 = vector.broadcast %cst_503 : f32 to vector<8x32xf32>
    %1112 = arith.mulf %1111, %1107 : vector<8x32xf32>
    %1113 = math.tanh %1112 : vector<8x32xf32>
    %cst_504 = arith.constant 5.000000e-01 : f32
    %1114 = vector.broadcast %cst_504 : f32 to vector<8x32xf32>
    %1115 = arith.mulf %1114, %1113 : vector<8x32xf32>
    %cst_505 = arith.constant 5.000000e-01 : f32
    %1116 = vector.broadcast %cst_505 : f32 to vector<8x32xf32>
    %1117 = arith.addf %1115, %1116 : vector<8x32xf32>
    %cst_506 = arith.constant 5.000000e-01 : f32
    %1118 = vector.broadcast %cst_506 : f32 to vector<8x32xf32>
    %1119 = arith.mulf %1118, %1110 : vector<8x32xf32>
    %1120 = math.tanh %1119 : vector<8x32xf32>
    %cst_507 = arith.constant 5.000000e-01 : f32
    %1121 = vector.broadcast %cst_507 : f32 to vector<8x32xf32>
    %1122 = arith.mulf %1121, %1120 : vector<8x32xf32>
    %cst_508 = arith.constant 5.000000e-01 : f32
    %1123 = vector.broadcast %cst_508 : f32 to vector<8x32xf32>
    %1124 = arith.addf %1122, %1123 : vector<8x32xf32>
    %1125 = vector.extract_strided_slice %1104 {offsets = [0, 256], sizes = [8, 32], strides = [1, 1]} : vector<8x384xf32> to vector<8x32xf32>
    %c3_509 = arith.constant 3 : index
    %c0_510 = arith.constant 0 : index
    %c0_511 = arith.constant 0 : index
    %1126 = vector.load %arg5[%c3_509, %c0_510, %c0_511] : memref<4x1x128xf32, #tpu.memory_space<vmem>>, vector<1x1x128xf32>
    %1127 = vector.shape_cast %1126 : vector<1x1x128xf32> to vector<1x128xf32>
    %1128 = vector.extract_strided_slice %1127 {offsets = [0, 0], sizes = [1, 32], strides = [1, 1]} : vector<1x128xf32> to vector<1x32xf32>
    %1129 = vector.broadcast %1128 : vector<1x32xf32> to vector<8x32xf32>
    %1130 = arith.addf %1125, %1129 : vector<8x32xf32>
    %1131 = vector.extract_strided_slice %1101 {offsets = [0, 256], sizes = [8, 32], strides = [1, 1]} : vector<8x384xf32> to vector<8x32xf32>
    %1132 = arith.mulf %1117, %1130 : vector<8x32xf32>
    %1133 = arith.addf %1131, %1132 : vector<8x32xf32>
    %1134 = math.tanh %1133 : vector<8x32xf32>
    %1135 = arith.subf %963, %1134 : vector<8x32xf32>
    %1136 = arith.mulf %1124, %1135 : vector<8x32xf32>
    %1137 = arith.addf %1134, %1136 : vector<8x32xf32>
    %c0_512 = arith.constant 0 : index
    %c0_513 = arith.constant 0 : index
    %c0_514 = arith.constant 0 : index
    %1138 = vector.load %arg2[%c0_512, %c0_513, %c0_514] : memref<3x32x384xf32, #tpu.memory_space<vmem>>, vector<1x32x384xf32>
    %1139 = vector.shape_cast %1138 : vector<1x32x384xf32> to vector<32x384xf32>
    %cst_515 = arith.constant dense<0.000000e+00> : vector<8x384xf32>
    %1140 = tpu.matmul %1008, %1139, %cst_515 {dimension_numbers = #tpu.dot_dimension_numbers<[1], [0], [0], [1], [0, 0, 1, 1], [], []>} : vector<8x32xf32>, vector<32x384xf32>, vector<8x384xf32> -> vector<8x384xf32>
    %c1_516 = arith.constant 1 : index
    %c0_517 = arith.constant 0 : index
    %c0_518 = arith.constant 0 : index
    %1141 = vector.load %arg4[%c1_516, %c0_517, %c0_518] : memref<4x1x384xf32, #tpu.memory_space<vmem>>, vector<1x1x384xf32>
    %1142 = vector.shape_cast %1141 : vector<1x1x384xf32> to vector<1x384xf32>
    %1143 = vector.broadcast %1142 : vector<1x384xf32> to vector<8x384xf32>
    %1144 = arith.addf %1140, %1143 : vector<8x384xf32>
    %c1_519 = arith.constant 1 : index
    %c0_520 = arith.constant 0 : index
    %c0_521 = arith.constant 0 : index
    %1145 = vector.load %arg3[%c1_519, %c0_520, %c0_521] : memref<4x32x384xf32, #tpu.memory_space<vmem>>, vector<1x32x384xf32>
    %1146 = vector.shape_cast %1145 : vector<1x32x384xf32> to vector<32x384xf32>
    %cst_522 = arith.constant dense<0.000000e+00> : vector<8x384xf32>
    %1147 = tpu.matmul %1051, %1146, %cst_522 {dimension_numbers = #tpu.dot_dimension_numbers<[1], [0], [0], [1], [0, 0, 1, 1], [], []>} : vector<8x32xf32>, vector<32x384xf32>, vector<8x384xf32> -> vector<8x384xf32>
    %1148 = vector.extract_strided_slice %1144 {offsets = [0, 0], sizes = [8, 32], strides = [1, 1]} : vector<8x384xf32> to vector<8x32xf32>
    %1149 = vector.extract_strided_slice %1147 {offsets = [0, 0], sizes = [8, 32], strides = [1, 1]} : vector<8x384xf32> to vector<8x32xf32>
    %1150 = arith.addf %1148, %1149 : vector<8x32xf32>
    %1151 = vector.extract_strided_slice %1144 {offsets = [0, 128], sizes = [8, 32], strides = [1, 1]} : vector<8x384xf32> to vector<8x32xf32>
    %1152 = vector.extract_strided_slice %1147 {offsets = [0, 128], sizes = [8, 32], strides = [1, 1]} : vector<8x384xf32> to vector<8x32xf32>
    %1153 = arith.addf %1151, %1152 : vector<8x32xf32>
    %cst_523 = arith.constant 5.000000e-01 : f32
    %1154 = vector.broadcast %cst_523 : f32 to vector<8x32xf32>
    %1155 = arith.mulf %1154, %1150 : vector<8x32xf32>
    %1156 = math.tanh %1155 : vector<8x32xf32>
    %cst_524 = arith.constant 5.000000e-01 : f32
    %1157 = vector.broadcast %cst_524 : f32 to vector<8x32xf32>
    %1158 = arith.mulf %1157, %1156 : vector<8x32xf32>
    %cst_525 = arith.constant 5.000000e-01 : f32
    %1159 = vector.broadcast %cst_525 : f32 to vector<8x32xf32>
    %1160 = arith.addf %1158, %1159 : vector<8x32xf32>
    %cst_526 = arith.constant 5.000000e-01 : f32
    %1161 = vector.broadcast %cst_526 : f32 to vector<8x32xf32>
    %1162 = arith.mulf %1161, %1153 : vector<8x32xf32>
    %1163 = math.tanh %1162 : vector<8x32xf32>
    %cst_527 = arith.constant 5.000000e-01 : f32
    %1164 = vector.broadcast %cst_527 : f32 to vector<8x32xf32>
    %1165 = arith.mulf %1164, %1163 : vector<8x32xf32>
    %cst_528 = arith.constant 5.000000e-01 : f32
    %1166 = vector.broadcast %cst_528 : f32 to vector<8x32xf32>
    %1167 = arith.addf %1165, %1166 : vector<8x32xf32>
    %1168 = vector.extract_strided_slice %1147 {offsets = [0, 256], sizes = [8, 32], strides = [1, 1]} : vector<8x384xf32> to vector<8x32xf32>
    %c1_529 = arith.constant 1 : index
    %c0_530 = arith.constant 0 : index
    %c0_531 = arith.constant 0 : index
    %1169 = vector.load %arg5[%c1_529, %c0_530, %c0_531] : memref<4x1x128xf32, #tpu.memory_space<vmem>>, vector<1x1x128xf32>
    %1170 = vector.shape_cast %1169 : vector<1x1x128xf32> to vector<1x128xf32>
    %1171 = vector.extract_strided_slice %1170 {offsets = [0, 0], sizes = [1, 32], strides = [1, 1]} : vector<1x128xf32> to vector<1x32xf32>
    %1172 = vector.broadcast %1171 : vector<1x32xf32> to vector<8x32xf32>
    %1173 = arith.addf %1168, %1172 : vector<8x32xf32>
    %1174 = vector.extract_strided_slice %1144 {offsets = [0, 256], sizes = [8, 32], strides = [1, 1]} : vector<8x384xf32> to vector<8x32xf32>
    %1175 = arith.mulf %1160, %1173 : vector<8x32xf32>
    %1176 = arith.addf %1174, %1175 : vector<8x32xf32>
    %1177 = math.tanh %1176 : vector<8x32xf32>
    %1178 = arith.subf %1051, %1177 : vector<8x32xf32>
    %1179 = arith.mulf %1167, %1178 : vector<8x32xf32>
    %1180 = arith.addf %1177, %1179 : vector<8x32xf32>
    %c1_532 = arith.constant 1 : index
    %c0_533 = arith.constant 0 : index
    %c0_534 = arith.constant 0 : index
    %1181 = vector.load %arg2[%c1_532, %c0_533, %c0_534] : memref<3x32x384xf32, #tpu.memory_space<vmem>>, vector<1x32x384xf32>
    %1182 = vector.shape_cast %1181 : vector<1x32x384xf32> to vector<32x384xf32>
    %cst_535 = arith.constant dense<0.000000e+00> : vector<8x384xf32>
    %1183 = tpu.matmul %1051, %1182, %cst_535 {dimension_numbers = #tpu.dot_dimension_numbers<[1], [0], [0], [1], [0, 0, 1, 1], [], []>} : vector<8x32xf32>, vector<32x384xf32>, vector<8x384xf32> -> vector<8x384xf32>
    %c2_536 = arith.constant 2 : index
    %c0_537 = arith.constant 0 : index
    %c0_538 = arith.constant 0 : index
    %1184 = vector.load %arg4[%c2_536, %c0_537, %c0_538] : memref<4x1x384xf32, #tpu.memory_space<vmem>>, vector<1x1x384xf32>
    %1185 = vector.shape_cast %1184 : vector<1x1x384xf32> to vector<1x384xf32>
    %1186 = vector.broadcast %1185 : vector<1x384xf32> to vector<8x384xf32>
    %1187 = arith.addf %1183, %1186 : vector<8x384xf32>
    %c2_539 = arith.constant 2 : index
    %c0_540 = arith.constant 0 : index
    %c0_541 = arith.constant 0 : index
    %1188 = vector.load %arg3[%c2_539, %c0_540, %c0_541] : memref<4x32x384xf32, #tpu.memory_space<vmem>>, vector<1x32x384xf32>
    %1189 = vector.shape_cast %1188 : vector<1x32x384xf32> to vector<32x384xf32>
    %cst_542 = arith.constant dense<0.000000e+00> : vector<8x384xf32>
    %1190 = tpu.matmul %1094, %1189, %cst_542 {dimension_numbers = #tpu.dot_dimension_numbers<[1], [0], [0], [1], [0, 0, 1, 1], [], []>} : vector<8x32xf32>, vector<32x384xf32>, vector<8x384xf32> -> vector<8x384xf32>
    %1191 = vector.extract_strided_slice %1187 {offsets = [0, 0], sizes = [8, 32], strides = [1, 1]} : vector<8x384xf32> to vector<8x32xf32>
    %1192 = vector.extract_strided_slice %1190 {offsets = [0, 0], sizes = [8, 32], strides = [1, 1]} : vector<8x384xf32> to vector<8x32xf32>
    %1193 = arith.addf %1191, %1192 : vector<8x32xf32>
    %1194 = vector.extract_strided_slice %1187 {offsets = [0, 128], sizes = [8, 32], strides = [1, 1]} : vector<8x384xf32> to vector<8x32xf32>
    %1195 = vector.extract_strided_slice %1190 {offsets = [0, 128], sizes = [8, 32], strides = [1, 1]} : vector<8x384xf32> to vector<8x32xf32>
    %1196 = arith.addf %1194, %1195 : vector<8x32xf32>
    %cst_543 = arith.constant 5.000000e-01 : f32
    %1197 = vector.broadcast %cst_543 : f32 to vector<8x32xf32>
    %1198 = arith.mulf %1197, %1193 : vector<8x32xf32>
    %1199 = math.tanh %1198 : vector<8x32xf32>
    %cst_544 = arith.constant 5.000000e-01 : f32
    %1200 = vector.broadcast %cst_544 : f32 to vector<8x32xf32>
    %1201 = arith.mulf %1200, %1199 : vector<8x32xf32>
    %cst_545 = arith.constant 5.000000e-01 : f32
    %1202 = vector.broadcast %cst_545 : f32 to vector<8x32xf32>
    %1203 = arith.addf %1201, %1202 : vector<8x32xf32>
    %cst_546 = arith.constant 5.000000e-01 : f32
    %1204 = vector.broadcast %cst_546 : f32 to vector<8x32xf32>
    %1205 = arith.mulf %1204, %1196 : vector<8x32xf32>
    %1206 = math.tanh %1205 : vector<8x32xf32>
    %cst_547 = arith.constant 5.000000e-01 : f32
    %1207 = vector.broadcast %cst_547 : f32 to vector<8x32xf32>
    %1208 = arith.mulf %1207, %1206 : vector<8x32xf32>
    %cst_548 = arith.constant 5.000000e-01 : f32
    %1209 = vector.broadcast %cst_548 : f32 to vector<8x32xf32>
    %1210 = arith.addf %1208, %1209 : vector<8x32xf32>
    %1211 = vector.extract_strided_slice %1190 {offsets = [0, 256], sizes = [8, 32], strides = [1, 1]} : vector<8x384xf32> to vector<8x32xf32>
    %c2_549 = arith.constant 2 : index
    %c0_550 = arith.constant 0 : index
    %c0_551 = arith.constant 0 : index
    %1212 = vector.load %arg5[%c2_549, %c0_550, %c0_551] : memref<4x1x128xf32, #tpu.memory_space<vmem>>, vector<1x1x128xf32>
    %1213 = vector.shape_cast %1212 : vector<1x1x128xf32> to vector<1x128xf32>
    %1214 = vector.extract_strided_slice %1213 {offsets = [0, 0], sizes = [1, 32], strides = [1, 1]} : vector<1x128xf32> to vector<1x32xf32>
    %1215 = vector.broadcast %1214 : vector<1x32xf32> to vector<8x32xf32>
    %1216 = arith.addf %1211, %1215 : vector<8x32xf32>
    %1217 = vector.extract_strided_slice %1187 {offsets = [0, 256], sizes = [8, 32], strides = [1, 1]} : vector<8x384xf32> to vector<8x32xf32>
    %1218 = arith.mulf %1203, %1216 : vector<8x32xf32>
    %1219 = arith.addf %1217, %1218 : vector<8x32xf32>
    %1220 = math.tanh %1219 : vector<8x32xf32>
    %1221 = arith.subf %1094, %1220 : vector<8x32xf32>
    %1222 = arith.mulf %1210, %1221 : vector<8x32xf32>
    %1223 = arith.addf %1220, %1222 : vector<8x32xf32>
    %c2_552 = arith.constant 2 : index
    %c0_553 = arith.constant 0 : index
    %c0_554 = arith.constant 0 : index
    %1224 = vector.load %arg2[%c2_552, %c0_553, %c0_554] : memref<3x32x384xf32, #tpu.memory_space<vmem>>, vector<1x32x384xf32>
    %1225 = vector.shape_cast %1224 : vector<1x32x384xf32> to vector<32x384xf32>
    %cst_555 = arith.constant dense<0.000000e+00> : vector<8x384xf32>
    %1226 = tpu.matmul %1094, %1225, %cst_555 {dimension_numbers = #tpu.dot_dimension_numbers<[1], [0], [0], [1], [0, 0, 1, 1], [], []>} : vector<8x32xf32>, vector<32x384xf32>, vector<8x384xf32> -> vector<8x384xf32>
    %c3_556 = arith.constant 3 : index
    %c0_557 = arith.constant 0 : index
    %c0_558 = arith.constant 0 : index
    %1227 = vector.load %arg4[%c3_556, %c0_557, %c0_558] : memref<4x1x384xf32, #tpu.memory_space<vmem>>, vector<1x1x384xf32>
    %1228 = vector.shape_cast %1227 : vector<1x1x384xf32> to vector<1x384xf32>
    %1229 = vector.broadcast %1228 : vector<1x384xf32> to vector<8x384xf32>
    %1230 = arith.addf %1226, %1229 : vector<8x384xf32>
    %c3_559 = arith.constant 3 : index
    %c0_560 = arith.constant 0 : index
    %c0_561 = arith.constant 0 : index
    %1231 = vector.load %arg3[%c3_559, %c0_560, %c0_561] : memref<4x32x384xf32, #tpu.memory_space<vmem>>, vector<1x32x384xf32>
    %1232 = vector.shape_cast %1231 : vector<1x32x384xf32> to vector<32x384xf32>
    %cst_562 = arith.constant dense<0.000000e+00> : vector<8x384xf32>
    %1233 = tpu.matmul %1137, %1232, %cst_562 {dimension_numbers = #tpu.dot_dimension_numbers<[1], [0], [0], [1], [0, 0, 1, 1], [], []>} : vector<8x32xf32>, vector<32x384xf32>, vector<8x384xf32> -> vector<8x384xf32>
    %1234 = vector.extract_strided_slice %1230 {offsets = [0, 0], sizes = [8, 32], strides = [1, 1]} : vector<8x384xf32> to vector<8x32xf32>
    %1235 = vector.extract_strided_slice %1233 {offsets = [0, 0], sizes = [8, 32], strides = [1, 1]} : vector<8x384xf32> to vector<8x32xf32>
    %1236 = arith.addf %1234, %1235 : vector<8x32xf32>
    %1237 = vector.extract_strided_slice %1230 {offsets = [0, 128], sizes = [8, 32], strides = [1, 1]} : vector<8x384xf32> to vector<8x32xf32>
    %1238 = vector.extract_strided_slice %1233 {offsets = [0, 128], sizes = [8, 32], strides = [1, 1]} : vector<8x384xf32> to vector<8x32xf32>
    %1239 = arith.addf %1237, %1238 : vector<8x32xf32>
    %cst_563 = arith.constant 5.000000e-01 : f32
    %1240 = vector.broadcast %cst_563 : f32 to vector<8x32xf32>
    %1241 = arith.mulf %1240, %1236 : vector<8x32xf32>
    %1242 = math.tanh %1241 : vector<8x32xf32>
    %cst_564 = arith.constant 5.000000e-01 : f32
    %1243 = vector.broadcast %cst_564 : f32 to vector<8x32xf32>
    %1244 = arith.mulf %1243, %1242 : vector<8x32xf32>
    %cst_565 = arith.constant 5.000000e-01 : f32
    %1245 = vector.broadcast %cst_565 : f32 to vector<8x32xf32>
    %1246 = arith.addf %1244, %1245 : vector<8x32xf32>
    %cst_566 = arith.constant 5.000000e-01 : f32
    %1247 = vector.broadcast %cst_566 : f32 to vector<8x32xf32>
    %1248 = arith.mulf %1247, %1239 : vector<8x32xf32>
    %1249 = math.tanh %1248 : vector<8x32xf32>
    %cst_567 = arith.constant 5.000000e-01 : f32
    %1250 = vector.broadcast %cst_567 : f32 to vector<8x32xf32>
    %1251 = arith.mulf %1250, %1249 : vector<8x32xf32>
    %cst_568 = arith.constant 5.000000e-01 : f32
    %1252 = vector.broadcast %cst_568 : f32 to vector<8x32xf32>
    %1253 = arith.addf %1251, %1252 : vector<8x32xf32>
    %1254 = vector.extract_strided_slice %1233 {offsets = [0, 256], sizes = [8, 32], strides = [1, 1]} : vector<8x384xf32> to vector<8x32xf32>
    %c3_569 = arith.constant 3 : index
    %c0_570 = arith.constant 0 : index
    %c0_571 = arith.constant 0 : index
    %1255 = vector.load %arg5[%c3_569, %c0_570, %c0_571] : memref<4x1x128xf32, #tpu.memory_space<vmem>>, vector<1x1x128xf32>
    %1256 = vector.shape_cast %1255 : vector<1x1x128xf32> to vector<1x128xf32>
    %1257 = vector.extract_strided_slice %1256 {offsets = [0, 0], sizes = [1, 32], strides = [1, 1]} : vector<1x128xf32> to vector<1x32xf32>
    %1258 = vector.broadcast %1257 : vector<1x32xf32> to vector<8x32xf32>
    %1259 = arith.addf %1254, %1258 : vector<8x32xf32>
    %1260 = vector.extract_strided_slice %1230 {offsets = [0, 256], sizes = [8, 32], strides = [1, 1]} : vector<8x384xf32> to vector<8x32xf32>
    %1261 = arith.mulf %1246, %1259 : vector<8x32xf32>
    %1262 = arith.addf %1260, %1261 : vector<8x32xf32>
    %1263 = math.tanh %1262 : vector<8x32xf32>
    %1264 = arith.subf %1137, %1263 : vector<8x32xf32>
    %1265 = arith.mulf %1253, %1264 : vector<8x32xf32>
    %1266 = arith.addf %1263, %1265 : vector<8x32xf32>
    %c1_572 = arith.constant 1 : index
    %c0_573 = arith.constant 0 : index
    %c0_574 = arith.constant 0 : index
    %1267 = vector.load %arg2[%c1_572, %c0_573, %c0_574] : memref<3x32x384xf32, #tpu.memory_space<vmem>>, vector<1x32x384xf32>
    %1268 = vector.shape_cast %1267 : vector<1x32x384xf32> to vector<32x384xf32>
    %cst_575 = arith.constant dense<0.000000e+00> : vector<8x384xf32>
    %1269 = tpu.matmul %1180, %1268, %cst_575 {dimension_numbers = #tpu.dot_dimension_numbers<[1], [0], [0], [1], [0, 0, 1, 1], [], []>} : vector<8x32xf32>, vector<32x384xf32>, vector<8x384xf32> -> vector<8x384xf32>
    %c2_576 = arith.constant 2 : index
    %c0_577 = arith.constant 0 : index
    %c0_578 = arith.constant 0 : index
    %1270 = vector.load %arg4[%c2_576, %c0_577, %c0_578] : memref<4x1x384xf32, #tpu.memory_space<vmem>>, vector<1x1x384xf32>
    %1271 = vector.shape_cast %1270 : vector<1x1x384xf32> to vector<1x384xf32>
    %1272 = vector.broadcast %1271 : vector<1x384xf32> to vector<8x384xf32>
    %1273 = arith.addf %1269, %1272 : vector<8x384xf32>
    %c2_579 = arith.constant 2 : index
    %c0_580 = arith.constant 0 : index
    %c0_581 = arith.constant 0 : index
    %1274 = vector.load %arg3[%c2_579, %c0_580, %c0_581] : memref<4x32x384xf32, #tpu.memory_space<vmem>>, vector<1x32x384xf32>
    %1275 = vector.shape_cast %1274 : vector<1x32x384xf32> to vector<32x384xf32>
    %cst_582 = arith.constant dense<0.000000e+00> : vector<8x384xf32>
    %1276 = tpu.matmul %1223, %1275, %cst_582 {dimension_numbers = #tpu.dot_dimension_numbers<[1], [0], [0], [1], [0, 0, 1, 1], [], []>} : vector<8x32xf32>, vector<32x384xf32>, vector<8x384xf32> -> vector<8x384xf32>
    %1277 = vector.extract_strided_slice %1273 {offsets = [0, 0], sizes = [8, 32], strides = [1, 1]} : vector<8x384xf32> to vector<8x32xf32>
    %1278 = vector.extract_strided_slice %1276 {offsets = [0, 0], sizes = [8, 32], strides = [1, 1]} : vector<8x384xf32> to vector<8x32xf32>
    %1279 = arith.addf %1277, %1278 : vector<8x32xf32>
    %1280 = vector.extract_strided_slice %1273 {offsets = [0, 128], sizes = [8, 32], strides = [1, 1]} : vector<8x384xf32> to vector<8x32xf32>
    %1281 = vector.extract_strided_slice %1276 {offsets = [0, 128], sizes = [8, 32], strides = [1, 1]} : vector<8x384xf32> to vector<8x32xf32>
    %1282 = arith.addf %1280, %1281 : vector<8x32xf32>
    %cst_583 = arith.constant 5.000000e-01 : f32
    %1283 = vector.broadcast %cst_583 : f32 to vector<8x32xf32>
    %1284 = arith.mulf %1283, %1279 : vector<8x32xf32>
    %1285 = math.tanh %1284 : vector<8x32xf32>
    %cst_584 = arith.constant 5.000000e-01 : f32
    %1286 = vector.broadcast %cst_584 : f32 to vector<8x32xf32>
    %1287 = arith.mulf %1286, %1285 : vector<8x32xf32>
    %cst_585 = arith.constant 5.000000e-01 : f32
    %1288 = vector.broadcast %cst_585 : f32 to vector<8x32xf32>
    %1289 = arith.addf %1287, %1288 : vector<8x32xf32>
    %cst_586 = arith.constant 5.000000e-01 : f32
    %1290 = vector.broadcast %cst_586 : f32 to vector<8x32xf32>
    %1291 = arith.mulf %1290, %1282 : vector<8x32xf32>
    %1292 = math.tanh %1291 : vector<8x32xf32>
    %cst_587 = arith.constant 5.000000e-01 : f32
    %1293 = vector.broadcast %cst_587 : f32 to vector<8x32xf32>
    %1294 = arith.mulf %1293, %1292 : vector<8x32xf32>
    %cst_588 = arith.constant 5.000000e-01 : f32
    %1295 = vector.broadcast %cst_588 : f32 to vector<8x32xf32>
    %1296 = arith.addf %1294, %1295 : vector<8x32xf32>
    %1297 = vector.extract_strided_slice %1276 {offsets = [0, 256], sizes = [8, 32], strides = [1, 1]} : vector<8x384xf32> to vector<8x32xf32>
    %c2_589 = arith.constant 2 : index
    %c0_590 = arith.constant 0 : index
    %c0_591 = arith.constant 0 : index
    %1298 = vector.load %arg5[%c2_589, %c0_590, %c0_591] : memref<4x1x128xf32, #tpu.memory_space<vmem>>, vector<1x1x128xf32>
    %1299 = vector.shape_cast %1298 : vector<1x1x128xf32> to vector<1x128xf32>
    %1300 = vector.extract_strided_slice %1299 {offsets = [0, 0], sizes = [1, 32], strides = [1, 1]} : vector<1x128xf32> to vector<1x32xf32>
    %1301 = vector.broadcast %1300 : vector<1x32xf32> to vector<8x32xf32>
    %1302 = arith.addf %1297, %1301 : vector<8x32xf32>
    %1303 = vector.extract_strided_slice %1273 {offsets = [0, 256], sizes = [8, 32], strides = [1, 1]} : vector<8x384xf32> to vector<8x32xf32>
    %1304 = arith.mulf %1289, %1302 : vector<8x32xf32>
    %1305 = arith.addf %1303, %1304 : vector<8x32xf32>
    %1306 = math.tanh %1305 : vector<8x32xf32>
    %1307 = arith.subf %1223, %1306 : vector<8x32xf32>
    %1308 = arith.mulf %1296, %1307 : vector<8x32xf32>
    %1309 = arith.addf %1306, %1308 : vector<8x32xf32>
    %c2_592 = arith.constant 2 : index
    %c0_593 = arith.constant 0 : index
    %c0_594 = arith.constant 0 : index
    %1310 = vector.load %arg2[%c2_592, %c0_593, %c0_594] : memref<3x32x384xf32, #tpu.memory_space<vmem>>, vector<1x32x384xf32>
    %1311 = vector.shape_cast %1310 : vector<1x32x384xf32> to vector<32x384xf32>
    %cst_595 = arith.constant dense<0.000000e+00> : vector<8x384xf32>
    %1312 = tpu.matmul %1223, %1311, %cst_595 {dimension_numbers = #tpu.dot_dimension_numbers<[1], [0], [0], [1], [0, 0, 1, 1], [], []>} : vector<8x32xf32>, vector<32x384xf32>, vector<8x384xf32> -> vector<8x384xf32>
    %c3_596 = arith.constant 3 : index
    %c0_597 = arith.constant 0 : index
    %c0_598 = arith.constant 0 : index
    %1313 = vector.load %arg4[%c3_596, %c0_597, %c0_598] : memref<4x1x384xf32, #tpu.memory_space<vmem>>, vector<1x1x384xf32>
    %1314 = vector.shape_cast %1313 : vector<1x1x384xf32> to vector<1x384xf32>
    %1315 = vector.broadcast %1314 : vector<1x384xf32> to vector<8x384xf32>
    %1316 = arith.addf %1312, %1315 : vector<8x384xf32>
    %c3_599 = arith.constant 3 : index
    %c0_600 = arith.constant 0 : index
    %c0_601 = arith.constant 0 : index
    %1317 = vector.load %arg3[%c3_599, %c0_600, %c0_601] : memref<4x32x384xf32, #tpu.memory_space<vmem>>, vector<1x32x384xf32>
    %1318 = vector.shape_cast %1317 : vector<1x32x384xf32> to vector<32x384xf32>
    %cst_602 = arith.constant dense<0.000000e+00> : vector<8x384xf32>
    %1319 = tpu.matmul %1266, %1318, %cst_602 {dimension_numbers = #tpu.dot_dimension_numbers<[1], [0], [0], [1], [0, 0, 1, 1], [], []>} : vector<8x32xf32>, vector<32x384xf32>, vector<8x384xf32> -> vector<8x384xf32>
    %1320 = vector.extract_strided_slice %1316 {offsets = [0, 0], sizes = [8, 32], strides = [1, 1]} : vector<8x384xf32> to vector<8x32xf32>
    %1321 = vector.extract_strided_slice %1319 {offsets = [0, 0], sizes = [8, 32], strides = [1, 1]} : vector<8x384xf32> to vector<8x32xf32>
    %1322 = arith.addf %1320, %1321 : vector<8x32xf32>
    %1323 = vector.extract_strided_slice %1316 {offsets = [0, 128], sizes = [8, 32], strides = [1, 1]} : vector<8x384xf32> to vector<8x32xf32>
    %1324 = vector.extract_strided_slice %1319 {offsets = [0, 128], sizes = [8, 32], strides = [1, 1]} : vector<8x384xf32> to vector<8x32xf32>
    %1325 = arith.addf %1323, %1324 : vector<8x32xf32>
    %cst_603 = arith.constant 5.000000e-01 : f32
    %1326 = vector.broadcast %cst_603 : f32 to vector<8x32xf32>
    %1327 = arith.mulf %1326, %1322 : vector<8x32xf32>
    %1328 = math.tanh %1327 : vector<8x32xf32>
    %cst_604 = arith.constant 5.000000e-01 : f32
    %1329 = vector.broadcast %cst_604 : f32 to vector<8x32xf32>
    %1330 = arith.mulf %1329, %1328 : vector<8x32xf32>
    %cst_605 = arith.constant 5.000000e-01 : f32
    %1331 = vector.broadcast %cst_605 : f32 to vector<8x32xf32>
    %1332 = arith.addf %1330, %1331 : vector<8x32xf32>
    %cst_606 = arith.constant 5.000000e-01 : f32
    %1333 = vector.broadcast %cst_606 : f32 to vector<8x32xf32>
    %1334 = arith.mulf %1333, %1325 : vector<8x32xf32>
    %1335 = math.tanh %1334 : vector<8x32xf32>
    %cst_607 = arith.constant 5.000000e-01 : f32
    %1336 = vector.broadcast %cst_607 : f32 to vector<8x32xf32>
    %1337 = arith.mulf %1336, %1335 : vector<8x32xf32>
    %cst_608 = arith.constant 5.000000e-01 : f32
    %1338 = vector.broadcast %cst_608 : f32 to vector<8x32xf32>
    %1339 = arith.addf %1337, %1338 : vector<8x32xf32>
    %1340 = vector.extract_strided_slice %1319 {offsets = [0, 256], sizes = [8, 32], strides = [1, 1]} : vector<8x384xf32> to vector<8x32xf32>
    %c3_609 = arith.constant 3 : index
    %c0_610 = arith.constant 0 : index
    %c0_611 = arith.constant 0 : index
    %1341 = vector.load %arg5[%c3_609, %c0_610, %c0_611] : memref<4x1x128xf32, #tpu.memory_space<vmem>>, vector<1x1x128xf32>
    %1342 = vector.shape_cast %1341 : vector<1x1x128xf32> to vector<1x128xf32>
    %1343 = vector.extract_strided_slice %1342 {offsets = [0, 0], sizes = [1, 32], strides = [1, 1]} : vector<1x128xf32> to vector<1x32xf32>
    %1344 = vector.broadcast %1343 : vector<1x32xf32> to vector<8x32xf32>
    %1345 = arith.addf %1340, %1344 : vector<8x32xf32>
    %1346 = vector.extract_strided_slice %1316 {offsets = [0, 256], sizes = [8, 32], strides = [1, 1]} : vector<8x384xf32> to vector<8x32xf32>
    %1347 = arith.mulf %1332, %1345 : vector<8x32xf32>
    %1348 = arith.addf %1346, %1347 : vector<8x32xf32>
    %1349 = math.tanh %1348 : vector<8x32xf32>
    %1350 = arith.subf %1266, %1349 : vector<8x32xf32>
    %1351 = arith.mulf %1339, %1350 : vector<8x32xf32>
    %1352 = arith.addf %1349, %1351 : vector<8x32xf32>
    %c2_612 = arith.constant 2 : index
    %c0_613 = arith.constant 0 : index
    %c0_614 = arith.constant 0 : index
    %1353 = vector.load %arg2[%c2_612, %c0_613, %c0_614] : memref<3x32x384xf32, #tpu.memory_space<vmem>>, vector<1x32x384xf32>
    %1354 = vector.shape_cast %1353 : vector<1x32x384xf32> to vector<32x384xf32>
    %cst_615 = arith.constant dense<0.000000e+00> : vector<8x384xf32>
    %1355 = tpu.matmul %1309, %1354, %cst_615 {dimension_numbers = #tpu.dot_dimension_numbers<[1], [0], [0], [1], [0, 0, 1, 1], [], []>} : vector<8x32xf32>, vector<32x384xf32>, vector<8x384xf32> -> vector<8x384xf32>
    %c3_616 = arith.constant 3 : index
    %c0_617 = arith.constant 0 : index
    %c0_618 = arith.constant 0 : index
    %1356 = vector.load %arg4[%c3_616, %c0_617, %c0_618] : memref<4x1x384xf32, #tpu.memory_space<vmem>>, vector<1x1x384xf32>
    %1357 = vector.shape_cast %1356 : vector<1x1x384xf32> to vector<1x384xf32>
    %1358 = vector.broadcast %1357 : vector<1x384xf32> to vector<8x384xf32>
    %1359 = arith.addf %1355, %1358 : vector<8x384xf32>
    %c3_619 = arith.constant 3 : index
    %c0_620 = arith.constant 0 : index
    %c0_621 = arith.constant 0 : index
    %1360 = vector.load %arg3[%c3_619, %c0_620, %c0_621] : memref<4x32x384xf32, #tpu.memory_space<vmem>>, vector<1x32x384xf32>
    %1361 = vector.shape_cast %1360 : vector<1x32x384xf32> to vector<32x384xf32>
    %cst_622 = arith.constant dense<0.000000e+00> : vector<8x384xf32>
    %1362 = tpu.matmul %1352, %1361, %cst_622 {dimension_numbers = #tpu.dot_dimension_numbers<[1], [0], [0], [1], [0, 0, 1, 1], [], []>} : vector<8x32xf32>, vector<32x384xf32>, vector<8x384xf32> -> vector<8x384xf32>
    %1363 = vector.extract_strided_slice %1359 {offsets = [0, 0], sizes = [8, 32], strides = [1, 1]} : vector<8x384xf32> to vector<8x32xf32>
    %1364 = vector.extract_strided_slice %1362 {offsets = [0, 0], sizes = [8, 32], strides = [1, 1]} : vector<8x384xf32> to vector<8x32xf32>
    %1365 = arith.addf %1363, %1364 : vector<8x32xf32>
    %1366 = vector.extract_strided_slice %1359 {offsets = [0, 128], sizes = [8, 32], strides = [1, 1]} : vector<8x384xf32> to vector<8x32xf32>
    %1367 = vector.extract_strided_slice %1362 {offsets = [0, 128], sizes = [8, 32], strides = [1, 1]} : vector<8x384xf32> to vector<8x32xf32>
    %1368 = arith.addf %1366, %1367 : vector<8x32xf32>
    %cst_623 = arith.constant 5.000000e-01 : f32
    %1369 = vector.broadcast %cst_623 : f32 to vector<8x32xf32>
    %1370 = arith.mulf %1369, %1365 : vector<8x32xf32>
    %1371 = math.tanh %1370 : vector<8x32xf32>
    %cst_624 = arith.constant 5.000000e-01 : f32
    %1372 = vector.broadcast %cst_624 : f32 to vector<8x32xf32>
    %1373 = arith.mulf %1372, %1371 : vector<8x32xf32>
    %cst_625 = arith.constant 5.000000e-01 : f32
    %1374 = vector.broadcast %cst_625 : f32 to vector<8x32xf32>
    %1375 = arith.addf %1373, %1374 : vector<8x32xf32>
    %cst_626 = arith.constant 5.000000e-01 : f32
    %1376 = vector.broadcast %cst_626 : f32 to vector<8x32xf32>
    %1377 = arith.mulf %1376, %1368 : vector<8x32xf32>
    %1378 = math.tanh %1377 : vector<8x32xf32>
    %cst_627 = arith.constant 5.000000e-01 : f32
    %1379 = vector.broadcast %cst_627 : f32 to vector<8x32xf32>
    %1380 = arith.mulf %1379, %1378 : vector<8x32xf32>
    %cst_628 = arith.constant 5.000000e-01 : f32
    %1381 = vector.broadcast %cst_628 : f32 to vector<8x32xf32>
    %1382 = arith.addf %1380, %1381 : vector<8x32xf32>
    %1383 = vector.extract_strided_slice %1362 {offsets = [0, 256], sizes = [8, 32], strides = [1, 1]} : vector<8x384xf32> to vector<8x32xf32>
    %c3_629 = arith.constant 3 : index
    %c0_630 = arith.constant 0 : index
    %c0_631 = arith.constant 0 : index
    %1384 = vector.load %arg5[%c3_629, %c0_630, %c0_631] : memref<4x1x128xf32, #tpu.memory_space<vmem>>, vector<1x1x128xf32>
    %1385 = vector.shape_cast %1384 : vector<1x1x128xf32> to vector<1x128xf32>
    %1386 = vector.extract_strided_slice %1385 {offsets = [0, 0], sizes = [1, 32], strides = [1, 1]} : vector<1x128xf32> to vector<1x32xf32>
    %1387 = vector.broadcast %1386 : vector<1x32xf32> to vector<8x32xf32>
    %1388 = arith.addf %1383, %1387 : vector<8x32xf32>
    %1389 = vector.extract_strided_slice %1359 {offsets = [0, 256], sizes = [8, 32], strides = [1, 1]} : vector<8x384xf32> to vector<8x32xf32>
    %1390 = arith.mulf %1375, %1388 : vector<8x32xf32>
    %1391 = arith.addf %1389, %1390 : vector<8x32xf32>
    %1392 = math.tanh %1391 : vector<8x32xf32>
    %1393 = arith.subf %1352, %1392 : vector<8x32xf32>
    %1394 = arith.mulf %1382, %1393 : vector<8x32xf32>
    %1395 = arith.addf %1392, %1394 : vector<8x32xf32>
    %c0_632 = arith.constant 0 : index
    %c0_633 = arith.constant 0 : index
    %1396 = vector.load %arg6[%c0_632, %c0_633] : memref<32x128xf32, #tpu.memory_space<vmem>>, vector<32x128xf32>
    %cst_634 = arith.constant dense<0.000000e+00> : vector<8x128xf32>
    %1397 = tpu.matmul %1395, %1396, %cst_634 {dimension_numbers = #tpu.dot_dimension_numbers<[1], [0], [0], [1], [0, 0, 1, 1], [], []>} : vector<8x32xf32>, vector<32x128xf32>, vector<8x128xf32> -> vector<8x128xf32>
    %c0_635 = arith.constant 0 : index
    %c0_636 = arith.constant 0 : index
    %1398 = vector.load %arg7[%c0_635, %c0_636] : memref<1x128xf32, #tpu.memory_space<vmem>>, vector<1x128xf32>
    %1399 = vector.broadcast %1398 : vector<1x128xf32> to vector<8x128xf32>
    %1400 = arith.addf %1397, %1399 : vector<8x128xf32>
    %c0_637 = arith.constant 0 : index
    %c0_638 = arith.constant 0 : index
    %1401 = vector.load %arg8[%c0_637, %c0_638] : memref<8x128xf32, #tpu.memory_space<vmem>>, vector<8x128xf32>
    tpu.vector_store %arg8[%c0_637, %c0_638], %1400 {strides = array<i32>} : memref<8x128xf32, #tpu.memory_space<vmem>>, vector<8x128xf32>,
    return
  }
}

</mosaic_0001>

<bundles_post_ra>
// kernel: gru_model_forward.1
= control target key start
LH: loop header
LB: loop body
LE: loop exit
PB: predicated region body
PF: predicated region fallthrough
CT: control target
= control target key end

     0   :  { %v12781_v3 = vmov 0.0   ;;  %v12783_v4 = vmov 0.0|0.0   ;;  %vm11140_vm0 = vmmov 0   ;;  %v11141_v9 = vmov 0   ;;  %s12772_s3 = inlined_call_operand.vmem [shape: f32[4,32,384], index: 3, kind: input, shape index: {}]   ;;  %s12773_s0 = inlined_call_operand.vmem [shape: f32[64,1], index: 0, kind: input, shape index: {}]   ;;  %s12774_s2 = inlined_call_operand.vmem [shape: f32[3,32,384], index: 2, kind: input, shape index: {}]   ;;  %s12775_s1 = inlined_call_operand.vmem [shape: f32[1,384], index: 1, kind: input, shape index: {}]   ;;  %s12776_s4 = inlined_call_operand.vmem [shape: f32[4,1,384], index: 4, kind: input, shape index: {}]   ;;  %s12777_s5 = inlined_call_operand.vmem [shape: f32[4,1,128], index: 5, kind: input, shape index: {}]   ;;  %s12778_s6 = inlined_call_operand.vmem [shape: f32[32,128], index: 6, kind: input, shape index: {}]   ;;  %s12779_s7 = inlined_call_operand.vmem [shape: f32[1,128], index: 7, kind: input, shape index: {}]   ;;  %s12780_s8 = inlined_call_operand.vmem [shape: f32[8,128], index: 8, kind: output, shape index: {}]  }
   0x1   :  { %v76_v0 = vld [vmem:[%s12772_s3 + $0x8] sm:$0xff]  ;;  %v79_v1 = vld [vmem:[%s12772_s3 + $0x20] sm:$0xff]  ;;  %155 = vmatprep.mubr.f32.mxu0 %v12781_v3  ;;  %10055 = vmatprep.subr.bf16.mxu1 %v12783_v4  ;;  %v78_v6 = vld [vmem:[%s12772_s3 + $0x18] sm:$0xff]  ;;  %v37_v28 = vlaneseq  ;;  %vm87_vm1 = vcmask 261120  }
   0x2   :  { %v75_v2 = vld [vmem:[%s12772_s3] sm:$0xff]  ;;  %v11198_v5 = vpack.c.bf16 %v79_v1, %v76_v0  ;;  %v82_v7 = vld [vmem:[%s12772_s3 + $0x38] sm:$0xff]  ;;  %v85_v8 = vld [vmem:[%s12772_s3 + $0x50] sm:$0xff]  ;;  %9428 = vmatprep.mubr.msk.f32.mxu1 %vm11140_vm0, %v12781_v3  ;;  %10937 = vset.pattern.permute.xlu0 %v11141_v9 }
   0x3   :  { %v11211_v10 = vpack.c.bf16 %v78_v6, %v75_v2  ;;  %v11213_v11 = vpack.c.bf16 %v85_v8, %v82_v7  ;;  %v81_v12 = vld [vmem:[%s12772_s3 + $0x30] sm:$0xff]  ;;  %v84_v13 = vld [vmem:[%s12772_s3 + $0x48] sm:$0xff]  ;;  %10938 = vset.pattern.permute.xlu1 %v11141_v9  ;;  %v83_v16 = vld [vmem:[%s12772_s3 + $0x40] sm:$0xff]  ;;  %v38_v29 = vshrl.u32 %v37_v28, 7 }
   0x4   :  { %12844 = vst [vmem:[#allocation2_spill] sm:$0xff] %v11198_v5  ;;  %v77_v14 = vld [vmem:[%s12772_s3 + $0x10] sm:$0xff]  ;;  %10048 = vmatprep.subr.bf16.mxu0 %v11198_v5  ;;  %v80_v15 = vld [vmem:[%s12772_s3 + $0x28] sm:$0xff]  ;;  %v86_v17 = vld [vmem:[%s12772_s3 + $0x58] sm:$0xff]  ;;  %v11235_v18 = vpack.c.bf16 %v84_v13, %v81_v12 }
   0x5   :  { %12845 = vst [vmem:[#allocation3_spill] sm:$0xff] %v11211_v10  ;;  %12846 = vst [vmem:[#allocation4_spill] sm:$0xff] %v11213_v11  ;;  %10050 = vmatpush1.bf16.msra.mxu0 %v11211_v10  ;;  %v11237_v19 = vpack.c.bf16 %v80_v15, %v77_v14  ;;  %v29_v20 = vld [vmem:[%s12773_s0] sm:$0xff]  ;;  %v11244_v21 = vpack.c.bf16 %v86_v17, %v83_v16  ;;  %v256_v22 = vld [vmem:[%s12773_s0 + $0x8] sm:$0xff]  ;;  %v11281_v30 = vsub.s32 0, %v38_v29  ;;  %v11296_v37 = vsub.s32 1, %v38_v29 }
   0x6   :  { %12847 = vst [vmem:[#allocation5_spill] sm:$0xff] %v11235_v18  ;;  %10052 = vmatprep.subr.bf16.mxu0 %v11213_v11  ;;  %33 = vperm.xlu0 %10937, %v29_v20   ;;  %v2733_v23 = vld [vmem:[%s12773_s0 + $0x20] sm:$0xff]  ;;  %v4891_v24 = vld [vmem:[%s12773_s0 + $0x30] sm:$0xff]  ;;  %v430_v25 = vld [vmem:[%s12774_s2 + $0x8] sm:$0xff]  ;;  %v11307_v49 = vsub.s32 2, %v38_v29 }
   0x7   :  { %12848 = vst [vmem:[#allocation6_spill] sm:$0xff] %v11237_v19  ;;  %10057 = vmatpush3.bf16.msra.mxu1 %v11237_v19  ;;  %12849 = vst [vmem:[#allocation7_spill] sm:$0xff] %v11244_v21  ;;  %v433_v26 = vld [vmem:[%s12774_s2 + $0x20] sm:$0xff]  ;;  %v432_v8 = vld [vmem:[%s12774_s2 + $0x18] sm:$0xff] }
   0x8   :  { %10058 = vmatprep.subr.bf16.mxu1 %v12783_v4  ;;  %v11278_v27 = vpack.c.bf16 %v433_v26, %v430_v25  ;;  %12851 = vst [vmem:[#allocation9_spill] sm:$0xff] %v11281_v30  ;;  %v30_v31 = vld [vmem:[%s12775_s1] sm:$0x7]  ;;  %v431_v9 = vld [vmem:[%s12774_s2 + $0x10] sm:$0xff]  ;;  %v434_v12 = vld [vmem:[%s12774_s2 + $0x28] sm:$0xff] }
   0x9   :  { %10054 = vmatpush1.bf16.msra.mxu0 %v11235_v18  ;;  %v11287_v32 = vrot.slane %v30_v31, %v11281_v30  ;;  %v55_v33 = vld [vmem:[%s12776_s4] sm:$0x7]  ;;  %v11300_v39 = vrot.slane %v30_v31, %v11296_v37  ;;  %v11310_v51 = vrot.slane %v30_v31, %v11307_v49  ;;  %v436_v13 = vld [vmem:[%s12774_s2 + $0x38] sm:$0xff]  ;;  %v439_v14 = vld [vmem:[%s12774_s2 + $0x50] sm:$0xff]  ;;  %v11343_v17 = vpack.c.bf16 %v434_v12, %v431_v9 }
   0xa   :  { %259 = vperm.xlu0 %10937, %v256_v22   ;;  %10062 = vmatprep.subr.bf16.mxu0 %v11198_v5  ;;  %12850 = vst [vmem:[#allocation8_spill] sm:$0xff] %v11278_v27  ;;  %v11294_v36 = vrot.slane %v55_v33, %v11281_v30  ;;  %v11304_v44 = vrot.slane %v55_v33, %v11296_v37  ;;  %v11315_v52 = vld [vmem:[%s12777_s5] ss:$0 sm:$0xff]  ;;  %v435_v20 = vld [vmem:[%s12774_s2 + $0x30] sm:$0xff]  ;;  %v440_v26 = vld [vmem:[%s12774_s2 + $0x58] sm:$0xff] }
   0xb   :  { %10060 = vmatpush3.bf16.msra.mxu1 %v11244_v21  ;;  %12852 = vst [vmem:[#allocation10_spill] sm:$0xff] %v11287_v32  ;;  %12854 = vst [vmem:[#allocation12_spill] sm:$0xff] %v11300_v39  ;;  %v11318_v55 = vrot.slane %v55_v33, %v11307_v49  ;;  %v429_v2 = vld [vmem:[%s12774_s2] sm:$0xff]  ;;  %v8966_v28 = vld [vmem:[%s12772_s3 + $0x68] sm:$0xff] }
   0xc   :  { %156 = vmatmul.mubr.f32.vlgmr.msra.gmra.mrb[0].mxu0 %v12781_v3  ;;  %10069 = vmatprep.subr.bf16.mxu1 %v12783_v4  ;;  %12853 = vst [vmem:[#allocation11_spill] sm:$0xff] %v11294_v36  ;;  %12855 = vst [vmem:[#allocation13_spill] sm:$0xff] %v11304_v44  ;;  %v11341_v16 = vpack.c.bf16 %v432_v8, %v429_v2  ;;  %v437_v25 = vld [vmem:[%s12774_s2 + $0x40] sm:$0xff] }
   0xd   :  { %10064 = vmatpush1.bf16.msra.mxu0 %v11211_v10  ;;  %335 = vmatprep.mubr.f32.mxu0 %v12781_v3  ;;  %12856 = vst [vmem:[#allocation14_spill] sm:$0xff] %v11310_v51  ;;  %12857 = vst [vmem:[#allocation15_spill] sm:$0xff] %v11318_v55  ;;  %v8969_v29 = vld [vmem:[%s12772_s3 + $0x80] sm:$0xff]  ;;  %v11375_v33 = vpack.c.bf16 %v440_v26, %v437_v25 }
   0xe   :  { %9429 = vmatmul.mubr.f32.vlgmr.msra.gmra.mrb[0].mxu1 %v12781_v3  ;;  %2736 = vperm.xlu0 %10937, %v2733_v23   ;;  %v11350_v23 = vpack.c.bf16 %v439_v14, %v436_v13 }
   0xf   :  { %10071 = vmatpush3.bf16.msra.mxu1 %v11237_v19  ;;  %10066 = vmatprep.subr.bf16.mxu0 %v11213_v11 }
  0x10   :  { %10072 = vmatprep.subr.bf16.mxu1 %v12783_v4  ;;  %9439 = vmatprep.mubr.msk.f32.mxu1 %vm11140_vm0, %v12781_v3 }
  0x11   :  { %10068 = vmatpush1.bf16.msra.mxu0 %v11235_v18 }
  0x12   :  { %4894 = vperm.xlu0 %10937, %v4891_v24   ;;  %10076 = vmatprep.subr.bf16.mxu0 %v11278_v27  ;;  %v438_v24 = vld [vmem:[%s12774_s2 + $0x48] sm:$0xff] }
  0x13   :  { %10074 = vmatpush3.bf16.msra.mxu1 %v11244_v21  ;;  %v11373_v31 = vpack.c.bf16 %v438_v24, %v435_v20  ;;  %v8962_v24 = vld [vmem:[%s12776_s4 + $0x3] sm:$0x7] }
  0x14   :  { %10083 = vmatprep.subr.bf16.mxu1 %v12783_v4  ;;  %v11476_v25 = vrot.slane %v8962_v24, %v11281_v30 }
  0x16   :  { %12858 = vst [vmem:[#allocation16_spill] sm:$0xff] %v11476_v25 }
  0x85   :  { %v34_v34 = vpop.permute.xlu0 %33 }
  0x86   :  { %v52_v35 = vmul.f32 %v11287_v32, %v34_v34  ;;  %v53_v43 = vmul.f32 %v11300_v39, %v34_v34  ;;  %v54_v56 = vmul.f32 %v11310_v51, %v34_v34  ;;  %v11379_v34 = vpack.c.bf16 %v8969_v29, %v8966_v28 }
  0x88   :  { %v72_v38 = vadd.f32 %v11294_v36, %v52_v35  ;;  %v73_v48 = vadd.f32 %v11304_v44, %v53_v43  ;;  %v74_v60 = vadd.f32 %v11318_v55, %v54_v56  ;;  %v8965_v35 = vld [vmem:[%s12772_s3 + $0x60] sm:$0xff]  ;;  %v8970_v43 = vld [vmem:[%s12772_s3 + $0x88] sm:$0xff] }
  0xdf   :  { %v157_v40 = vpop.f32.mrb[0].mxu0 }
  0xe0   :  { %v232_v41 = vadd.f32 %v157_v40, %v72_v38  ;;  %v159_v42 = vpop.f32.mrb[1].mxu0  ;;  %v8968_v38 = vld [vmem:[%s12772_s3 + $0x78] sm:$0xff] }
  0xe1   :  { %v228_v45 = vpop.f32.mrb[0].mxu1  ;;  %v233_v50 = vadd.f32 %v159_v42, %v73_v48  ;;  %v8972_v40 = vld [vmem:[%s12772_s3 + $0x98] sm:$0xff]  ;;  %v8967_v42 = vld [vmem:[%s12772_s3 + $0x70] sm:$0xff]  ;;  %v8974_v48 = vld [vmem:[%s12772_s3 + $0xa8] sm:$0xff] }
  0xe2   :  { %v234_v46 = vmul.f32 0.5, %v232_v41  ;;  %v9430_v47 = vpop.f32.mrb[1].mxu1  ;;  %v249_v58 = vadd.f32 %v11315_v52, %v228_v45  ;;  %v8975_v41 = vld [vmem:[%s12772_s3 + $0xb0] sm:$0xff]  ;;  %v11404_v45 = vpack.c.bf16 %v8968_v38, %v8965_v35 }
  0xe3   :  { %v238_v53 = vmul.f32 0.5, %v233_v50  ;;  %v8971_v47 = vld [vmem:[%s12772_s3 + $0x90] sm:$0xff]  ;;  %v11416_v50 = vpack.c.bf16 %v8970_v43, %v8967_v42 }
  0xe4   :  { %10939 = vtanh.f32 %v234_v46  ;;  %v11407_v46 = vpack.c.bf16 %v8975_v41, %v8972_v40  ;;  %v11429_v56 = vpack.c.bf16 %v8974_v48, %v8971_v47 }
  0xe5   :  { %10941 = vtanh.f32 %v238_v53  ;;  %v8973_v53 = vld [vmem:[%s12772_s3 + $0xa0] sm:$0xff] }
  0xee   :  { %v10940_v54 = vpop.eup %10939 }
  0xef   :  { %v236_v57 = vmul.f32 0.5, %v10940_v54  ;;  %v10942_v63 = vpop.eup %10941  ;;  %v8976_v54 = vld [vmem:[%s12772_s3 + $0xb8] sm:$0xff] }
  0xf0   :  { %v240_v0 = vmul.f32 0.5, %v10942_v63 }
  0xf1   :  { %v237_v59 = vadd.f32 0.5, %v236_v57  ;;  %v11434_v57 = vpack.c.bf16 %v8976_v54, %v8973_v53 }
  0xf2   :  { %v241_v6 = vadd.f32 0.5, %v240_v0 }
  0xf3   :  { %v250_v61 = vmul.f32 %v249_v58, %v237_v59  ;;  %v779_v58 = vld [vmem:[%s12773_s0 + $0x10] sm:$0xff]  ;;  %v1605_v59 = vld [vmem:[%s12773_s0 + $0x18] sm:$0xff] }
  0xf4   :  { %782 = vperm.xlu1 %10938, %v779_v58  }
  0xf5   :  { %v251_v62 = vadd.f32 %v250_v61, %v74_v60  ;;  %v3812_v60 = vld [vmem:[%s12773_s0 + $0x28] sm:$0xff]  ;;  %v5970_v61 = vld [vmem:[%s12773_s0 + $0x38] sm:$0xff] }
  0xf7   :  { %10943 = vtanh.f32 %v251_v62  ;;  %v260_v62 = vpop.permute.xlu0 %259 }
  0xf8   :  { %1608 = vperm.xlu1 %10938, %v1605_v59   ;;  %v262_v63 = vmul.f32 %v260_v62, %v11287_v32  ;;  %v263_v12 = vmul.f32 %v260_v62, %v11300_v39  ;;  %v264_v29 = vmul.f32 %v260_v62, %v11310_v51 }
  0xfa   :  { %v265_v0 = vadd.f32 %v262_v63, %v11294_v36  ;;  %v266_v13 = vadd.f32 %v263_v12, %v11304_v44  ;;  %v267_v54 = vadd.f32 %v264_v29, %v11318_v55  ;;  %v11489_v63 = vld [vmem:[%s12777_s5 + $0x1] ss:$0 sm:$0xff] }
  0xfc   :  { %3815 = vperm.xlu1 %10938, %v3812_v60   ;;  %v11483_v60 = vrot.slane %v8962_v24, %v11296_v37 }
  0xfe   :  { %12859 = vst [vmem:[#allocation17_spill] sm:$0xff] %v11483_v60 }
 0x100   :  { %5973 = vperm.xlu1 %10938, %v5970_v61  }
 0x101   :  { %v10944_v1 = vpop.eup %10943 }
 0x102   :  { %v253_v7 = vsub.f32 0.0, %v10944_v1 }
 0x104   :  { %v254_v15 = vmul.f32 %v253_v7, %v241_v6 }
 0x106   :  { %v11348_v22 = vadd.f32 %v10944_v1, %v254_v15 }
 0x108   :  { %8960 = vmatmul.mubr.msk.f32.vlgmr.msra.gmra.mrb[2].mxu0 %vm87_vm1, %v11348_v22  ;;  %9440 = vmatmul.mubr.msk.f32.vlgmr.msra.gmra.mrb[2].mxu1 %vm87_vm1, %v11348_v22 }
 0x109   :  { %10078 = vmatpush1.bf16.msra.mxu0 %v11341_v16  ;;  %10085 = vmatpush3.bf16.msra.mxu1 %v11343_v17 }
 0x10a   :  { %10080 = vmatprep.subr.bf16.mxu0 %v11350_v23  ;;  %10086 = vmatprep.subr.bf16.mxu1 %v12783_v4 }
 0x10b   :  { %523 = vmatprep.mubr.f32.mxu0 %v12781_v3  ;;  %9450 = vmatprep.mubr.msk.f32.mxu1 %vm11140_vm0, %v12781_v3 }
 0x10d   :  { %10082 = vmatpush1.bf16.msra.mxu0 %v11373_v31  ;;  %10088 = vmatpush3.bf16.msra.mxu1 %v11375_v33 }
 0x10e   :  { %10090 = vmatprep.subr.bf16.mxu0 %v11379_v34  ;;  %10097 = vmatprep.subr.bf16.mxu1 %v12783_v4 }
 0x110   :  { %8963 = vmatmul.mubr.msk.f32.vlgmr.msra.gmra.mrb[4].mxu0 %vm87_vm1, %v11348_v22  ;;  %9451 = vmatmul.mubr.msk.f32.vlgmr.msra.gmra.mrb[4].mxu1 %vm87_vm1, %v11348_v22 }
 0x111   :  { %10092 = vmatpush1.bf16.msra.mxu0 %v11404_v45  ;;  %677 = vmatprep.mubr.f32.mxu0 %v12781_v3 }
 0x112   :  { %10094 = vmatprep.subr.bf16.mxu0 %v11407_v46  ;;  %10099 = vmatpush3.bf16.msra.mxu1 %v11416_v50 }
 0x113   :  { %10100 = vmatprep.subr.bf16.mxu1 %v12783_v4  ;;  %9461 = vmatprep.mubr.msk.f32.mxu1 %vm11140_vm0, %v12781_v3 }
 0x115   :  { %10096 = vmatpush1.bf16.msra.mxu0 %v11429_v56 }
 0x116   :  { %10102 = vmatpush3.bf16.msra.mxu1 %v11434_v57  ;;  %10104 = vmatprep.subr.bf16.mxu0 %v11198_v5 }
 0x117   :  { %10111 = vmatprep.subr.bf16.mxu1 %v12783_v4 }
 0x118   :  { %678 = vmatmul.mubr.f32.vlgmr.msra.gmra.mrb[4].mxu0 %v12781_v3 }
 0x119   :  { %9462 = vmatmul.mubr.f32.vlgmr.msra.gmra.mrb[6].mxu1 %v12781_v3  ;;  %10106 = vmatpush1.bf16.msra.mxu0 %v11211_v10 }
 0x11a   :  { %10113 = vmatpush3.bf16.msra.mxu1 %v11237_v19  ;;  %10108 = vmatprep.subr.bf16.mxu0 %v11213_v11 }
 0x11b   :  { %10114 = vmatprep.subr.bf16.mxu1 %v12783_v4  ;;  %858 = vmatprep.mubr.f32.mxu0 %v12781_v3 }
 0x11c   :  { %9472 = vmatprep.mubr.msk.f32.mxu1 %vm11140_vm0, %v12781_v3 }
 0x11d   :  { %10110 = vmatpush1.bf16.msra.mxu0 %v11235_v18 }
 0x11e   :  { %10116 = vmatpush3.bf16.msra.mxu1 %v11244_v21  ;;  %10118 = vmatprep.subr.bf16.mxu0 %v11278_v27 }
 0x11f   :  { %10125 = vmatprep.subr.bf16.mxu1 %v12783_v4 }
 0x1db   :  { %v337_v1 = vpop.f32.mrb[2].mxu0  ;;  %v408_v2 = vpop.f32.mrb[2].mxu1 }
 0x1dc   :  { %v412_v6 = vadd.f32 %v337_v1, %v265_v0  ;;  %v339_v7 = vpop.f32.mrb[3].mxu0  ;;  %v9441_v8 = vpop.f32.mrb[3].mxu1  ;;  %v422_v47 = vadd.f32 %v11315_v52, %v408_v2 }
 0x1dd   :  { %v413_v20 = vadd.f32 %v339_v7, %v266_v13 }
 0x1de   :  { %v414_v9 = vmul.f32 0.5, %v412_v6  ;;  %v11492_v6 = vrot.slane %v8962_v24, %v11307_v49  ;;  %v8986_v24 = vld [vmem:[%s12774_s2 + $0x68] sm:$0xff] }
 0x1df   :  { %v418_v26 = vmul.f32 0.5, %v413_v20 }
 0x1e0   :  { %10945 = vtanh.f32 %v414_v9 }
 0x1e1   :  { %10947 = vtanh.f32 %v418_v26 }
 0x1e3   :  { %v596_v14 = vpop.f32.mrb[4].mxu1 }
 0x1e4   :  { %v9452_v15 = vpop.f32.mrb[5].mxu1  ;;  %v597_v20 = vadd.f32 %v596_v14, %v11492_v6 }
 0x1ea   :  { %v10946_v28 = vpop.eup %10945 }
 0x1eb   :  { %v416_v35 = vmul.f32 0.5, %v10946_v28  ;;  %v679_v38 = vpop.f32.mrb[4].mxu0  ;;  %v10948_v62 = vpop.eup %10947 }
 0x1ec   :  { %v10837_v40 = vadd.f32 %v679_v38, %v11476_v25  ;;  %v681_v41 = vpop.f32.mrb[5].mxu0  ;;  %v750_v42 = vpop.f32.mrb[6].mxu1  ;;  %v420_v2 = vmul.f32 0.5, %v10948_v62  ;;  %v8989_v38 = vld [vmem:[%s12774_s2 + $0x80] sm:$0xff] }
 0x1ed   :  { %v417_v43 = vadd.f32 0.5, %v416_v35  ;;  %v9463_v48 = vpop.f32.mrb[7].mxu1  ;;  %v10838_v61 = vadd.f32 %v681_v41, %v11483_v60  ;;  %v772_v8 = vadd.f32 %v11489_v63, %v750_v42  ;;  %v8985_v41 = vld [vmem:[%s12774_s2 + $0x60] sm:$0xff] }
 0x1ee   :  { %v756_v53 = vmul.f32 0.5, %v10837_v40  ;;  %v421_v13 = vadd.f32 0.5, %v420_v2  ;;  %v8988_v48 = vld [vmem:[%s12774_s2 + $0x78] sm:$0xff] }
 0x1ef   :  { %v423_v58 = vmul.f32 %v422_v47, %v417_v43  ;;  %v760_v0 = vmul.f32 0.5, %v10838_v61  ;;  %v11531_v47 = vpack.c.bf16 %v8989_v38, %v8986_v24  ;;  %v11553_v62 = vpack.c.bf16 %v8988_v48, %v8985_v41  ;;  %v9010_v24 = vld [vmem:[%s12772_s3 + $0x110] sm:$0xff]  ;;  %v9009_v48 = vld [vmem:[%s12772_s3 + $0x108] sm:$0xff] }
 0x1f0   :  { %10949 = vtanh.f32 %v756_v53  ;;  %v8987_v53 = vld [vmem:[%s12774_s2 + $0x70] sm:$0xff] }
 0x1f1   :  { %v424_v59 = vadd.f32 %v423_v58, %v267_v54  ;;  %v8990_v54 = vld [vmem:[%s12774_s2 + $0x88] sm:$0xff]  ;;  %v8992_v58 = vld [vmem:[%s12774_s2 + $0x98] sm:$0xff]  ;;  %v9002_v38 = vld [vmem:[%s12772_s3 + $0xd0] sm:$0xff] }
 0x1f3   :  { %10951 = vtanh.f32 %v424_v59  ;;  %v8995_v59 = vld [vmem:[%s12774_s2 + $0xb0] sm:$0xff] }
 0x1f4   :  { %10953 = vtanh.f32 %v760_v0  ;;  %v11555_v0 = vpack.c.bf16 %v8990_v54, %v8987_v53  ;;  %v9008_v54 = vld [vmem:[%s12772_s3 + $0x100] sm:$0xff] }
 0x1fa   :  { %v10950_v1 = vpop.eup %10949 }
 0x1fb   :  { %v758_v7 = vmul.f32 0.5, %v10950_v1  ;;  %v8991_v1 = vld [vmem:[%s12774_s2 + $0x90] sm:$0xff] }
 0x1fd   :  { %v10952_v9 = vpop.eup %10951  ;;  %v759_v12 = vadd.f32 0.5, %v758_v7  ;;  %v11564_v7 = vpack.c.bf16 %v8995_v59, %v8992_v58  ;;  %v9011_v58 = vld [vmem:[%s12772_s3 + $0x118] sm:$0xff] }
 0x1fe   :  { %v426_v15 = vsub.f32 %v11348_v22, %v10952_v9  ;;  %v10954_v22 = vpop.eup %10953 }
 0x1ff   :  { %v773_v26 = vmul.f32 %v772_v8, %v759_v12  ;;  %v762_v14 = vmul.f32 0.5, %v10954_v22  ;;  %v8994_v8 = vld [vmem:[%s12774_s2 + $0xa8] sm:$0xff]  ;;  %v8996_v12 = vld [vmem:[%s12774_s2 + $0xb8] sm:$0xff] }
 0x200   :  { %v427_v28 = vmul.f32 %v426_v15, %v421_v13  ;;  %v9001_v13 = vld [vmem:[%s12772_s3 + $0xc8] sm:$0xff]  ;;  %v9004_v15 = vld [vmem:[%s12772_s3 + $0xe0] sm:$0xff]  ;;  %v9003_v22 = vld [vmem:[%s12772_s3 + $0xd8] sm:$0xff] }
 0x201   :  { %v774_v29 = vadd.f32 %v773_v26, %v597_v20  ;;  %v763_v42 = vadd.f32 0.5, %v762_v14  ;;  %v11587_v20 = vpack.c.bf16 %v8994_v8, %v8991_v1  ;;  %v9007_v14 = vld [vmem:[%s12772_s3 + $0xf8] sm:$0xff]  ;;  %v783_v1 = vpop.permute.xlu1 %782 }
 0x202   :  { %v11497_v35 = vadd.f32 %v10952_v9, %v427_v28  ;;  %v8993_v9 = vld [vmem:[%s12774_s2 + $0xa0] sm:$0xff]  ;;  %v11593_v28 = vpack.c.bf16 %v9004_v15, %v9001_v13  ;;  %v785_v8 = vmul.f32 %v783_v1, %v11287_v32 }
 0x203   :  { %10955 = vtanh.f32 %v774_v29  ;;  %v11589_v26 = vpack.c.bf16 %v8996_v12, %v8993_v9  ;;  %v9000_v29 = vld [vmem:[%s12772_s3 + $0xc0] sm:$0xff] }
 0x204   :  { %8979 = vmatmul.mubr.msk.f32.vlgmr.msra.gmra.mrb[6].mxu0 %vm87_vm1, %v11497_v35  ;;  %9473 = vmatmul.mubr.msk.f32.vlgmr.msra.gmra.mrb[8].mxu1 %vm87_vm1, %v11497_v35  ;;  %v11618_v41 = vpack.c.bf16 %v9003_v22, %v9000_v29  ;;  %v788_v9 = vadd.f32 %v785_v8, %v11294_v36 }
 0x205   :  { %10120 = vmatpush1.bf16.msra.mxu0 %v11341_v16  ;;  %10127 = vmatpush3.bf16.msra.mxu1 %v11343_v17 }
 0x206   :  { %10122 = vmatprep.subr.bf16.mxu0 %v11350_v23  ;;  %10128 = vmatprep.subr.bf16.mxu1 %v12783_v4 }
 0x207   :  { %1016 = vmatprep.mubr.f32.mxu0 %v12781_v3  ;;  %9483 = vmatprep.mubr.msk.f32.mxu1 %vm11140_vm0, %v12781_v3 }
 0x209   :  { %10124 = vmatpush1.bf16.msra.mxu0 %v11373_v31  ;;  %10130 = vmatpush3.bf16.msra.mxu1 %v11375_v33 }
 0x20a   :  { %10132 = vmatprep.subr.bf16.mxu0 %v11379_v34  ;;  %10139 = vmatprep.subr.bf16.mxu1 %v12783_v4 }
 0x20c   :  { %8981 = vmatmul.mubr.msk.f32.vlgmr.msra.gmra.mrb[8].mxu0 %vm87_vm1, %v11497_v35  ;;  %9484 = vmatmul.mubr.msk.f32.vlgmr.msra.gmra.mrb[10].mxu1 %vm87_vm1, %v11497_v35 }
 0x20d   :  { %v10956_v40 = vpop.eup %10955  ;;  %10134 = vmatpush1.bf16.msra.mxu0 %v11404_v45  ;;  %10141 = vmatpush3.bf16.msra.mxu1 %v11416_v50 }
 0x20e   :  { %10136 = vmatprep.subr.bf16.mxu0 %v11407_v46  ;;  %10142 = vmatprep.subr.bf16.mxu1 %v12783_v4  ;;  %v776_v43 = vsub.f32 0.0, %v10956_v40 }
 0x20f   :  { %1160 = vmatprep.mubr.f32.mxu0 %v12781_v3  ;;  %9494 = vmatprep.mubr.msk.f32.mxu1 %vm11140_vm0, %v12781_v3 }
 0x210   :  { %v777_v61 = vmul.f32 %v776_v43, %v763_v42  ;;  %v11621_v42 = vpack.c.bf16 %v9010_v24, %v9007_v14  ;;  %v9006_v43 = vld [vmem:[%s12772_s3 + $0xf0] sm:$0xff]  ;;  %v786_v14 = vmul.f32 %v783_v1, %v11300_v39 }
 0x211   :  { %10138 = vmatpush1.bf16.msra.mxu0 %v11429_v56  ;;  %10144 = vmatpush3.bf16.msra.mxu1 %v11434_v57  ;;  %v11643_v59 = vpack.c.bf16 %v9009_v48, %v9006_v43 }
 0x212   :  { %v11560_v2 = vadd.f32 %v10956_v40, %v777_v61  ;;  %10146 = vmatprep.subr.bf16.mxu0 %v11531_v47  ;;  %10153 = vmatprep.subr.bf16.mxu1 %v12783_v4  ;;  %v9005_v40 = vld [vmem:[%s12772_s3 + $0xe8] sm:$0xff]  ;;  %v11648_v61 = vpack.c.bf16 %v9011_v58, %v9008_v54 }
 0x213   :  { %v11630_v53 = vpack.c.bf16 %v9005_v40, %v9002_v38  ;;  %v789_v38 = vadd.f32 %v786_v14, %v11304_v44 }
 0x214   :  { %8983 = vmatmul.mubr.msk.f32.vlgmr.msra.gmra.mrb[8].mxu0 %vm87_vm1, %v11560_v2  ;;  %9495 = vmatmul.mubr.msk.f32.vlgmr.msra.gmra.mrb[12].mxu1 %vm87_vm1, %v11560_v2 }
 0x215   :  { %10148 = vmatpush1.bf16.msra.mxu0 %v11553_v62  ;;  %10155 = vmatpush3.bf16.msra.mxu1 %v11555_v0 }
 0x216   :  { %10150 = vmatprep.subr.bf16.mxu0 %v11564_v7  ;;  %10156 = vmatprep.subr.bf16.mxu1 %v12783_v4 }
 0x217   :  { %1349 = vmatprep.mubr.f32.mxu0 %v12781_v3  ;;  %9505 = vmatprep.mubr.msk.f32.mxu1 %vm11140_vm0, %v12781_v3 }
 0x219   :  { %10152 = vmatpush1.bf16.msra.mxu0 %v11587_v20  ;;  %10158 = vmatpush3.bf16.msra.mxu1 %v11589_v26 }
 0x21a   :  { %10160 = vmatprep.subr.bf16.mxu0 %v11593_v28  ;;  %10167 = vmatprep.subr.bf16.mxu1 %v12783_v4 }
 0x21c   :  { %8998 = vmatmul.mubr.msk.f32.vlgmr.msra.gmra.mrb[10].mxu0 %vm87_vm1, %v11560_v2  ;;  %9506 = vmatmul.mubr.msk.f32.vlgmr.msra.gmra.mrb[14].mxu1 %vm87_vm1, %v11560_v2 }
 0x21d   :  { %10162 = vmatpush1.bf16.msra.mxu0 %v11618_v41  ;;  %1503 = vmatprep.mubr.f32.mxu0 %v12781_v3 }
 0x21e   :  { %10164 = vmatprep.subr.bf16.mxu0 %v11621_v42  ;;  %10169 = vmatpush3.bf16.msra.mxu1 %v11630_v53 }
 0x21f   :  { %10170 = vmatprep.subr.bf16.mxu1 %v12783_v4  ;;  %9516 = vmatprep.mubr.msk.f32.mxu1 %vm11140_vm0, %v12781_v3 }
 0x221   :  { %10166 = vmatpush1.bf16.msra.mxu0 %v11643_v59 }
 0x222   :  { %10172 = vmatpush3.bf16.msra.mxu1 %v11648_v61  ;;  %10174 = vmatprep.subr.bf16.mxu0 %v11198_v5 }
 0x223   :  { %10181 = vmatprep.subr.bf16.mxu1 %v12783_v4 }
 0x224   :  { %1504 = vmatmul.mubr.f32.vlgmr.msra.gmra.mrb[10].mxu0 %v12781_v3 }
 0x225   :  { %9517 = vmatmul.mubr.f32.vlgmr.msra.gmra.mrb[16].mxu1 %v12781_v3  ;;  %10176 = vmatpush1.bf16.msra.mxu0 %v11211_v10 }
 0x226   :  { %10183 = vmatpush3.bf16.msra.mxu1 %v11237_v19  ;;  %10178 = vmatprep.subr.bf16.mxu0 %v11213_v11 }
 0x227   :  { %10184 = vmatprep.subr.bf16.mxu1 %v12783_v4  ;;  %1684 = vmatprep.mubr.f32.mxu0 %v12781_v3 }
 0x228   :  { %9527 = vmatprep.mubr.msk.f32.mxu1 %vm11140_vm0, %v12781_v3  ;;  %v787_v3 = vmul.f32 %v783_v1, %v11310_v51 }
 0x229   :  { %10180 = vmatpush1.bf16.msra.mxu0 %v11235_v18 }
 0x22a   :  { %10186 = vmatpush3.bf16.msra.mxu1 %v11244_v21  ;;  %10188 = vmatprep.subr.bf16.mxu0 %v11278_v27  ;;  %v790_v14 = vadd.f32 %v787_v3, %v11318_v55 }
 0x22b   :  { %10195 = vmatprep.subr.bf16.mxu1 %v12783_v4 }
 0x2d7   :  { %v860_v12 = vpop.f32.mrb[6].mxu0  ;;  %v931_v13 = vpop.f32.mrb[8].mxu1 }
 0x2d8   :  { %v935_v15 = vadd.f32 %v860_v12, %v788_v9  ;;  %v862_v29 = vpop.f32.mrb[7].mxu0  ;;  %v9474_v22 = vpop.f32.mrb[9].mxu1 }
 0x2d9   :  { %v936_v48 = vadd.f32 %v862_v29, %v789_v38 }
 0x2da   :  { %v937_v24 = vmul.f32 0.5, %v935_v15  ;;  %v945_v15 = vadd.f32 %v11315_v52, %v931_v13 }
 0x2db   :  { %v941_v54 = vmul.f32 0.5, %v936_v48 }
 0x2dc   :  { %10957 = vtanh.f32 %v937_v24 }
 0x2dd   :  { %10959 = vtanh.f32 %v941_v54 }
 0x2df   :  { %v1089_v40 = vpop.f32.mrb[10].mxu1 }
 0x2e0   :  { %v9485_v43 = vpop.f32.mrb[11].mxu1 }
 0x2e6   :  { %v10958_v58 = vpop.eup %10957 }
 0x2e7   :  { %v939_v4 = vmul.f32 0.5, %v10958_v58  ;;  %v1162_v8 = vpop.f32.mrb[8].mxu0  ;;  %v1233_v36 = vpop.f32.mrb[12].mxu1 }
 0x2e8   :  { %v10839_v9 = vadd.f32 %v1162_v8, %v11476_v25  ;;  %v1164_v12 = vpop.f32.mrb[9].mxu0  ;;  %v9496_v22 = vpop.f32.mrb[13].mxu1  ;;  %v8997_v8 = vld [vmem:[%s12776_s4 + $0x6] sm:$0x7] }
 0x2e9   :  { %v940_v32 = vadd.f32 0.5, %v939_v4  ;;  %v10840_v48 = vadd.f32 %v1164_v12, %v11483_v60  ;;  %v10960_v58 = vpop.eup %10959  ;;  %v11683_v4 = vrot.slane %v8997_v8, %v11281_v30  ;;  %v1247_v12 = vadd.f32 %v11489_v63, %v1233_v36 }
 0x2ea   :  { %v1239_v24 = vmul.f32 0.5, %v10839_v9  ;;  %v943_v9 = vmul.f32 0.5, %v10960_v58 }
 0x2eb   :  { %v946_v43 = vmul.f32 %v945_v15, %v940_v32  ;;  %12860 = vst [vmem:[#allocation18_spill] sm:$0xff] %v11683_v4  ;;  %v1243_v13 = vmul.f32 0.5, %v10840_v48  ;;  %v1090_v48 = vadd.f32 %v1089_v40, %v11492_v6 }
 0x2ec   :  { %10961 = vtanh.f32 %v1239_v24 }
 0x2ed   :  { %v947_v29 = vadd.f32 %v946_v43, %v790_v14 }
 0x2ef   :  { %10963 = vtanh.f32 %v947_v29  ;;  %v1422_v38 = vpop.f32.mrb[14].mxu1 }
 0x2f0   :  { %v9507_v1 = vpop.f32.mrb[15].mxu1  ;;  %10965 = vtanh.f32 %v1243_v13 }
 0x2f1   :  { %v944_v1 = vadd.f32 0.5, %v943_v9 }
 0x2f6   :  { %v10962_v54 = vpop.eup %10961 }
 0x2f7   :  { %v1241_v3 = vmul.f32 0.5, %v10962_v54  ;;  %v1505_v32 = vpop.f32.mrb[10].mxu0 }
 0x2f8   :  { %v10841_v22 = vadd.f32 %v1505_v32, %v11683_v4  ;;  %v1507_v15 = vpop.f32.mrb[11].mxu0  ;;  %v1576_v24 = vpop.f32.mrb[16].mxu1  ;;  %v11690_v32 = vrot.slane %v8997_v8, %v11296_v37 }
 0x2f9   :  { %v10964_v14 = vpop.eup %10963  ;;  %v1242_v43 = vadd.f32 0.5, %v1241_v3  ;;  %v9518_v29 = vpop.f32.mrb[17].mxu1  ;;  %v11716_v3 = vrot.slane %v8997_v8, %v11307_v49 }
 0x2fa   :  { %v949_v60 = vsub.f32 %v11497_v35, %v10964_v14  ;;  %v1582_v30 = vmul.f32 0.5, %v10841_v22  ;;  %v10842_v36 = vadd.f32 %v1507_v15, %v11690_v32  ;;  %v11709_v35 = vld [vmem:[%s12777_s5 + $0x2] ss:$0 sm:$0xff] }
 0x2fb   :  { %v1248_v55 = vmul.f32 %v1247_v12, %v1242_v43  ;;  %v1598_v15 = vadd.f32 %v11709_v35, %v1576_v24  ;;  %v1423_v24 = vadd.f32 %v1422_v38, %v11716_v3 }
 0x2fc   :  { %v950_v58 = vmul.f32 %v949_v60, %v944_v1  ;;  %10967 = vtanh.f32 %v1582_v30  ;;  %v12861_v30 = vmov 0.0|0.0   ;;  %v12862_v60 = vmov 0.0  }
 0x2fd   :  { %v1249_v54 = vadd.f32 %v1248_v55, %v1090_v48  ;;  %v10966_v55 = vpop.eup %10965  ;;  %v1586_v40 = vmul.f32 0.5, %v10842_v36  ;;  %v9028_v36 = vld [vmem:[%s12774_s2 + $0xe0] sm:$0xff] }
 0x2fe   :  { %v11692_v4 = vadd.f32 %v10964_v14, %v950_v58  ;;  %v1245_v9 = vmul.f32 0.5, %v10966_v55 }
 0x2ff   :  { %10969 = vtanh.f32 %v1249_v54  ;;  %v9025_v54 = vld [vmem:[%s12774_s2 + $0xc8] sm:$0xff] }
 0x300   :  { %9014 = vmatmul.mubr.msk.f32.vlgmr.msra.gmra.mrb[12].mxu0 %vm87_vm1, %v11692_v4  ;;  %9528 = vmatmul.mubr.msk.f32.vlgmr.msra.gmra.mrb[18].mxu1 %vm87_vm1, %v11692_v4  ;;  %10971 = vtanh.f32 %v1586_v40  ;;  %v1246_v12 = vadd.f32 0.5, %v1245_v9  ;;  %v9024_v40 = vld [vmem:[%s12774_s2 + $0xc0] sm:$0xff] }
 0x301   :  { %10190 = vmatpush1.bf16.msra.mxu0 %v11341_v16  ;;  %10197 = vmatpush3.bf16.msra.mxu1 %v11343_v17 }
 0x302   :  { %10192 = vmatprep.subr.bf16.mxu0 %v11350_v23  ;;  %10198 = vmatprep.subr.bf16.mxu1 %v12861_v30 }
 0x303   :  { %1842 = vmatprep.mubr.f32.mxu0 %v12862_v60  ;;  %9538 = vmatprep.mubr.msk.f32.mxu1 %vm11140_vm0, %v12862_v60 }
 0x305   :  { %10194 = vmatpush1.bf16.msra.mxu0 %v11373_v31  ;;  %10200 = vmatpush3.bf16.msra.mxu1 %v11375_v33 }
 0x306   :  { %v10968_v13 = vpop.eup %10967  ;;  %10202 = vmatprep.subr.bf16.mxu0 %v11379_v34  ;;  %10209 = vmatprep.subr.bf16.mxu1 %v12861_v30 }
 0x307   :  { %v1584_v22 = vmul.f32 0.5, %v10968_v13 }
 0x308   :  { %9016 = vmatmul.mubr.msk.f32.vlgmr.msra.gmra.mrb[14].mxu0 %vm87_vm1, %v11692_v4  ;;  %9539 = vmatmul.mubr.msk.f32.vlgmr.msra.gmra.mrb[20].mxu1 %vm87_vm1, %v11692_v4 }
 0x309   :  { %v10970_v14 = vpop.eup %10969  ;;  %v1585_v43 = vadd.f32 0.5, %v1584_v22  ;;  %10204 = vmatpush1.bf16.msra.mxu0 %v11404_v45  ;;  %10211 = vmatpush3.bf16.msra.mxu1 %v11416_v50  ;;  %v11770_v22 = vpack.c.bf16 %v9028_v36, %v9025_v54  ;;  %v9033_v54 = vld [vmem:[%s12774_s2 + $0x108] sm:$0xff]  ;;  %v9032_v36 = vld [vmem:[%s12774_s2 + $0x100] sm:$0xff] }
 0x30a   :  { %v1251_v8 = vsub.f32 %v11560_v2, %v10970_v14  ;;  %10206 = vmatprep.subr.bf16.mxu0 %v11407_v46  ;;  %10212 = vmatprep.subr.bf16.mxu1 %v12861_v30  ;;  %v10972_v2 = vpop.eup %10971 }
 0x30b   :  { %v1599_v29 = vmul.f32 %v1598_v15, %v1585_v43  ;;  %1986 = vmatprep.mubr.f32.mxu0 %v12862_v60  ;;  %9549 = vmatprep.mubr.msk.f32.mxu1 %vm11140_vm0, %v12862_v60  ;;  %v1588_v38 = vmul.f32 0.5, %v10972_v2  ;;  %v9027_v15 = vld [vmem:[%s12774_s2 + $0xd8] sm:$0xff]  ;;  %v9029_v43 = vld [vmem:[%s12774_s2 + $0xe8] sm:$0xff] }
 0x30c   :  { %v1252_v1 = vmul.f32 %v1251_v8, %v1246_v12  ;;  %v9031_v12 = vld [vmem:[%s12774_s2 + $0xf8] sm:$0xff]  ;;  %v9034_v8 = vld [vmem:[%s12774_s2 + $0x110] sm:$0xff] }
 0x30d   :  { %v1600_v48 = vadd.f32 %v1599_v29, %v1423_v24  ;;  %10208 = vmatpush1.bf16.msra.mxu0 %v11429_v56  ;;  %10214 = vmatpush3.bf16.msra.mxu1 %v11434_v57  ;;  %v1589_v13 = vadd.f32 0.5, %v1588_v38  ;;  %v11792_v29 = vpack.c.bf16 %v9027_v15, %v9024_v40  ;;  %v11803_v38 = vpack.c.bf16 %v9034_v8, %v9031_v12  ;;  %v9035_v40 = vld [vmem:[%s12774_s2 + $0x118] sm:$0xff] }
 0x30e   :  { %v11734_v58 = vadd.f32 %v10970_v14, %v1252_v1  ;;  %10216 = vmatprep.subr.bf16.mxu0 %v11531_v47  ;;  %10223 = vmatprep.subr.bf16.mxu1 %v12861_v30  ;;  %v9026_v14 = vld [vmem:[%s12774_s2 + $0xd0] sm:$0xff]  ;;  %v11828_v15 = vpack.c.bf16 %v9035_v40, %v9032_v36  ;;  %v9042_v12 = vld [vmem:[%s12772_s3 + $0x138] sm:$0xff] }
 0x30f   :  { %10973 = vtanh.f32 %v1600_v48  ;;  %12863 = vst [vmem:[#allocation19_spill] sm:$0xff] %v11792_v29  ;;  %v11794_v1 = vpack.c.bf16 %v9029_v43, %v9026_v14  ;;  %v9030_v48 = vld [vmem:[%s12774_s2 + $0xf0] sm:$0xff]  ;;  %12865 = vst [vmem:[#allocation21_spill] sm:$0xff] %v11803_v38  ;;  %v9039_v43 = vld [vmem:[%s12772_s3 + $0x120] sm:$0xff] }
 0x310   :  { %9018 = vmatmul.mubr.msk.f32.vlgmr.msra.gmra.mrb[14].mxu0 %vm87_vm1, %v11734_v58  ;;  %9550 = vmatmul.mubr.msk.f32.vlgmr.msra.gmra.mrb[22].mxu1 %vm87_vm1, %v11734_v58  ;;  %12867 = vst [vmem:[#allocation23_spill] sm:$0xff] %v11828_v15  ;;  %v9046_v8 = vld [vmem:[%s12772_s3 + $0x158] sm:$0xff]  ;;  %v11857_v36 = vpack.c.bf16 %v9042_v12, %v9039_v43  ;;  %v9047_v43 = vld [vmem:[%s12772_s3 + $0x160] sm:$0xff] }
 0x311   :  { %10218 = vmatpush1.bf16.msra.mxu0 %v11553_v62  ;;  %10225 = vmatpush3.bf16.msra.mxu1 %v11555_v0  ;;  %12864 = vst [vmem:[#allocation20_spill] sm:$0xff] %v11794_v1  ;;  %v9050_v12 = vld [vmem:[%s12772_s3 + $0x178] sm:$0xff] }
 0x312   :  { %10220 = vmatprep.subr.bf16.mxu0 %v11564_v7  ;;  %10226 = vmatprep.subr.bf16.mxu1 %v12861_v30  ;;  %12869 = vst [vmem:[#allocation25_spill] sm:$0xff] %v11857_v36 }
 0x313   :  { %2144 = vmatprep.mubr.f32.mxu0 %v12862_v60  ;;  %9560 = vmatprep.mubr.msk.f32.mxu1 %vm11140_vm0, %v12862_v60 }
 0x315   :  { %10222 = vmatpush1.bf16.msra.mxu0 %v11587_v20  ;;  %10228 = vmatpush3.bf16.msra.mxu1 %v11589_v26 }
 0x316   :  { %10230 = vmatprep.subr.bf16.mxu0 %v11593_v28  ;;  %10237 = vmatprep.subr.bf16.mxu1 %v12861_v30 }
 0x318   :  { %9020 = vmatmul.mubr.msk.f32.vlgmr.msra.gmra.mrb[16].mxu0 %vm87_vm1, %v11734_v58  ;;  %9561 = vmatmul.mubr.msk.f32.vlgmr.msra.gmra.mrb[24].mxu1 %vm87_vm1, %v11734_v58 }
 0x319   :  { %v10974_v55 = vpop.eup %10973  ;;  %10232 = vmatpush1.bf16.msra.mxu0 %v11618_v41  ;;  %10239 = vmatpush3.bf16.msra.mxu1 %v11630_v53 }
 0x31a   :  { %10234 = vmatprep.subr.bf16.mxu0 %v11621_v42  ;;  %10240 = vmatprep.subr.bf16.mxu1 %v12861_v30  ;;  %v1602_v9 = vsub.f32 0.0, %v10974_v55 }
 0x31b   :  { %2288 = vmatprep.mubr.f32.mxu0 %v12862_v60  ;;  %9571 = vmatprep.mubr.msk.f32.mxu1 %vm11140_vm0, %v12862_v60 }
 0x31c   :  { %v1603_v24 = vmul.f32 %v1602_v9, %v1589_v13  ;;  %v9043_v13 = vld [vmem:[%s12772_s3 + $0x140] sm:$0xff]  ;;  %v11826_v9 = vpack.c.bf16 %v9033_v54, %v9030_v48  ;;  %v9041_v48 = vld [vmem:[%s12772_s3 + $0x130] sm:$0xff]  ;;  %v9044_v54 = vld [vmem:[%s12772_s3 + $0x148] sm:$0xff] }
 0x31d   :  { %10236 = vmatpush1.bf16.msra.mxu0 %v11643_v59  ;;  %10242 = vmatpush3.bf16.msra.mxu1 %v11648_v61 }
 0x31e   :  { %v11799_v2 = vadd.f32 %v10974_v55, %v1603_v24  ;;  %10244 = vmatprep.subr.bf16.mxu0 %v11770_v22  ;;  %10251 = vmatprep.subr.bf16.mxu1 %v12861_v30  ;;  %v9040_v55 = vld [vmem:[%s12772_s3 + $0x128] sm:$0xff]  ;;  %12866 = vst [vmem:[#allocation22_spill] sm:$0xff] %v11826_v9  ;;  %v9049_v24 = vld [vmem:[%s12772_s3 + $0x170] sm:$0xff] }
 0x31f   :  { %v11832_v14 = vpack.c.bf16 %v9043_v13, %v9040_v55  ;;  %v11860_v40 = vpack.c.bf16 %v9049_v24, %v9046_v8  ;;  %v9045_v55 = vld [vmem:[%s12772_s3 + $0x150] sm:$0xff]  ;;  %v9048_v13 = vld [vmem:[%s12772_s3 + $0x168] sm:$0xff]  ;;  %v11887_v24 = vpack.c.bf16 %v9050_v12, %v9047_v43 }
 0x320   :  { %9022 = vmatmul.mubr.msk.f32.vlgmr.msra.gmra.mrb[16].mxu0 %vm87_vm1, %v11799_v2  ;;  %9572 = vmatmul.mubr.msk.f32.vlgmr.msra.gmra.mrb[26].mxu1 %vm87_vm1, %v11799_v2  ;;  %v11882_v8 = vpack.c.bf16 %v9048_v13, %v9045_v55  ;;  %v12875_v13 = vld [vmem:[#allocation11_spill] sm:$0xff] }
 0x321   :  { %10246 = vmatpush1.bf16.msra.mxu0 %v11792_v29  ;;  %10253 = vmatpush3.bf16.msra.mxu1 %v11794_v1  ;;  %12868 = vst [vmem:[#allocation24_spill] sm:$0xff] %v11832_v14  ;;  %12870 = vst [vmem:[#allocation26_spill] sm:$0xff] %v11860_v40 }
 0x322   :  { %10248 = vmatprep.subr.bf16.mxu0 %v11803_v38  ;;  %10254 = vmatprep.subr.bf16.mxu1 %v12861_v30  ;;  %v11869_v38 = vpack.c.bf16 %v9044_v54, %v9041_v48  ;;  %12872 = vst [vmem:[#allocation28_spill] sm:$0xff] %v11882_v8  ;;  %12873 = vst [vmem:[#allocation29_spill] sm:$0xff] %v11887_v24  ;;  %v1609_v48 = vpop.permute.xlu1 %1608  ;;  %v12874_v54 = vld [vmem:[#allocation10_spill] sm:$0xff] }
 0x323   :  { %2477 = vmatprep.mubr.f32.mxu0 %v12862_v60  ;;  %9582 = vmatprep.mubr.msk.f32.mxu1 %vm11140_vm0, %v12862_v60  ;;  %v1611_v55 = vmul.f32 %v1609_v48, %v12874_v54  ;;  %v1613_v54 = vmul.f32 %v1609_v48, %v11310_v51 }
 0x324   :  { %12871 = vst [vmem:[#allocation27_spill] sm:$0xff] %v11869_v38 }
 0x325   :  { %10250 = vmatpush1.bf16.msra.mxu0 %v11826_v9  ;;  %10256 = vmatpush3.bf16.msra.mxu1 %v11828_v15  ;;  %v1614_v43 = vadd.f32 %v1611_v55, %v12875_v13 }
 0x326   :  { %10258 = vmatprep.subr.bf16.mxu0 %v11832_v14  ;;  %10265 = vmatprep.subr.bf16.mxu1 %v12861_v30 }
 0x328   :  { %9037 = vmatmul.mubr.msk.f32.vlgmr.msra.gmra.mrb[18].mxu0 %vm87_vm1, %v11799_v2  ;;  %9583 = vmatmul.mubr.msk.f32.vlgmr.msra.gmra.mrb[28].mxu1 %vm87_vm1, %v11799_v2 }
 0x329   :  { %10260 = vmatpush1.bf16.msra.mxu0 %v11857_v36  ;;  %2631 = vmatprep.mubr.f32.mxu0 %v12862_v60 }
 0x32a   :  { %10262 = vmatprep.subr.bf16.mxu0 %v11860_v40  ;;  %10267 = vmatpush3.bf16.msra.mxu1 %v11869_v38 }
 0x32b   :  { %10268 = vmatprep.subr.bf16.mxu1 %v12861_v30  ;;  %9593 = vmatprep.mubr.msk.f32.mxu1 %vm11140_vm0, %v12862_v60 }
 0x32d   :  { %10264 = vmatpush1.bf16.msra.mxu0 %v11882_v8  ;;  %v1612_v8 = vmul.f32 %v1609_v48, %v11300_v39 }
 0x32e   :  { %10270 = vmatpush3.bf16.msra.mxu1 %v11887_v24  ;;  %10272 = vmatprep.subr.bf16.mxu0 %v11198_v5 }
 0x32f   :  { %10279 = vmatprep.subr.bf16.mxu1 %v12861_v30 }
 0x330   :  { %2632 = vmatmul.mubr.f32.vlgmr.msra.gmra.mrb[18].mxu0 %v12862_v60 }
 0x331   :  { %9594 = vmatmul.mubr.f32.vlgmr.msra.gmra.mrb[30].mxu1 %v12862_v60  ;;  %10274 = vmatpush1.bf16.msra.mxu0 %v11211_v10 }
 0x332   :  { %10281 = vmatpush3.bf16.msra.mxu1 %v11237_v19  ;;  %10276 = vmatprep.subr.bf16.mxu0 %v11213_v11 }
 0x333   :  { %10282 = vmatprep.subr.bf16.mxu1 %v12861_v30  ;;  %2812 = vmatprep.mubr.f32.mxu0 %v12862_v60 }
 0x334   :  { %9604 = vmatprep.mubr.msk.f32.mxu1 %vm11140_vm0, %v12862_v60 }
 0x335   :  { %10278 = vmatpush1.bf16.msra.mxu0 %v11235_v18 }
 0x336   :  { %10284 = vmatpush3.bf16.msra.mxu1 %v11244_v21  ;;  %10286 = vmatprep.subr.bf16.mxu0 %v11278_v27  ;;  %v1615_v21 = vadd.f32 %v1612_v8, %v11304_v44  ;;  %v12876_v8 = vld [vmem:[#allocation15_spill] sm:$0xff] }
 0x337   :  { %10293 = vmatprep.subr.bf16.mxu1 %v12861_v30  ;;  %v1616_v44 = vadd.f32 %v1613_v54, %v12876_v8 }
 0x3d3   :  { %v1686_v12 = vpop.f32.mrb[12].mxu0  ;;  %v1757_v11 = vpop.f32.mrb[18].mxu1 }
 0x3d4   :  { %v1761_v19 = vadd.f32 %v1686_v12, %v1614_v43  ;;  %v1688_v10 = vpop.f32.mrb[13].mxu0  ;;  %v9529_v5 = vpop.f32.mrb[19].mxu1  ;;  %v1771_v39 = vadd.f32 %v11315_v52, %v1757_v11  ;;  %v12878_v52 = vld [vmem:[#allocation18_spill] sm:$0xff] }
 0x3d5   :  { %v1762_v40 = vadd.f32 %v1688_v10, %v1615_v21 }
 0x3d6   :  { %v1763_v24 = vmul.f32 0.5, %v1761_v19 }
 0x3d7   :  { %v1767_v38 = vmul.f32 0.5, %v1762_v40  ;;  %v12877_v40 = vld [vmem:[#allocation17_spill] sm:$0xff] }
 0x3d8   :  { %10975 = vtanh.f32 %v1763_v24 }
 0x3d9   :  { %10977 = vtanh.f32 %v1767_v38 }
 0x3db   :  { %v1915_v18 = vpop.f32.mrb[20].mxu1 }
 0x3dc   :  { %v9540_v27 = vpop.f32.mrb[21].mxu1 }
 0x3e2   :  { %v10976_v36 = vpop.eup %10975 }
 0x3e3   :  { %v1765_v14 = vmul.f32 0.5, %v10976_v36  ;;  %v1988_v55 = vpop.f32.mrb[14].mxu0  ;;  %v2059_v13 = vpop.f32.mrb[22].mxu1 }
 0x3e4   :  { %v10843_v43 = vadd.f32 %v1988_v55, %v11476_v25  ;;  %v1990_v12 = vpop.f32.mrb[15].mxu0  ;;  %v9551_v5 = vpop.f32.mrb[23].mxu1 }
 0x3e5   :  { %v1766_v19 = vadd.f32 0.5, %v1765_v14  ;;  %v10844_v48 = vadd.f32 %v1990_v12, %v12877_v40  ;;  %v10978_v51 = vpop.eup %10977 }
 0x3e6   :  { %v2065_v24 = vmul.f32 0.5, %v10843_v43  ;;  %v1769_v5 = vmul.f32 0.5, %v10978_v51 }
 0x3e7   :  { %v1772_v27 = vmul.f32 %v1771_v39, %v1766_v19  ;;  %v2069_v55 = vmul.f32 0.5, %v10844_v48 }
 0x3e8   :  { %10979 = vtanh.f32 %v2065_v24  ;;  %v1770_v24 = vadd.f32 0.5, %v1769_v5 }
 0x3e9   :  { %v1773_v10 = vadd.f32 %v1772_v27, %v1616_v44  ;;  %v2073_v44 = vadd.f32 %v11489_v63, %v2059_v13  ;;  %v12879_v13 = vld [vmem:[#allocation9_spill] sm:$0xff] }
 0x3eb   :  { %10981 = vtanh.f32 %v1773_v10  ;;  %v11917_v21 = vpop.f32.mrb[24].mxu1  ;;  %v1916_v10 = vadd.f32 %v1915_v18, %v11492_v6 }
 0x3ec   :  { %v9562_v36 = vpop.f32.mrb[25].mxu1  ;;  %10983 = vtanh.f32 %v2069_v55 }
 0x3f2   :  { %v10980_v25 = vpop.eup %10979 }
 0x3f3   :  { %v2067_v14 = vmul.f32 0.5, %v10980_v25  ;;  %v2290_v15 = vpop.f32.mrb[16].mxu0  ;;  %v2361_v11 = vpop.f32.mrb[26].mxu1 }
 0x3f4   :  { %v10845_v38 = vadd.f32 %v2290_v15, %v12878_v52  ;;  %v2292_v43 = vpop.f32.mrb[17].mxu0  ;;  %v9573_v54 = vpop.f32.mrb[27].mxu1 }
 0x3f5   :  { %v10982_v39 = vpop.eup %10981  ;;  %v2068_v19 = vadd.f32 0.5, %v2067_v14  ;;  %v10846_v63 = vadd.f32 %v2292_v43, %v11690_v32 }
 0x3f6   :  { %v1775_v27 = vsub.f32 %v11692_v4, %v10982_v39  ;;  %v2367_v12 = vmul.f32 0.5, %v10845_v38  ;;  %v10984_v18 = vpop.eup %10983  ;;  %v9036_v4 = vld [vmem:[%s12776_s4 + $0x9] sm:$0x7] }
 0x3f7   :  { %v2074_v36 = vmul.f32 %v2073_v44, %v2068_v19  ;;  %v11944_v55 = vrot.slane %v9036_v4, %v12879_v13  ;;  %v2371_v5 = vmul.f32 0.5, %v10846_v63  ;;  %v2071_v38 = vmul.f32 0.5, %v10984_v18 }
 0x3f8   :  { %v1776_v51 = vmul.f32 %v1775_v27, %v1770_v24  ;;  %10985 = vtanh.f32 %v2367_v12  ;;  %v2218_v63 = vadd.f32 %v11917_v21, %v11716_v3 }
 0x3f9   :  { %v2075_v25 = vadd.f32 %v2074_v36, %v1916_v10  ;;  %v2375_v10 = vadd.f32 %v11709_v35, %v2361_v11 }
 0x3fa   :  { %v11924_v48 = vadd.f32 %v10982_v39, %v1776_v51  ;;  %v2072_v51 = vadd.f32 0.5, %v2071_v38 }
 0x3fb   :  { %10987 = vtanh.f32 %v2075_v25  ;;  %v11926_v15 = vpop.f32.mrb[28].mxu1 }
 0x3fc   :  { %v9584_v54 = vpop.f32.mrb[29].mxu1  ;;  %9053 = vmatmul.mubr.msk.f32.vlgmr.msra.gmra.mrb[20].mxu0 %vm87_vm1, %v11924_v48  ;;  %9605 = vmatmul.mubr.msk.f32.vlgmr.msra.gmra.mrb[32].mxu1 %vm87_vm1, %v11924_v48  ;;  %10989 = vtanh.f32 %v2371_v5  ;;  %v11967_v5 = vrot.slane %v9036_v4, %v11296_v37 }
 0x3fd   :  { %10288 = vmatpush1.bf16.msra.mxu0 %v11341_v16  ;;  %10295 = vmatpush3.bf16.msra.mxu1 %v11343_v17 }
 0x3fe   :  { %10290 = vmatprep.subr.bf16.mxu0 %v11350_v23  ;;  %10296 = vmatprep.subr.bf16.mxu1 %v12861_v30 }
 0x3ff   :  { %2970 = vmatprep.mubr.f32.mxu0 %v12862_v60  ;;  %9615 = vmatprep.mubr.msk.f32.mxu1 %vm11140_vm0, %v12862_v60 }
 0x401   :  { %10292 = vmatpush1.bf16.msra.mxu0 %v11373_v31  ;;  %10298 = vmatpush3.bf16.msra.mxu1 %v11375_v33 }
 0x402   :  { %v10986_v14 = vpop.eup %10985  ;;  %10300 = vmatprep.subr.bf16.mxu0 %v11379_v34  ;;  %10307 = vmatprep.subr.bf16.mxu1 %v12861_v30 }
 0x403   :  { %v2369_v43 = vmul.f32 0.5, %v10986_v14  ;;  %v2633_v39 = vpop.f32.mrb[18].mxu0  ;;  %v11990_v14 = vld [vmem:[%s12777_s5 + $0x3] ss:$0 sm:$0xff] }
 0x404   :  { %v10847_v19 = vadd.f32 %v2633_v39, %v11944_v55  ;;  %v2635_v44 = vpop.f32.mrb[19].mxu0  ;;  %9055 = vmatmul.mubr.msk.f32.vlgmr.msra.gmra.mrb[22].mxu0 %vm87_vm1, %v11924_v48  ;;  %9616 = vmatmul.mubr.msk.f32.vlgmr.msra.gmra.mrb[34].mxu1 %vm87_vm1, %v11924_v48  ;;  %v2704_v24 = vpop.f32.mrb[30].mxu1 }
 0x405   :  { %v10988_v27 = vpop.eup %10987  ;;  %v2370_v12 = vadd.f32 0.5, %v2369_v43  ;;  %10302 = vmatpush1.bf16.msra.mxu0 %v11404_v45  ;;  %10309 = vmatpush3.bf16.msra.mxu1 %v11416_v50  ;;  %v9595_v36 = vpop.f32.mrb[31].mxu1  ;;  %v10848_v37 = vadd.f32 %v2635_v44, %v11967_v5 }
 0x406   :  { %v2077_v25 = vsub.f32 %v11734_v58, %v10988_v27  ;;  %v2710_v54 = vmul.f32 0.5, %v10847_v19  ;;  %10304 = vmatprep.subr.bf16.mxu0 %v11407_v46  ;;  %10310 = vmatprep.subr.bf16.mxu1 %v12861_v30  ;;  %v10990_v21 = vpop.eup %10989  ;;  %v11997_v19 = vrot.slane %v9036_v4, %v11307_v49 }
 0x407   :  { %v2376_v18 = vmul.f32 %v2375_v10, %v2370_v12  ;;  %3114 = vmatprep.mubr.f32.mxu0 %v12862_v60  ;;  %9626 = vmatprep.mubr.msk.f32.mxu1 %vm11140_vm0, %v12862_v60  ;;  %v2714_v38 = vmul.f32 0.5, %v10848_v37  ;;  %v2373_v39 = vmul.f32 0.5, %v10990_v21  ;;  %v12883_v37 = vld [vmem:[#allocation25_spill] sm:$0xff]  ;;  %v12884_v21 = vld [vmem:[#allocation27_spill] sm:$0xff] }
 0x408   :  { %v2078_v11 = vmul.f32 %v2077_v25, %v2072_v51  ;;  %10991 = vtanh.f32 %v2710_v54  ;;  %v2551_v4 = vadd.f32 %v11926_v15, %v11997_v19  ;;  %v12880_v15 = vld [vmem:[#allocation21_spill] sm:$0xff] }
 0x409   :  { %v2377_v13 = vadd.f32 %v2376_v18, %v2218_v63  ;;  %10306 = vmatpush1.bf16.msra.mxu0 %v11429_v56  ;;  %10312 = vmatpush3.bf16.msra.mxu1 %v11434_v57  ;;  %v2374_v36 = vadd.f32 0.5, %v2373_v39  ;;  %v12881_v63 = vld [vmem:[#allocation23_spill] sm:$0xff] }
 0x40a   :  { %v11971_v58 = vadd.f32 %v10988_v27, %v2078_v11  ;;  %10314 = vmatprep.subr.bf16.mxu0 %v11531_v47  ;;  %10321 = vmatprep.subr.bf16.mxu1 %v12861_v30  ;;  %v2726_v27 = vadd.f32 %v11990_v14, %v2704_v24  ;;  %v12882_v11 = vld [vmem:[#allocation24_spill] sm:$0xff] }
 0x40b   :  { %10993 = vtanh.f32 %v2377_v13 }
 0x40c   :  { %9057 = vmatmul.mubr.msk.f32.vlgmr.msra.gmra.mrb[22].mxu0 %vm87_vm1, %v11971_v58  ;;  %9627 = vmatmul.mubr.msk.f32.vlgmr.msra.gmra.mrb[36].mxu1 %vm87_vm1, %v11971_v58  ;;  %10995 = vtanh.f32 %v2714_v38 }
 0x40d   :  { %10316 = vmatpush1.bf16.msra.mxu0 %v11553_v62  ;;  %10323 = vmatpush3.bf16.msra.mxu1 %v11555_v0 }
 0x40e   :  { %10318 = vmatprep.subr.bf16.mxu0 %v11564_v7  ;;  %10324 = vmatprep.subr.bf16.mxu1 %v12861_v30 }
 0x40f   :  { %3272 = vmatprep.mubr.f32.mxu0 %v12862_v60  ;;  %9637 = vmatprep.mubr.msk.f32.mxu1 %vm11140_vm0, %v12862_v60 }
 0x411   :  { %10320 = vmatpush1.bf16.msra.mxu0 %v11587_v20  ;;  %10326 = vmatpush3.bf16.msra.mxu1 %v11589_v26 }
 0x412   :  { %v10992_v43 = vpop.eup %10991  ;;  %10328 = vmatprep.subr.bf16.mxu0 %v11593_v28  ;;  %10335 = vmatprep.subr.bf16.mxu1 %v12861_v30 }
 0x413   :  { %v2712_v44 = vmul.f32 0.5, %v10992_v43  ;;  %v12885_v43 = vld [vmem:[#allocation26_spill] sm:$0xff] }
 0x414   :  { %9059 = vmatmul.mubr.msk.f32.vlgmr.msra.gmra.mrb[24].mxu0 %vm87_vm1, %v11971_v58  ;;  %9638 = vmatmul.mubr.msk.f32.vlgmr.msra.gmra.mrb[38].mxu1 %vm87_vm1, %v11971_v58 }
 0x415   :  { %v10994_v12 = vpop.eup %10993  ;;  %v2713_v10 = vadd.f32 0.5, %v2712_v44  ;;  %10330 = vmatpush1.bf16.msra.mxu0 %v11618_v41  ;;  %10337 = vmatpush3.bf16.msra.mxu1 %v11630_v53 }
 0x416   :  { %v2379_v49 = vsub.f32 %v11799_v2, %v10994_v12  ;;  %10332 = vmatprep.subr.bf16.mxu0 %v11621_v42  ;;  %10338 = vmatprep.subr.bf16.mxu1 %v12861_v30  ;;  %v10996_v54 = vpop.eup %10995 }
 0x417   :  { %v2727_v24 = vmul.f32 %v2726_v27, %v2713_v10  ;;  %3416 = vmatprep.mubr.f32.mxu0 %v12862_v60  ;;  %9648 = vmatprep.mubr.msk.f32.mxu1 %vm11140_vm0, %v12862_v60  ;;  %v2716_v18 = vmul.f32 0.5, %v10996_v54  ;;  %v12886_v27 = vld [vmem:[#allocation28_spill] sm:$0xff] }
 0x418   :  { %v2380_v51 = vmul.f32 %v2379_v49, %v2374_v36  ;;  %v12889_v36 = vld [vmem:[#allocation2_spill] sm:$0xff]  ;;  %v12890_v49 = vld [vmem:[#allocation3_spill] sm:$0xff]  ;;  %v12895_v54 = vld [vmem:[#allocation8_spill] sm:$0xff] }
 0x419   :  { %v2728_v25 = vadd.f32 %v2727_v24, %v2551_v4  ;;  %10334 = vmatpush1.bf16.msra.mxu0 %v11643_v59  ;;  %10340 = vmatpush3.bf16.msra.mxu1 %v11648_v61  ;;  %v2717_v38 = vadd.f32 0.5, %v2716_v18  ;;  %v12891_v4 = vld [vmem:[#allocation6_spill] sm:$0xff]  ;;  %v12892_v24 = vld [vmem:[#allocation4_spill] sm:$0xff]  ;;  %v2737_v18 = vpop.permute.xlu0 %2736 }
 0x41a   :  { %v12016_v2 = vadd.f32 %v10994_v12, %v2380_v51  ;;  %10342 = vmatprep.subr.bf16.mxu0 %v11770_v22  ;;  %10349 = vmatprep.subr.bf16.mxu1 %v12861_v30  ;;  %v12887_v12 = vld [vmem:[#allocation29_spill] sm:$0xff] }
 0x41b   :  { %10997 = vtanh.f32 %v2728_v25  ;;  %v12893_v51 = vld [vmem:[#allocation5_spill] sm:$0xff]  ;;  %v12894_v25 = vld [vmem:[#allocation7_spill] sm:$0xff] }
 0x41c   :  { %9061 = vmatmul.mubr.msk.f32.vlgmr.msra.gmra.mrb[24].mxu0 %vm87_vm1, %v12016_v2  ;;  %9649 = vmatmul.mubr.msk.f32.vlgmr.msra.gmra.mrb[40].mxu1 %vm87_vm1, %v12016_v2 }
 0x41d   :  { %10344 = vmatpush1.bf16.msra.mxu0 %v11792_v29  ;;  %10351 = vmatpush3.bf16.msra.mxu1 %v11794_v1  ;;  %v12901_v1 = vld [vmem:[#allocation16_spill] sm:$0xff] }
 0x41e   :  { %10346 = vmatprep.subr.bf16.mxu0 %v12880_v15  ;;  %10352 = vmatprep.subr.bf16.mxu1 %v12861_v30 }
 0x41f   :  { %3574 = vmatprep.mubr.f32.mxu0 %v12862_v60  ;;  %9659 = vmatprep.mubr.msk.f32.mxu1 %vm11140_vm0, %v12862_v60 }
 0x421   :  { %10348 = vmatpush1.bf16.msra.mxu0 %v11826_v9  ;;  %10354 = vmatpush3.bf16.msra.mxu1 %v12881_v63  ;;  %v12900_v9 = vld [vmem:[#allocation14_spill] sm:$0xff] }
 0x422   :  { %10356 = vmatprep.subr.bf16.mxu0 %v12882_v11  ;;  %10363 = vmatprep.subr.bf16.mxu1 %v12861_v30 }
 0x424   :  { %9063 = vmatmul.mubr.msk.f32.vlgmr.msra.gmra.mrb[26].mxu0 %vm87_vm1, %v12016_v2  ;;  %9660 = vmatmul.mubr.msk.f32.vlgmr.msra.gmra.mrb[42].mxu1 %vm87_vm1, %v12016_v2 }
 0x425   :  { %v10998_v13 = vpop.eup %10997  ;;  %10358 = vmatpush1.bf16.msra.mxu0 %v12883_v37  ;;  %10365 = vmatpush3.bf16.msra.mxu1 %v12884_v21 }
 0x426   :  { %10360 = vmatprep.subr.bf16.mxu0 %v12885_v43  ;;  %10366 = vmatprep.subr.bf16.mxu1 %v12861_v30  ;;  %v2730_v39 = vsub.f32 0.0, %v10998_v13  ;;  %v12898_v43 = vld [vmem:[#allocation12_spill] sm:$0xff] }
 0x427   :  { %3718 = vmatprep.mubr.f32.mxu0 %v12862_v60  ;;  %9670 = vmatprep.mubr.msk.f32.mxu1 %vm11140_vm0, %v12862_v60 }
 0x428   :  { %v2731_v44 = vmul.f32 %v2730_v39, %v2717_v38  ;;  %v12897_v39 = vld [vmem:[#allocation11_spill] sm:$0xff] }
 0x429   :  { %10362 = vmatpush1.bf16.msra.mxu0 %v12886_v27  ;;  %10368 = vmatpush3.bf16.msra.mxu1 %v12887_v12 }
 0x42a   :  { %v12048_v10 = vadd.f32 %v10998_v13, %v2731_v44  ;;  %10370 = vmatprep.subr.bf16.mxu0 %v12889_v36  ;;  %10377 = vmatprep.subr.bf16.mxu1 %v12861_v30  ;;  %v12896_v13 = vld [vmem:[#allocation10_spill] sm:$0xff] }
 0x42b   :  { %v2739_v38 = vmul.f32 %v2737_v18, %v12896_v13  ;;  %v2741_v13 = vmul.f32 %v2737_v18, %v12900_v9 }
 0x42c   :  { %12888 = vst [vmem:[#allocation15_spill] sm:$0xff] %v12048_v10  ;;  %9065 = vmatmul.mubr.msk.f32.vlgmr.msra.gmra.mrb[26].mxu0 %vm87_vm1, %v12048_v10  ;;  %9671 = vmatmul.mubr.msk.f32.vlgmr.msra.gmra.mrb[44].mxu1 %vm87_vm1, %v12048_v10  ;;  %v2740_v10 = vmul.f32 %v2737_v18, %v12898_v43 }
 0x42d   :  { %10372 = vmatpush1.bf16.msra.mxu0 %v12890_v49  ;;  %10379 = vmatpush3.bf16.msra.mxu1 %v12891_v4  ;;  %v2742_v44 = vadd.f32 %v2739_v38, %v12897_v39 }
 0x42e   :  { %10374 = vmatprep.subr.bf16.mxu0 %v12892_v24  ;;  %10380 = vmatprep.subr.bf16.mxu1 %v12861_v30 }
 0x42f   :  { %3891 = vmatprep.mubr.f32.mxu0 %v12862_v60  ;;  %9681 = vmatprep.mubr.msk.f32.mxu1 %vm11140_vm0, %v12862_v60 }
 0x431   :  { %10376 = vmatpush1.bf16.msra.mxu0 %v12893_v51  ;;  %10382 = vmatpush3.bf16.msra.mxu1 %v12894_v25  ;;  %v12899_v51 = vld [vmem:[#allocation13_spill] sm:$0xff] }
 0x432   :  { %10384 = vmatprep.subr.bf16.mxu0 %v12895_v54  ;;  %10391 = vmatprep.subr.bf16.mxu1 %v12861_v30  ;;  %v2743_v25 = vadd.f32 %v2740_v10, %v12899_v51 }
 0x4cf   :  { %v2814_v24 = vpop.f32.mrb[20].mxu0  ;;  %v2885_v4 = vpop.f32.mrb[32].mxu1 }
 0x4d0   :  { %v2889_v49 = vadd.f32 %v2814_v24, %v2742_v44  ;;  %v2816_v36 = vpop.f32.mrb[21].mxu0  ;;  %v9606_v12 = vpop.f32.mrb[33].mxu1 }
 0x4d1   :  { %v2890_v37 = vadd.f32 %v2816_v36, %v2743_v25  ;;  %v2744_v36 = vadd.f32 %v2741_v13, %v12876_v8 }
 0x4d2   :  { %v2891_v27 = vmul.f32 0.5, %v2889_v49 }
 0x4d3   :  { %v2895_v11 = vmul.f32 0.5, %v2890_v37 }
 0x4d4   :  { %10999 = vtanh.f32 %v2891_v27  ;;  %v12076_v27 = vld [vmem:[%s12777_s5] ss:$0 sm:$0xff] }
 0x4d5   :  { %v2899_v10 = vadd.f32 %v12076_v27, %v2885_v4  ;;  %11001 = vtanh.f32 %v2895_v11 }
 0x4d7   :  { %v3043_v21 = vpop.f32.mrb[34].mxu1 }
 0x4d8   :  { %v9617_v54 = vpop.f32.mrb[35].mxu1 }
 0x4de   :  { %v11000_v63 = vpop.eup %10999 }
 0x4df   :  { %v2893_v15 = vmul.f32 0.5, %v11000_v63  ;;  %v3116_v38 = vpop.f32.mrb[22].mxu0  ;;  %v3187_v39 = vpop.f32.mrb[36].mxu1 }
 0x4e0   :  { %v10849_v24 = vadd.f32 %v3116_v38, %v12901_v1  ;;  %v3118_v44 = vpop.f32.mrb[23].mxu0  ;;  %v9628_v12 = vpop.f32.mrb[37].mxu1 }
 0x4e1   :  { %v2894_v49 = vadd.f32 0.5, %v2893_v15  ;;  %v10850_v15 = vadd.f32 %v3118_v44, %v12877_v40  ;;  %v11002_v38 = vpop.eup %11001 }
 0x4e2   :  { %v3193_v37 = vmul.f32 0.5, %v10849_v24  ;;  %v2897_v9 = vmul.f32 0.5, %v11002_v38 }
 0x4e3   :  { %v2900_v25 = vmul.f32 %v2899_v10, %v2894_v49  ;;  %v3197_v12 = vmul.f32 0.5, %v10850_v15 }
 0x4e4   :  { %11003 = vtanh.f32 %v3193_v37  ;;  %v12087_v37 = vld [vmem:[%s12777_s5 + $0x1] ss:$0 sm:$0xff] }
 0x4e5   :  { %v2901_v63 = vadd.f32 %v2900_v25, %v2744_v36  ;;  %v3201_v44 = vadd.f32 %v12087_v37, %v3187_v39  ;;  %v2898_v36 = vadd.f32 0.5, %v2897_v9 }
 0x4e7   :  { %11005 = vtanh.f32 %v2901_v63  ;;  %v12080_v54 = vpop.f32.mrb[38].mxu1  ;;  %v3044_v63 = vadd.f32 %v3043_v21, %v11492_v6 }
 0x4e8   :  { %v9639_v18 = vpop.f32.mrb[39].mxu1  ;;  %11007 = vtanh.f32 %v3197_v12 }
 0x4ee   :  { %v11004_v1 = vpop.eup %11003 }
 0x4ef   :  { %v3195_v51 = vmul.f32 0.5, %v11004_v1  ;;  %v3418_v43 = vpop.f32.mrb[24].mxu0  ;;  %v3489_v4 = vpop.f32.mrb[40].mxu1 }
 0x4f0   :  { %v10851_v11 = vadd.f32 %v3418_v43, %v12878_v52  ;;  %v3420_v24 = vpop.f32.mrb[25].mxu0  ;;  %v9650_v13 = vpop.f32.mrb[41].mxu1 }
 0x4f1   :  { %v11006_v49 = vpop.eup %11005  ;;  %v3196_v10 = vadd.f32 0.5, %v3195_v51  ;;  %v10852_v9 = vadd.f32 %v3420_v24, %v11690_v32 }
 0x4f2   :  { %v2903_v25 = vsub.f32 %v11924_v48, %v11006_v49  ;;  %v3495_v1 = vmul.f32 0.5, %v10851_v11  ;;  %v11008_v48 = vpop.eup %11007 }
 0x4f3   :  { %v3202_v18 = vmul.f32 %v3201_v44, %v3196_v10  ;;  %v3499_v21 = vmul.f32 0.5, %v10852_v9  ;;  %v3199_v12 = vmul.f32 0.5, %v11008_v48 }
 0x4f4   :  { %v2904_v43 = vmul.f32 %v2903_v25, %v2898_v36  ;;  %11009 = vtanh.f32 %v3495_v1 }
 0x4f5   :  { %v3203_v15 = vadd.f32 %v3202_v18, %v3044_v63  ;;  %v3503_v63 = vadd.f32 %v11709_v35, %v3489_v4  ;;  %v3200_v18 = vadd.f32 0.5, %v3199_v12 }
 0x4f6   :  { %v12092_v38 = vadd.f32 %v11006_v49, %v2904_v43 }
 0x4f7   :  { %11011 = vtanh.f32 %v3203_v15  ;;  %v12094_v51 = vpop.f32.mrb[42].mxu1 }
 0x4f8   :  { %v9661_v13 = vpop.f32.mrb[43].mxu1  ;;  %9067 = vmatmul.mubr.msk.f32.vlgmr.msra.gmra.mrb[28].mxu0 %vm87_vm1, %v12092_v38  ;;  %9682 = vmatmul.mubr.msk.f32.vlgmr.msra.gmra.mrb[46].mxu1 %vm87_vm1, %v12092_v38  ;;  %11013 = vtanh.f32 %v3499_v21 }
 0x4f9   :  { %10386 = vmatpush1.bf16.msra.mxu0 %v11341_v16  ;;  %10393 = vmatpush3.bf16.msra.mxu1 %v11343_v17  ;;  %v3346_v13 = vadd.f32 %v12080_v54, %v11716_v3 }
 0x4fa   :  { %10388 = vmatprep.subr.bf16.mxu0 %v11350_v23  ;;  %10394 = vmatprep.subr.bf16.mxu1 %v12861_v30 }
 0x4fb   :  { %4049 = vmatprep.mubr.f32.mxu0 %v12862_v60  ;;  %9692 = vmatprep.mubr.msk.f32.mxu1 %vm11140_vm0, %v12862_v60 }
 0x4fd   :  { %10390 = vmatpush1.bf16.msra.mxu0 %v11373_v31  ;;  %10396 = vmatpush3.bf16.msra.mxu1 %v11375_v33 }
 0x4fe   :  { %v11010_v39 = vpop.eup %11009  ;;  %10398 = vmatprep.subr.bf16.mxu0 %v11379_v34  ;;  %10405 = vmatprep.subr.bf16.mxu1 %v12861_v30 }
 0x4ff   :  { %v3497_v11 = vmul.f32 0.5, %v11010_v39  ;;  %v3720_v24 = vpop.f32.mrb[26].mxu0  ;;  %v3791_v49 = vpop.f32.mrb[44].mxu1 }
 0x500   :  { %v10853_v10 = vadd.f32 %v3720_v24, %v11944_v55  ;;  %v3722_v44 = vpop.f32.mrb[27].mxu0  ;;  %v9672_v36 = vpop.f32.mrb[45].mxu1  ;;  %9069 = vmatmul.mubr.msk.f32.vlgmr.msra.gmra.mrb[30].mxu0 %vm87_vm1, %v12092_v38  ;;  %9693 = vmatmul.mubr.msk.f32.vlgmr.msra.gmra.mrb[48].mxu1 %vm87_vm1, %v12092_v38 }
 0x501   :  { %v11012_v25 = vpop.eup %11011  ;;  %v3498_v1 = vadd.f32 0.5, %v3497_v11  ;;  %10400 = vmatpush1.bf16.msra.mxu0 %v11404_v45  ;;  %10407 = vmatpush3.bf16.msra.mxu1 %v11416_v50  ;;  %v10854_v54 = vadd.f32 %v3722_v44, %v11967_v5  ;;  %v3805_v44 = vadd.f32 %v11990_v14, %v3791_v49 }
 0x502   :  { %v3205_v43 = vsub.f32 %v11971_v58, %v11012_v25  ;;  %v3797_v15 = vmul.f32 0.5, %v10853_v10  ;;  %10402 = vmatprep.subr.bf16.mxu0 %v11407_v46  ;;  %10408 = vmatprep.subr.bf16.mxu1 %v12861_v30  ;;  %v11014_v48 = vpop.eup %11013 }
 0x503   :  { %v3504_v9 = vmul.f32 %v3503_v63, %v3498_v1  ;;  %4193 = vmatprep.mubr.f32.mxu0 %v12862_v60  ;;  %9703 = vmatprep.mubr.msk.f32.mxu1 %vm11140_vm0, %v12862_v60  ;;  %v3801_v21 = vmul.f32 0.5, %v10854_v54  ;;  %v3501_v12 = vmul.f32 0.5, %v11014_v48  ;;  %v3648_v1 = vadd.f32 %v12094_v51, %v11997_v19  ;;  %v12902_v51 = vld [vmem:[#allocation20_spill] sm:$0xff]  ;;  %v12907_v48 = vld [vmem:[#allocation25_spill] sm:$0xff] }
 0x504   :  { %v3206_v35 = vmul.f32 %v3205_v43, %v3200_v18  ;;  %11015 = vtanh.f32 %v3797_v15  ;;  %v12903_v43 = vld [vmem:[#allocation21_spill] sm:$0xff] }
 0x505   :  { %v3505_v4 = vadd.f32 %v3504_v9, %v3346_v13  ;;  %10404 = vmatpush1.bf16.msra.mxu0 %v11429_v56  ;;  %10410 = vmatpush3.bf16.msra.mxu1 %v11434_v57  ;;  %v3502_v36 = vadd.f32 0.5, %v3501_v12  ;;  %v12904_v13 = vld [vmem:[#allocation22_spill] sm:$0xff]  ;;  %v12905_v9 = vld [vmem:[#allocation23_spill] sm:$0xff] }
 0x506   :  { %v12130_v58 = vadd.f32 %v11012_v25, %v3206_v35  ;;  %10412 = vmatprep.subr.bf16.mxu0 %v11531_v47  ;;  %10419 = vmatprep.subr.bf16.mxu1 %v12861_v30  ;;  %v12909_v12 = vld [vmem:[#allocation15_spill] sm:$0xff] }
 0x507   :  { %11017 = vtanh.f32 %v3505_v4  ;;  %v12906_v4 = vld [vmem:[#allocation24_spill] sm:$0xff] }
 0x508   :  { %9071 = vmatmul.mubr.msk.f32.vlgmr.msra.gmra.mrb[30].mxu0 %vm87_vm1, %v12130_v58  ;;  %9704 = vmatmul.mubr.msk.f32.vlgmr.msra.gmra.mrb[50].mxu1 %vm87_vm1, %v12130_v58  ;;  %11019 = vtanh.f32 %v3801_v21  ;;  %v12908_v21 = vld [vmem:[#allocation27_spill] sm:$0xff] }
 0x509   :  { %10414 = vmatpush1.bf16.msra.mxu0 %v11553_v62  ;;  %10421 = vmatpush3.bf16.msra.mxu1 %v11555_v0 }
 0x50a   :  { %10416 = vmatprep.subr.bf16.mxu0 %v11564_v7  ;;  %10422 = vmatprep.subr.bf16.mxu1 %v12861_v30 }
 0x50b   :  { %4351 = vmatprep.mubr.f32.mxu0 %v12862_v60  ;;  %9714 = vmatprep.mubr.msk.f32.mxu1 %vm11140_vm0, %v12862_v60 }
 0x50d   :  { %10418 = vmatpush1.bf16.msra.mxu0 %v11587_v20  ;;  %10424 = vmatpush3.bf16.msra.mxu1 %v11589_v26 }
 0x50e   :  { %v11016_v39 = vpop.eup %11015  ;;  %10426 = vmatprep.subr.bf16.mxu0 %v11593_v28  ;;  %10433 = vmatprep.subr.bf16.mxu1 %v12861_v30 }
 0x50f   :  { %v3799_v11 = vmul.f32 0.5, %v11016_v39 }
 0x510   :  { %9073 = vmatmul.mubr.msk.f32.vlgmr.msra.gmra.mrb[32].mxu0 %vm87_vm1, %v12130_v58  ;;  %9715 = vmatmul.mubr.msk.f32.vlgmr.msra.gmra.mrb[52].mxu1 %vm87_vm1, %v12130_v58 }
 0x511   :  { %v11018_v24 = vpop.eup %11017  ;;  %v3800_v10 = vadd.f32 0.5, %v3799_v11  ;;  %10428 = vmatpush1.bf16.msra.mxu0 %v11618_v41  ;;  %10435 = vmatpush3.bf16.msra.mxu1 %v11630_v53 }
 0x512   :  { %v3507_v25 = vsub.f32 %v12016_v2, %v11018_v24  ;;  %10430 = vmatprep.subr.bf16.mxu0 %v11621_v42  ;;  %10436 = vmatprep.subr.bf16.mxu1 %v12861_v30  ;;  %v11020_v15 = vpop.eup %11019 }
 0x513   :  { %v3806_v63 = vmul.f32 %v3805_v44, %v3800_v10  ;;  %4495 = vmatprep.mubr.f32.mxu0 %v12862_v60  ;;  %9725 = vmatprep.mubr.msk.f32.mxu1 %vm11140_vm0, %v12862_v60  ;;  %v3803_v35 = vmul.f32 0.5, %v11020_v15  ;;  %v12911_v44 = vld [vmem:[#allocation28_spill] sm:$0xff]  ;;  %v12918_v15 = vld [vmem:[#allocation5_spill] sm:$0xff] }
 0x514   :  { %v3508_v49 = vmul.f32 %v3507_v25, %v3502_v36  ;;  %v12912_v36 = vld [vmem:[#allocation29_spill] sm:$0xff] }
 0x515   :  { %v3807_v18 = vadd.f32 %v3806_v63, %v3648_v1  ;;  %10432 = vmatpush1.bf16.msra.mxu0 %v11643_v59  ;;  %10438 = vmatpush3.bf16.msra.mxu1 %v11648_v61  ;;  %v3804_v39 = vadd.f32 0.5, %v3803_v35  ;;  %v12914_v1 = vld [vmem:[#allocation2_spill] sm:$0xff]  ;;  %v12915_v63 = vld [vmem:[#allocation3_spill] sm:$0xff] }
 0x516   :  { %v12167_v2 = vadd.f32 %v11018_v24, %v3508_v49  ;;  %10440 = vmatprep.subr.bf16.mxu0 %v11770_v22  ;;  %10447 = vmatprep.subr.bf16.mxu1 %v12861_v30  ;;  %v12910_v24 = vld [vmem:[#allocation26_spill] sm:$0xff]  ;;  %v12919_v35 = vld [vmem:[#allocation7_spill] sm:$0xff] }
 0x517   :  { %11021 = vtanh.f32 %v3807_v18  ;;  %v12916_v49 = vld [vmem:[#allocation6_spill] sm:$0xff]  ;;  %v12917_v18 = vld [vmem:[#allocation4_spill] sm:$0xff] }
 0x518   :  { %9075 = vmatmul.mubr.msk.f32.vlgmr.msra.gmra.mrb[32].mxu0 %vm87_vm1, %v12167_v2  ;;  %9726 = vmatmul.mubr.msk.f32.vlgmr.msra.gmra.mrb[54].mxu1 %vm87_vm1, %v12167_v2 }
 0x519   :  { %10442 = vmatpush1.bf16.msra.mxu0 %v11792_v29  ;;  %10449 = vmatpush3.bf16.msra.mxu1 %v12902_v51  ;;  %v12926_v29 = vld [vmem:[#allocation16_spill] sm:$0xff] }
 0x51a   :  { %10444 = vmatprep.subr.bf16.mxu0 %v12903_v43  ;;  %10450 = vmatprep.subr.bf16.mxu1 %v12861_v30  ;;  %v12925_v43 = vld [vmem:[#allocation14_spill] sm:$0xff] }
 0x51b   :  { %4653 = vmatprep.mubr.f32.mxu0 %v12862_v60  ;;  %9736 = vmatprep.mubr.msk.f32.mxu1 %vm11140_vm0, %v12862_v60 }
 0x51d   :  { %10446 = vmatpush1.bf16.msra.mxu0 %v12904_v13  ;;  %10452 = vmatpush3.bf16.msra.mxu1 %v12905_v9 }
 0x51e   :  { %10454 = vmatprep.subr.bf16.mxu0 %v12906_v4  ;;  %10461 = vmatprep.subr.bf16.mxu1 %v12861_v30 }
 0x520   :  { %9077 = vmatmul.mubr.msk.f32.vlgmr.msra.gmra.mrb[34].mxu0 %vm87_vm1, %v12167_v2  ;;  %9737 = vmatmul.mubr.msk.f32.vlgmr.msra.gmra.mrb[56].mxu1 %vm87_vm1, %v12167_v2 }
 0x521   :  { %v11022_v54 = vpop.eup %11021  ;;  %10456 = vmatpush1.bf16.msra.mxu0 %v12907_v48  ;;  %10463 = vmatpush3.bf16.msra.mxu1 %v12908_v21 }
 0x522   :  { %v3809_v11 = vsub.f32 %v12909_v12, %v11022_v54  ;;  %10458 = vmatprep.subr.bf16.mxu0 %v12910_v24  ;;  %10464 = vmatprep.subr.bf16.mxu1 %v12861_v30  ;;  %v12921_v12 = vld [vmem:[#allocation10_spill] sm:$0xff] }
 0x523   :  { %4797 = vmatprep.mubr.f32.mxu0 %v12862_v60  ;;  %9747 = vmatprep.mubr.msk.f32.mxu1 %vm11140_vm0, %v12862_v60 }
 0x524   :  { %v3810_v10 = vmul.f32 %v3809_v11, %v3804_v39  ;;  %v3816_v39 = vpop.permute.xlu1 %3815 }
 0x525   :  { %10460 = vmatpush1.bf16.msra.mxu0 %v12911_v44  ;;  %10466 = vmatpush3.bf16.msra.mxu1 %v12912_v36  ;;  %v3818_v11 = vmul.f32 %v3816_v39, %v12921_v12  ;;  %v3820_v12 = vmul.f32 %v3816_v39, %v12925_v43 }
 0x526   :  { %v12200_v25 = vadd.f32 %v11022_v54, %v3810_v10  ;;  %10468 = vmatprep.subr.bf16.mxu0 %v12914_v1  ;;  %10475 = vmatprep.subr.bf16.mxu1 %v12861_v30  ;;  %v12920_v54 = vld [vmem:[#allocation8_spill] sm:$0xff]  ;;  %v12922_v10 = vld [vmem:[#allocation11_spill] sm:$0xff] }
 0x528   :  { %12913 = vst [vmem:[#allocation17_spill] sm:$0xff] %v12200_v25  ;;  %9079 = vmatmul.mubr.msk.f32.vlgmr.msra.gmra.mrb[34].mxu0 %vm87_vm1, %v12200_v25  ;;  %9748 = vmatmul.mubr.msk.f32.vlgmr.msra.gmra.mrb[58].mxu1 %vm87_vm1, %v12200_v25  ;;  %v12923_v25 = vld [vmem:[#allocation12_spill] sm:$0xff] }
 0x529   :  { %10470 = vmatpush1.bf16.msra.mxu0 %v12915_v63  ;;  %10477 = vmatpush3.bf16.msra.mxu1 %v12916_v49  ;;  %v3819_v21 = vmul.f32 %v3816_v39, %v12923_v25 }
 0x52a   :  { %10472 = vmatprep.subr.bf16.mxu0 %v12917_v18  ;;  %10478 = vmatprep.subr.bf16.mxu1 %v12861_v30  ;;  %v3821_v18 = vadd.f32 %v3818_v11, %v12922_v10 }
 0x52b   :  { %4970 = vmatprep.mubr.f32.mxu0 %v12862_v60  ;;  %9758 = vmatprep.mubr.msk.f32.mxu1 %vm11140_vm0, %v12862_v60 }
 0x52d   :  { %10474 = vmatpush1.bf16.msra.mxu0 %v12918_v15  ;;  %10480 = vmatpush3.bf16.msra.mxu1 %v12919_v35  ;;  %v12924_v15 = vld [vmem:[#allocation13_spill] sm:$0xff] }
 0x52e   :  { %10482 = vmatprep.subr.bf16.mxu0 %v12920_v54  ;;  %10489 = vmatprep.subr.bf16.mxu1 %v12861_v30  ;;  %v3822_v35 = vadd.f32 %v3819_v21, %v12924_v15  ;;  %v3823_v21 = vadd.f32 %v3820_v12, %v12876_v8 }
 0x5cb   :  { %v3893_v49 = vpop.f32.mrb[28].mxu0  ;;  %v3964_v63 = vpop.f32.mrb[46].mxu1 }
 0x5cc   :  { %v3968_v1 = vadd.f32 %v3893_v49, %v3821_v18  ;;  %v3895_v36 = vpop.f32.mrb[29].mxu0  ;;  %v9683_v44 = vpop.f32.mrb[47].mxu1  ;;  %v3978_v25 = vadd.f32 %v12076_v27, %v3964_v63 }
 0x5cd   :  { %v3969_v4 = vadd.f32 %v3895_v36, %v3822_v35 }
 0x5ce   :  { %v3970_v24 = vmul.f32 0.5, %v3968_v1 }
 0x5cf   :  { %v3974_v9 = vmul.f32 0.5, %v3969_v4 }
 0x5d0   :  { %11023 = vtanh.f32 %v3970_v24 }
 0x5d1   :  { %11025 = vtanh.f32 %v3974_v9 }
 0x5d3   :  { %v4122_v48 = vpop.f32.mrb[48].mxu1 }
 0x5d4   :  { %v9694_v54 = vpop.f32.mrb[49].mxu1 }
 0x5da   :  { %v11024_v13 = vpop.eup %11023 }
 0x5db   :  { %v3972_v51 = vmul.f32 0.5, %v11024_v13  ;;  %v4195_v11 = vpop.f32.mrb[30].mxu0  ;;  %v4266_v10 = vpop.f32.mrb[50].mxu1 }
 0x5dc   :  { %v10855_v49 = vadd.f32 %v4195_v11, %v12926_v29  ;;  %v4197_v18 = vpop.f32.mrb[31].mxu0  ;;  %v9705_v44 = vpop.f32.mrb[51].mxu1 }
 0x5dd   :  { %v3973_v1 = vadd.f32 0.5, %v3972_v51  ;;  %v10856_v35 = vadd.f32 %v4197_v18, %v12877_v40  ;;  %v11026_v39 = vpop.eup %11025 }
 0x5de   :  { %v4272_v24 = vmul.f32 0.5, %v10855_v49  ;;  %v3976_v44 = vmul.f32 0.5, %v11026_v39 }
 0x5df   :  { %v3979_v54 = vmul.f32 %v3978_v25, %v3973_v1  ;;  %v4276_v11 = vmul.f32 0.5, %v10856_v35 }
 0x5e0   :  { %11027 = vtanh.f32 %v4272_v24  ;;  %v4280_v24 = vadd.f32 %v12087_v37, %v4266_v10 }
 0x5e1   :  { %v3980_v4 = vadd.f32 %v3979_v54, %v3823_v21  ;;  %v3977_v21 = vadd.f32 0.5, %v3976_v44 }
 0x5e3   :  { %11029 = vtanh.f32 %v3980_v4  ;;  %v12227_v36 = vpop.f32.mrb[52].mxu1  ;;  %v4123_v4 = vadd.f32 %v4122_v48, %v11492_v6 }
 0x5e4   :  { %v9716_v13 = vpop.f32.mrb[53].mxu1  ;;  %11031 = vtanh.f32 %v4276_v11 }
 0x5ea   :  { %v11028_v29 = vpop.eup %11027 }
 0x5eb   :  { %v4274_v51 = vmul.f32 0.5, %v11028_v29  ;;  %v4497_v43 = vpop.f32.mrb[32].mxu0  ;;  %v4568_v63 = vpop.f32.mrb[54].mxu1 }
 0x5ec   :  { %v10857_v9 = vadd.f32 %v4497_v43, %v12878_v52  ;;  %v4499_v49 = vpop.f32.mrb[33].mxu0  ;;  %v9727_v12 = vpop.f32.mrb[55].mxu1 }
 0x5ed   :  { %v11030_v25 = vpop.eup %11029  ;;  %v4275_v1 = vadd.f32 0.5, %v4274_v51 }
 0x5ee   :  { %v3982_v54 = vsub.f32 %v12092_v38, %v11030_v25  ;;  %v4574_v18 = vmul.f32 0.5, %v10857_v9  ;;  %v10858_v38 = vadd.f32 %v4499_v49, %v11690_v32  ;;  %v11032_v48 = vpop.eup %11031 }
 0x5ef   :  { %v4281_v13 = vmul.f32 %v4280_v24, %v4275_v1  ;;  %v4278_v44 = vmul.f32 0.5, %v11032_v48 }
 0x5f0   :  { %v3983_v35 = vmul.f32 %v3982_v54, %v3977_v21  ;;  %11033 = vtanh.f32 %v4574_v18  ;;  %v4578_v10 = vmul.f32 0.5, %v10858_v38  ;;  %v12262_v18 = vld [vmem:[%s12777_s5 + $0x2] ss:$0 sm:$0xff] }
 0x5f1   :  { %v4282_v29 = vadd.f32 %v4281_v13, %v4123_v4  ;;  %v4582_v4 = vadd.f32 %v12262_v18, %v4568_v63  ;;  %v4279_v13 = vadd.f32 0.5, %v4278_v44 }
 0x5f2   :  { %v12234_v39 = vadd.f32 %v11030_v25, %v3983_v35 }
 0x5f3   :  { %11035 = vtanh.f32 %v4282_v29  ;;  %v12236_v43 = vpop.f32.mrb[56].mxu1 }
 0x5f4   :  { %v9738_v12 = vpop.f32.mrb[57].mxu1  ;;  %9081 = vmatmul.mubr.msk.f32.vlgmr.msra.gmra.mrb[36].mxu0 %vm87_vm1, %v12234_v39  ;;  %9759 = vmatmul.mubr.msk.f32.vlgmr.msra.gmra.mrb[60].mxu1 %vm87_vm1, %v12234_v39  ;;  %11037 = vtanh.f32 %v4578_v10 }
 0x5f5   :  { %10484 = vmatpush1.bf16.msra.mxu0 %v11341_v16  ;;  %10491 = vmatpush3.bf16.msra.mxu1 %v11343_v17  ;;  %v4425_v12 = vadd.f32 %v12227_v36, %v11716_v3 }
 0x5f6   :  { %10486 = vmatprep.subr.bf16.mxu0 %v11350_v23  ;;  %10492 = vmatprep.subr.bf16.mxu1 %v12861_v30 }
 0x5f7   :  { %5128 = vmatprep.mubr.f32.mxu0 %v12862_v60  ;;  %9769 = vmatprep.mubr.msk.f32.mxu1 %vm11140_vm0, %v12862_v60 }
 0x5f9   :  { %10488 = vmatpush1.bf16.msra.mxu0 %v11373_v31  ;;  %10494 = vmatpush3.bf16.msra.mxu1 %v11375_v33 }
 0x5fa   :  { %v11034_v11 = vpop.eup %11033  ;;  %10496 = vmatprep.subr.bf16.mxu0 %v11379_v34  ;;  %10503 = vmatprep.subr.bf16.mxu1 %v12861_v30 }
 0x5fb   :  { %v4576_v51 = vmul.f32 0.5, %v11034_v11  ;;  %v4799_v9 = vpop.f32.mrb[34].mxu0  ;;  %v4870_v49 = vpop.f32.mrb[58].mxu1 }
 0x5fc   :  { %v10859_v25 = vadd.f32 %v4799_v9, %v11944_v55  ;;  %v4801_v1 = vpop.f32.mrb[35].mxu0  ;;  %v9749_v24 = vpop.f32.mrb[59].mxu1  ;;  %9083 = vmatmul.mubr.msk.f32.vlgmr.msra.gmra.mrb[38].mxu0 %vm87_vm1, %v12234_v39  ;;  %9770 = vmatmul.mubr.msk.f32.vlgmr.msra.gmra.mrb[62].mxu1 %vm87_vm1, %v12234_v39 }
 0x5fd   :  { %v11036_v21 = vpop.eup %11035  ;;  %v4577_v54 = vadd.f32 0.5, %v4576_v51  ;;  %10498 = vmatpush1.bf16.msra.mxu0 %v11404_v45  ;;  %10505 = vmatpush3.bf16.msra.mxu1 %v11416_v50  ;;  %v10860_v36 = vadd.f32 %v4801_v1, %v11967_v5  ;;  %v4884_v24 = vadd.f32 %v11990_v14, %v4870_v49 }
 0x5fe   :  { %v4284_v35 = vsub.f32 %v12130_v58, %v11036_v21  ;;  %v4876_v29 = vmul.f32 0.5, %v10859_v25  ;;  %10500 = vmatprep.subr.bf16.mxu0 %v11407_v46  ;;  %10506 = vmatprep.subr.bf16.mxu1 %v12861_v30  ;;  %v11038_v10 = vpop.eup %11037 }
 0x5ff   :  { %v4583_v38 = vmul.f32 %v4582_v4, %v4577_v54  ;;  %5272 = vmatprep.mubr.f32.mxu0 %v12862_v60  ;;  %9780 = vmatprep.mubr.msk.f32.mxu1 %vm11140_vm0, %v12862_v60  ;;  %v4880_v11 = vmul.f32 0.5, %v10860_v36  ;;  %v4580_v51 = vmul.f32 0.5, %v11038_v10  ;;  %v4727_v4 = vadd.f32 %v12236_v43, %v11997_v19  ;;  %v12927_v43 = vld [vmem:[#allocation19_spill] sm:$0xff]  ;;  %v12932_v36 = vld [vmem:[#allocation24_spill] sm:$0xff] }
 0x600   :  { %v4285_v63 = vmul.f32 %v4284_v35, %v4279_v13  ;;  %11039 = vtanh.f32 %v4876_v29  ;;  %v12928_v35 = vld [vmem:[#allocation20_spill] sm:$0xff]  ;;  %v12929_v29 = vld [vmem:[#allocation21_spill] sm:$0xff] }
 0x601   :  { %v4584_v48 = vadd.f32 %v4583_v38, %v4425_v12  ;;  %10502 = vmatpush1.bf16.msra.mxu0 %v11429_v56  ;;  %10508 = vmatpush3.bf16.msra.mxu1 %v11434_v57  ;;  %v12930_v38 = vld [vmem:[#allocation22_spill] sm:$0xff] }
 0x602   :  { %v12277_v58 = vadd.f32 %v11036_v21, %v4285_v63  ;;  %10510 = vmatprep.subr.bf16.mxu0 %v11531_v47  ;;  %10517 = vmatprep.subr.bf16.mxu1 %v12861_v30  ;;  %v4581_v21 = vadd.f32 0.5, %v4580_v51  ;;  %v12931_v63 = vld [vmem:[#allocation23_spill] sm:$0xff] }
 0x603   :  { %11041 = vtanh.f32 %v4584_v48 }
 0x604   :  { %9085 = vmatmul.mubr.msk.f32.vlgmr.msra.gmra.mrb[38].mxu0 %vm87_vm1, %v12277_v58  ;;  %9781 = vmatmul.mubr.msk.f32.vlgmr.msra.gmra.mrb[64].mxu1 %vm87_vm1, %v12277_v58  ;;  %11043 = vtanh.f32 %v4880_v11  ;;  %v12933_v11 = vld [vmem:[#allocation25_spill] sm:$0xff] }
 0x605   :  { %10512 = vmatpush1.bf16.msra.mxu0 %v11553_v62  ;;  %10519 = vmatpush3.bf16.msra.mxu1 %v11555_v0 }
 0x606   :  { %10514 = vmatprep.subr.bf16.mxu0 %v11564_v7  ;;  %10520 = vmatprep.subr.bf16.mxu1 %v12861_v30 }
 0x607   :  { %5430 = vmatprep.mubr.f32.mxu0 %v12862_v60  ;;  %9791 = vmatprep.mubr.msk.f32.mxu1 %vm11140_vm0, %v12862_v60 }
 0x609   :  { %10516 = vmatpush1.bf16.msra.mxu0 %v11587_v20  ;;  %10522 = vmatpush3.bf16.msra.mxu1 %v11589_v26 }
 0x60a   :  { %v11040_v44 = vpop.eup %11039  ;;  %10524 = vmatprep.subr.bf16.mxu0 %v11593_v28  ;;  %10531 = vmatprep.subr.bf16.mxu1 %v12861_v30 }
 0x60b   :  { %v4878_v9 = vmul.f32 0.5, %v11040_v44  ;;  %v12934_v44 = vld [vmem:[#allocation27_spill] sm:$0xff] }
 0x60c   :  { %9087 = vmatmul.mubr.msk.f32.vlgmr.msra.gmra.mrb[40].mxu0 %vm87_vm1, %v12277_v58  ;;  %9792 = vmatmul.mubr.msk.f32.vlgmr.msra.gmra.mrb[66].mxu1 %vm87_vm1, %v12277_v58 }
 0x60d   :  { %v11042_v25 = vpop.eup %11041  ;;  %v4879_v1 = vadd.f32 0.5, %v4878_v9  ;;  %10526 = vmatpush1.bf16.msra.mxu0 %v11618_v41  ;;  %10533 = vmatpush3.bf16.msra.mxu1 %v11630_v53  ;;  %v12935_v9 = vld [vmem:[#allocation17_spill] sm:$0xff] }
 0x60e   :  { %v4586_v54 = vsub.f32 %v12167_v2, %v11042_v25  ;;  %10528 = vmatprep.subr.bf16.mxu0 %v11621_v42  ;;  %10534 = vmatprep.subr.bf16.mxu1 %v12861_v30  ;;  %v11044_v12 = vpop.eup %11043 }
 0x60f   :  { %v4885_v13 = vmul.f32 %v4884_v24, %v4879_v1  ;;  %5574 = vmatprep.mubr.f32.mxu0 %v12862_v60  ;;  %9802 = vmatprep.mubr.msk.f32.mxu1 %vm11140_vm0, %v12862_v60  ;;  %v4882_v48 = vmul.f32 0.5, %v11044_v12  ;;  %v12936_v1 = vld [vmem:[#allocation26_spill] sm:$0xff]  ;;  %v12943_v12 = vld [vmem:[#allocation4_spill] sm:$0xff] }
 0x610   :  { %v4587_v14 = vmul.f32 %v4586_v54, %v4581_v21  ;;  %v12937_v21 = vld [vmem:[#allocation28_spill] sm:$0xff]  ;;  %v12938_v54 = vld [vmem:[#allocation29_spill] sm:$0xff] }
 0x611   :  { %v4886_v49 = vadd.f32 %v4885_v13, %v4727_v4  ;;  %10530 = vmatpush1.bf16.msra.mxu0 %v11643_v59  ;;  %10536 = vmatpush3.bf16.msra.mxu1 %v11648_v61  ;;  %v4883_v51 = vadd.f32 0.5, %v4882_v48  ;;  %v12940_v13 = vld [vmem:[#allocation2_spill] sm:$0xff]  ;;  %v12944_v48 = vld [vmem:[#allocation5_spill] sm:$0xff] }
 0x612   :  { %v12314_v2 = vadd.f32 %v11042_v25, %v4587_v14  ;;  %10538 = vmatprep.subr.bf16.mxu0 %v11770_v22  ;;  %10545 = vmatprep.subr.bf16.mxu1 %v12861_v30  ;;  %v12941_v14 = vld [vmem:[#allocation3_spill] sm:$0xff] }
 0x613   :  { %11045 = vtanh.f32 %v4886_v49  ;;  %v12942_v49 = vld [vmem:[#allocation6_spill] sm:$0xff] }
 0x614   :  { %9089 = vmatmul.mubr.msk.f32.vlgmr.msra.gmra.mrb[40].mxu0 %vm87_vm1, %v12314_v2  ;;  %9803 = vmatmul.mubr.msk.f32.vlgmr.msra.gmra.mrb[68].mxu1 %vm87_vm1, %v12314_v2 }
 0x615   :  { %10540 = vmatpush1.bf16.msra.mxu0 %v12927_v43  ;;  %10547 = vmatpush3.bf16.msra.mxu1 %v12928_v35  ;;  %v12951_v43 = vld [vmem:[#allocation16_spill] sm:$0xff] }
 0x616   :  { %10542 = vmatprep.subr.bf16.mxu0 %v12929_v29  ;;  %10548 = vmatprep.subr.bf16.mxu1 %v12861_v30  ;;  %v12950_v29 = vld [vmem:[#allocation14_spill] sm:$0xff] }
 0x617   :  { %5732 = vmatprep.mubr.f32.mxu0 %v12862_v60  ;;  %9813 = vmatprep.mubr.msk.f32.mxu1 %vm11140_vm0, %v12862_v60 }
 0x619   :  { %10544 = vmatpush1.bf16.msra.mxu0 %v12930_v38  ;;  %10550 = vmatpush3.bf16.msra.mxu1 %v12931_v63 }
 0x61a   :  { %10552 = vmatprep.subr.bf16.mxu0 %v12932_v36  ;;  %10559 = vmatprep.subr.bf16.mxu1 %v12861_v30 }
 0x61c   :  { %9091 = vmatmul.mubr.msk.f32.vlgmr.msra.gmra.mrb[42].mxu0 %vm87_vm1, %v12314_v2  ;;  %9814 = vmatmul.mubr.msk.f32.vlgmr.msra.gmra.mrb[70].mxu1 %vm87_vm1, %v12314_v2 }
 0x61d   :  { %v11046_v10 = vpop.eup %11045  ;;  %10554 = vmatpush1.bf16.msra.mxu0 %v12933_v11  ;;  %10561 = vmatpush3.bf16.msra.mxu1 %v12934_v44  ;;  %v12949_v44 = vld [vmem:[#allocation12_spill] sm:$0xff] }
 0x61e   :  { %v4888_v25 = vsub.f32 %v12935_v9, %v11046_v10  ;;  %10556 = vmatprep.subr.bf16.mxu0 %v12936_v1  ;;  %10562 = vmatprep.subr.bf16.mxu1 %v12861_v30  ;;  %v4895_v9 = vpop.permute.xlu0 %4894 }
 0x61f   :  { %5876 = vmatprep.mubr.f32.mxu0 %v12862_v60  ;;  %9824 = vmatprep.mubr.msk.f32.mxu1 %vm11140_vm0, %v12862_v60  ;;  %v4898_v11 = vmul.f32 %v4895_v9, %v12949_v44 }
 0x620   :  { %v4889_v24 = vmul.f32 %v4888_v25, %v4883_v51  ;;  %v12946_v51 = vld [vmem:[#allocation8_spill] sm:$0xff]  ;;  %v12947_v25 = vld [vmem:[#allocation10_spill] sm:$0xff] }
 0x621   :  { %10558 = vmatpush1.bf16.msra.mxu0 %v12937_v21  ;;  %10564 = vmatpush3.bf16.msra.mxu1 %v12938_v54 }
 0x622   :  { %v12347_v4 = vadd.f32 %v11046_v10, %v4889_v24  ;;  %10566 = vmatprep.subr.bf16.mxu0 %v12940_v13  ;;  %10573 = vmatprep.subr.bf16.mxu1 %v12861_v30  ;;  %v12945_v10 = vld [vmem:[#allocation7_spill] sm:$0xff]  ;;  %v4897_v24 = vmul.f32 %v4895_v9, %v12947_v25  ;;  %v4899_v25 = vmul.f32 %v4895_v9, %v12950_v29 }
 0x623   :  { %v12948_v13 = vld [vmem:[#allocation11_spill] sm:$0xff] }
 0x624   :  { %12939 = vst [vmem:[#allocation18_spill] sm:$0xff] %v12347_v4  ;;  %9093 = vmatmul.mubr.msk.f32.vlgmr.msra.gmra.mrb[42].mxu0 %vm87_vm1, %v12347_v4  ;;  %9825 = vmatmul.mubr.msk.f32.vlgmr.msra.gmra.mrb[72].mxu1 %vm87_vm1, %v12347_v4 }
 0x625   :  { %10568 = vmatpush1.bf16.msra.mxu0 %v12941_v14  ;;  %10575 = vmatpush3.bf16.msra.mxu1 %v12942_v49  ;;  %v4900_v14 = vadd.f32 %v4897_v24, %v12948_v13 }
 0x626   :  { %10570 = vmatprep.subr.bf16.mxu0 %v12943_v12  ;;  %10576 = vmatprep.subr.bf16.mxu1 %v12861_v30 }
 0x627   :  { %6049 = vmatprep.mubr.f32.mxu0 %v12862_v60  ;;  %9835 = vmatprep.mubr.msk.f32.mxu1 %vm11140_vm0, %v12862_v60 }
 0x629   :  { %10572 = vmatpush1.bf16.msra.mxu0 %v12944_v48  ;;  %10578 = vmatpush3.bf16.msra.mxu1 %v12945_v10  ;;  %v4901_v48 = vadd.f32 %v4898_v11, %v12924_v15  ;;  %v4902_v11 = vadd.f32 %v4899_v25, %v12876_v8 }
 0x62a   :  { %10580 = vmatprep.subr.bf16.mxu0 %v12946_v51  ;;  %10587 = vmatprep.subr.bf16.mxu1 %v12861_v30 }
 0x6c7   :  { %v4972_v49 = vpop.f32.mrb[36].mxu0  ;;  %v5043_v12 = vpop.f32.mrb[60].mxu1 }
 0x6c8   :  { %v5047_v54 = vadd.f32 %v4972_v49, %v4900_v14  ;;  %v4974_v21 = vpop.f32.mrb[37].mxu0  ;;  %v9760_v1 = vpop.f32.mrb[61].mxu1  ;;  %v5057_v44 = vadd.f32 %v12076_v27, %v5043_v12 }
 0x6c9   :  { %v5048_v36 = vadd.f32 %v4974_v21, %v4901_v48 }
 0x6ca   :  { %v5049_v4 = vmul.f32 0.5, %v5047_v54 }
 0x6cb   :  { %v5053_v63 = vmul.f32 0.5, %v5048_v36 }
 0x6cc   :  { %11047 = vtanh.f32 %v5049_v4 }
 0x6cd   :  { %11049 = vtanh.f32 %v5053_v63 }
 0x6cf   :  { %v5201_v10 = vpop.f32.mrb[62].mxu1 }
 0x6d0   :  { %v9771_v51 = vpop.f32.mrb[63].mxu1 }
 0x6d6   :  { %v11048_v38 = vpop.eup %11047 }
 0x6d7   :  { %v5051_v35 = vmul.f32 0.5, %v11048_v38  ;;  %v5274_v24 = vpop.f32.mrb[38].mxu0  ;;  %v5345_v13 = vpop.f32.mrb[64].mxu1 }
 0x6d8   :  { %v10861_v14 = vadd.f32 %v5274_v24, %v12951_v43  ;;  %v5276_v49 = vpop.f32.mrb[39].mxu0  ;;  %v9782_v1 = vpop.f32.mrb[65].mxu1 }
 0x6d9   :  { %v5052_v54 = vadd.f32 0.5, %v5051_v35  ;;  %v10862_v9 = vadd.f32 %v5276_v49, %v12877_v40  ;;  %v11050_v48 = vpop.eup %11049 }
 0x6da   :  { %v5351_v4 = vmul.f32 0.5, %v10861_v14  ;;  %v5055_v1 = vmul.f32 0.5, %v11050_v48 }
 0x6db   :  { %v5058_v51 = vmul.f32 %v5057_v44, %v5052_v54  ;;  %v5355_v24 = vmul.f32 0.5, %v10862_v9  ;;  %v5359_v54 = vadd.f32 %v12087_v37, %v5345_v13 }
 0x6dc   :  { %11051 = vtanh.f32 %v5351_v4  ;;  %v5056_v4 = vadd.f32 0.5, %v5055_v1 }
 0x6dd   :  { %v5059_v36 = vadd.f32 %v5058_v51, %v4902_v11  ;;  %v5202_v51 = vadd.f32 %v5201_v10, %v11492_v6 }
 0x6df   :  { %11053 = vtanh.f32 %v5059_v36  ;;  %v12374_v21 = vpop.f32.mrb[66].mxu1 }
 0x6e0   :  { %v9793_v38 = vpop.f32.mrb[67].mxu1  ;;  %11055 = vtanh.f32 %v5355_v24 }
 0x6e6   :  { %v11052_v43 = vpop.eup %11051 }
 0x6e7   :  { %v5353_v35 = vmul.f32 0.5, %v11052_v43  ;;  %v5576_v29 = vpop.f32.mrb[40].mxu0  ;;  %v5647_v27 = vpop.f32.mrb[68].mxu1 }
 0x6e8   :  { %v10863_v63 = vadd.f32 %v5576_v29, %v12878_v52  ;;  %v5578_v12 = vpop.f32.mrb[41].mxu0  ;;  %v9804_v25 = vpop.f32.mrb[69].mxu1 }
 0x6e9   :  { %v11054_v44 = vpop.eup %11053  ;;  %v5354_v14 = vadd.f32 0.5, %v5353_v35  ;;  %v10864_v37 = vadd.f32 %v5578_v12, %v11690_v32 }
 0x6ea   :  { %v5061_v11 = vsub.f32 %v12234_v39, %v11054_v44  ;;  %v5653_v49 = vmul.f32 0.5, %v10863_v63  ;;  %v11056_v39 = vpop.eup %11055 }
 0x6eb   :  { %v5360_v36 = vmul.f32 %v5359_v54, %v5354_v14  ;;  %v5657_v13 = vmul.f32 0.5, %v10864_v37  ;;  %v5357_v24 = vmul.f32 0.5, %v11056_v39 }
 0x6ec   :  { %v5062_v38 = vmul.f32 %v5061_v11, %v5056_v4  ;;  %11057 = vtanh.f32 %v5653_v49  ;;  %v5661_v4 = vadd.f32 %v12262_v18, %v5647_v27 }
 0x6ed   :  { %v5361_v43 = vadd.f32 %v5360_v36, %v5202_v51  ;;  %v5358_v11 = vadd.f32 0.5, %v5357_v24  ;;  %v5504_v36 = vadd.f32 %v12374_v21, %v11716_v3 }
 0x6ee   :  { %v12381_v9 = vadd.f32 %v11054_v44, %v5062_v38 }
 0x6ef   :  { %11059 = vtanh.f32 %v5361_v43  ;;  %v12383_v29 = vpop.f32.mrb[70].mxu1 }
 0x6f0   :  { %v9815_v48 = vpop.f32.mrb[71].mxu1  ;;  %9095 = vmatmul.mubr.msk.f32.vlgmr.msra.gmra.mrb[44].mxu0 %vm87_vm1, %v12381_v9  ;;  %9836 = vmatmul.mubr.msk.f32.vlgmr.msra.gmra.mrb[74].mxu1 %vm87_vm1, %v12381_v9  ;;  %11061 = vtanh.f32 %v5657_v13 }
 0x6f1   :  { %10582 = vmatpush1.bf16.msra.mxu0 %v11341_v16  ;;  %10589 = vmatpush3.bf16.msra.mxu1 %v11343_v17 }
 0x6f2   :  { %10584 = vmatprep.subr.bf16.mxu0 %v11350_v23  ;;  %10590 = vmatprep.subr.bf16.mxu1 %v12861_v30 }
 0x6f3   :  { %6207 = vmatprep.mubr.f32.mxu0 %v12862_v60  ;;  %9846 = vmatprep.mubr.msk.f32.mxu1 %vm11140_vm0, %v12862_v60 }
 0x6f5   :  { %10586 = vmatpush1.bf16.msra.mxu0 %v11373_v31  ;;  %10592 = vmatpush3.bf16.msra.mxu1 %v11375_v33 }
 0x6f6   :  { %v11058_v10 = vpop.eup %11057  ;;  %10594 = vmatprep.subr.bf16.mxu0 %v11379_v34  ;;  %10601 = vmatprep.subr.bf16.mxu1 %v12861_v30 }
 0x6f7   :  { %v5655_v1 = vmul.f32 0.5, %v11058_v10  ;;  %v5878_v35 = vpop.f32.mrb[42].mxu0  ;;  %v5949_v63 = vpop.f32.mrb[72].mxu1 }
 0x6f8   :  { %v10865_v12 = vadd.f32 %v5878_v35, %v11944_v55  ;;  %v5880_v25 = vpop.f32.mrb[43].mxu0  ;;  %v9826_v44 = vpop.f32.mrb[73].mxu1  ;;  %9097 = vmatmul.mubr.msk.f32.vlgmr.msra.gmra.mrb[46].mxu0 %vm87_vm1, %v12381_v9  ;;  %9847 = vmatmul.mubr.msk.f32.vlgmr.msra.gmra.mrb[76].mxu1 %vm87_vm1, %v12381_v9  ;;  %v12446_v35 = vld [vmem:[%s12777_s5 + $0x3] ss:$0 sm:$0xff] }
 0x6f9   :  { %v11060_v14 = vpop.eup %11059  ;;  %v5656_v54 = vadd.f32 0.5, %v5655_v1  ;;  %10596 = vmatpush1.bf16.msra.mxu0 %v11404_v45  ;;  %10603 = vmatpush3.bf16.msra.mxu1 %v11416_v50  ;;  %v10866_v21 = vadd.f32 %v5880_v25, %v11967_v5 }
 0x6fa   :  { %v5363_v49 = vsub.f32 %v12277_v58, %v11060_v14  ;;  %v5955_v51 = vmul.f32 0.5, %v10865_v12  ;;  %10598 = vmatprep.subr.bf16.mxu0 %v11407_v46  ;;  %10604 = vmatprep.subr.bf16.mxu1 %v12861_v30  ;;  %v11062_v48 = vpop.eup %11061  ;;  %v5963_v12 = vadd.f32 %v12446_v35, %v5949_v63 }
 0x6fb   :  { %v5662_v38 = vmul.f32 %v5661_v4, %v5656_v54  ;;  %6351 = vmatprep.mubr.f32.mxu0 %v12862_v60  ;;  %9857 = vmatprep.mubr.msk.f32.mxu1 %vm11140_vm0, %v12862_v60  ;;  %v5959_v37 = vmul.f32 0.5, %v10866_v21  ;;  %v5659_v13 = vmul.f32 0.5, %v11062_v48  ;;  %v12958_v48 = vld [vmem:[#allocation25_spill] sm:$0xff] }
 0x6fc   :  { %v5364_v27 = vmul.f32 %v5363_v49, %v5358_v11  ;;  %11063 = vtanh.f32 %v5955_v51  ;;  %v12953_v11 = vld [vmem:[#allocation20_spill] sm:$0xff]  ;;  %v12954_v49 = vld [vmem:[#allocation21_spill] sm:$0xff] }
 0x6fd   :  { %v5663_v43 = vadd.f32 %v5662_v38, %v5504_v36  ;;  %10600 = vmatpush1.bf16.msra.mxu0 %v11429_v56  ;;  %10606 = vmatpush3.bf16.msra.mxu1 %v11434_v57  ;;  %v5660_v25 = vadd.f32 0.5, %v5659_v13  ;;  %v12955_v36 = vld [vmem:[#allocation22_spill] sm:$0xff]  ;;  %v12956_v38 = vld [vmem:[#allocation23_spill] sm:$0xff] }
 0x6fe   :  { %v12419_v58 = vadd.f32 %v11060_v14, %v5364_v27  ;;  %10608 = vmatprep.subr.bf16.mxu0 %v11531_v47  ;;  %10615 = vmatprep.subr.bf16.mxu1 %v12861_v30  ;;  %v5806_v14 = vadd.f32 %v12383_v29, %v11997_v19  ;;  %v12952_v29 = vld [vmem:[#allocation19_spill] sm:$0xff]  ;;  %v12960_v13 = vld [vmem:[#allocation18_spill] sm:$0xff] }
 0x6ff   :  { %11065 = vtanh.f32 %v5663_v43  ;;  %v12957_v43 = vld [vmem:[#allocation24_spill] sm:$0xff] }
 0x700   :  { %9099 = vmatmul.mubr.msk.f32.vlgmr.msra.gmra.mrb[46].mxu0 %vm87_vm1, %v12419_v58  ;;  %9858 = vmatmul.mubr.msk.f32.vlgmr.msra.gmra.mrb[78].mxu1 %vm87_vm1, %v12419_v58  ;;  %11067 = vtanh.f32 %v5959_v37  ;;  %v12959_v37 = vld [vmem:[#allocation27_spill] sm:$0xff] }
 0x701   :  { %10610 = vmatpush1.bf16.msra.mxu0 %v11553_v62  ;;  %10617 = vmatpush3.bf16.msra.mxu1 %v11555_v0 }
 0x702   :  { %10612 = vmatprep.subr.bf16.mxu0 %v11564_v7  ;;  %10618 = vmatprep.subr.bf16.mxu1 %v12861_v30 }
 0x703   :  { %6509 = vmatprep.mubr.f32.mxu0 %v12862_v60  ;;  %9868 = vmatprep.mubr.msk.f32.mxu1 %vm11140_vm0, %v12862_v60 }
 0x705   :  { %10614 = vmatpush1.bf16.msra.mxu0 %v11587_v20  ;;  %10620 = vmatpush3.bf16.msra.mxu1 %v11589_v26 }
 0x706   :  { %v11064_v39 = vpop.eup %11063  ;;  %10622 = vmatprep.subr.bf16.mxu0 %v11593_v28  ;;  %10629 = vmatprep.subr.bf16.mxu1 %v12861_v30 }
 0x707   :  { %v5957_v10 = vmul.f32 0.5, %v11064_v39 }
 0x708   :  { %9101 = vmatmul.mubr.msk.f32.vlgmr.msra.gmra.mrb[48].mxu0 %vm87_vm1, %v12419_v58  ;;  %9869 = vmatmul.mubr.msk.f32.vlgmr.msra.gmra.mrb[80].mxu1 %vm87_vm1, %v12419_v58 }
 0x709   :  { %v11066_v24 = vpop.eup %11065  ;;  %v5958_v1 = vadd.f32 0.5, %v5957_v10  ;;  %10624 = vmatpush1.bf16.msra.mxu0 %v11618_v41  ;;  %10631 = vmatpush3.bf16.msra.mxu1 %v11630_v53 }
 0x70a   :  { %v5665_v44 = vsub.f32 %v12314_v2, %v11066_v24  ;;  %10626 = vmatprep.subr.bf16.mxu0 %v11621_v42  ;;  %10632 = vmatprep.subr.bf16.mxu1 %v12861_v30  ;;  %v11068_v51 = vpop.eup %11067 }
 0x70b   :  { %v5964_v54 = vmul.f32 %v5963_v12, %v5958_v1  ;;  %6653 = vmatprep.mubr.f32.mxu0 %v12862_v60  ;;  %9879 = vmatprep.mubr.msk.f32.mxu1 %vm11140_vm0, %v12862_v60  ;;  %v5961_v27 = vmul.f32 0.5, %v11068_v51  ;;  %v12962_v12 = vld [vmem:[#allocation28_spill] sm:$0xff] }
 0x70c   :  { %v5666_v63 = vmul.f32 %v5665_v44, %v5660_v25  ;;  %v12963_v25 = vld [vmem:[#allocation29_spill] sm:$0xff] }
 0x70d   :  { %v5965_v4 = vadd.f32 %v5964_v54, %v5806_v14  ;;  %10628 = vmatpush1.bf16.msra.mxu0 %v11643_v59  ;;  %10634 = vmatpush3.bf16.msra.mxu1 %v11648_v61  ;;  %v5962_v39 = vadd.f32 0.5, %v5961_v27  ;;  %v12965_v14 = vld [vmem:[#allocation8_spill] sm:$0xff]  ;;  %v12966_v54 = vld [vmem:[#allocation10_spill] sm:$0xff] }
 0x70e   :  { %v12461_v2 = vadd.f32 %v11066_v24, %v5666_v63  ;;  %10636 = vmatprep.subr.bf16.mxu0 %v11770_v22  ;;  %10643 = vmatprep.subr.bf16.mxu1 %v12861_v30  ;;  %v12961_v24 = vld [vmem:[#allocation26_spill] sm:$0xff]  ;;  %v12967_v63 = vld [vmem:[#allocation11_spill] sm:$0xff] }
 0x70f   :  { %11069 = vtanh.f32 %v5965_v4 }
 0x710   :  { %9103 = vmatmul.mubr.msk.f32.vlgmr.msra.gmra.mrb[48].mxu0 %vm87_vm1, %v12461_v2  ;;  %9880 = vmatmul.mubr.msk.f32.vlgmr.msra.gmra.mrb[82].mxu1 %vm87_vm1, %v12461_v2 }
 0x711   :  { %10638 = vmatpush1.bf16.msra.mxu0 %v12952_v29  ;;  %10645 = vmatpush3.bf16.msra.mxu1 %v12953_v11 }
 0x712   :  { %10640 = vmatprep.subr.bf16.mxu0 %v12954_v49  ;;  %10646 = vmatprep.subr.bf16.mxu1 %v12861_v30 }
 0x713   :  { %6811 = vmatprep.mubr.f32.mxu0 %v12862_v60  ;;  %9890 = vmatprep.mubr.msk.f32.mxu1 %vm11140_vm0, %v12862_v60 }
 0x715   :  { %10642 = vmatpush1.bf16.msra.mxu0 %v12955_v36  ;;  %10648 = vmatpush3.bf16.msra.mxu1 %v12956_v38 }
 0x716   :  { %10650 = vmatprep.subr.bf16.mxu0 %v12957_v43  ;;  %10657 = vmatprep.subr.bf16.mxu1 %v12861_v30 }
 0x718   :  { %9105 = vmatmul.mubr.msk.f32.vlgmr.msra.gmra.mrb[50].mxu0 %vm87_vm1, %v12461_v2  ;;  %9891 = vmatmul.mubr.msk.f32.vlgmr.msra.gmra.mrb[84].mxu1 %vm87_vm1, %v12461_v2 }
 0x719   :  { %v11070_v21 = vpop.eup %11069  ;;  %10652 = vmatpush1.bf16.msra.mxu0 %v12958_v48  ;;  %10659 = vmatpush3.bf16.msra.mxu1 %v12959_v37  ;;  %v12970_v37 = vld [vmem:[#allocation16_spill] sm:$0xff] }
 0x71a   :  { %v5967_v10 = vsub.f32 %v12960_v13, %v11070_v21  ;;  %10654 = vmatprep.subr.bf16.mxu0 %v12961_v24  ;;  %10660 = vmatprep.subr.bf16.mxu1 %v12861_v30  ;;  %v12969_v24 = vld [vmem:[#allocation14_spill] sm:$0xff] }
 0x71b   :  { %6955 = vmatprep.mubr.f32.mxu0 %v12862_v60  ;;  %9901 = vmatprep.mubr.msk.f32.mxu1 %vm11140_vm0, %v12862_v60 }
 0x71c   :  { %v5968_v1 = vmul.f32 %v5967_v10, %v5962_v39  ;;  %v12968_v10 = vld [vmem:[#allocation12_spill] sm:$0xff] }
 0x71d   :  { %10656 = vmatpush1.bf16.msra.mxu0 %v12962_v12  ;;  %10662 = vmatpush3.bf16.msra.mxu1 %v12963_v25 }
 0x71e   :  { %v12494_v44 = vadd.f32 %v11070_v21, %v5968_v1  ;;  %10664 = vmatprep.subr.bf16.mxu0 %v12965_v14  ;;  %10671 = vmatprep.subr.bf16.mxu1 %v12861_v30 }
 0x720   :  { %12964 = vst [vmem:[#allocation9_spill] sm:$0xff] %v12494_v44  ;;  %9107 = vmatmul.mubr.msk.f32.vlgmr.msra.gmra.mrb[50].mxu0 %vm87_vm1, %v12494_v44  ;;  %9902 = vmatmul.mubr.msk.f32.vlgmr.msra.gmra.mrb[86].mxu1 %vm87_vm1, %v12494_v44 }
 0x721   :  { %10666 = vmatpush1.bf16.msra.mxu0 %v11341_v16  ;;  %10673 = vmatpush3.bf16.msra.mxu1 %v11343_v17  ;;  %v5974_v16 = vpop.permute.xlu1 %5973 }
 0x722   :  { %10668 = vmatprep.subr.bf16.mxu0 %v11350_v23  ;;  %10674 = vmatprep.subr.bf16.mxu1 %v12861_v30  ;;  %v5976_v17 = vmul.f32 %v5974_v16, %v12966_v54  ;;  %v5977_v1 = vmul.f32 %v5974_v16, %v12968_v10  ;;  %v5978_v54 = vmul.f32 %v5974_v16, %v12969_v24 }
 0x723   :  { %7116 = vmatprep.mubr.f32.mxu0 %v12862_v60  ;;  %9912 = vmatprep.mubr.msk.f32.mxu1 %vm11140_vm0, %v12862_v60 }
 0x724   :  { %v5979_v23 = vadd.f32 %v5976_v17, %v12967_v63 }
 0x725   :  { %10670 = vmatpush1.bf16.msra.mxu0 %v11373_v31  ;;  %10676 = vmatpush3.bf16.msra.mxu1 %v11375_v33  ;;  %v5980_v31 = vadd.f32 %v5977_v1, %v12924_v15 }
 0x726   :  { %10678 = vmatprep.subr.bf16.mxu0 %v11379_v34  ;;  %10685 = vmatprep.subr.bf16.mxu1 %v12861_v30 }
 0x7c3   :  { %v6051_v4 = vpop.f32.mrb[44].mxu0  ;;  %v6122_v51 = vpop.f32.mrb[74].mxu1 }
 0x7c4   :  { %v6126_v27 = vadd.f32 %v6051_v4, %v5979_v23  ;;  %v6053_v21 = vpop.f32.mrb[45].mxu0  ;;  %v9837_v39 = vpop.f32.mrb[75].mxu1 }
 0x7c5   :  { %v6127_v14 = vadd.f32 %v6053_v21, %v5980_v31  ;;  %v5981_v21 = vadd.f32 %v5978_v54, %v12876_v8 }
 0x7c6   :  { %v6128_v13 = vmul.f32 0.5, %v6126_v27 }
 0x7c7   :  { %v6132_v25 = vmul.f32 0.5, %v6127_v14 }
 0x7c8   :  { %11071 = vtanh.f32 %v6128_v13  ;;  %v11135_v13 = vld [vmem:[%s12777_s5] ss:$0 sm:$0xff] }
 0x7c9   :  { %v6136_v15 = vadd.f32 %v11135_v13, %v6122_v51  ;;  %11073 = vtanh.f32 %v6132_v25 }
 0x7cb   :  { %v6280_v33 = vpop.f32.mrb[76].mxu1 }
 0x7cc   :  { %v9848_v34 = vpop.f32.mrb[77].mxu1 }
 0x7d2   :  { %v11072_v12 = vpop.eup %11071 }
 0x7d3   :  { %v6130_v44 = vmul.f32 0.5, %v11072_v12  ;;  %v6353_v17 = vpop.f32.mrb[46].mxu0  ;;  %v6424_v63 = vpop.f32.mrb[78].mxu1 }
 0x7d4   :  { %v10867_v23 = vadd.f32 %v6353_v17, %v12970_v37  ;;  %v6355_v4 = vpop.f32.mrb[47].mxu0  ;;  %v9859_v39 = vpop.f32.mrb[79].mxu1 }
 0x7d5   :  { %v6131_v27 = vadd.f32 0.5, %v6130_v44  ;;  %v10868_v31 = vadd.f32 %v6355_v4, %v12877_v40  ;;  %v11074_v34 = vpop.eup %11073 }
 0x7d6   :  { %v6430_v10 = vmul.f32 0.5, %v10867_v23  ;;  %v6134_v17 = vmul.f32 0.5, %v11074_v34 }
 0x7d7   :  { %v6137_v1 = vmul.f32 %v6136_v15, %v6131_v27  ;;  %v6434_v14 = vmul.f32 0.5, %v10868_v31  ;;  %v12528_v27 = vld [vmem:[%s12777_s5 + $0x1] ss:$0 sm:$0xff] }
 0x7d8   :  { %11075 = vtanh.f32 %v6430_v10  ;;  %v6438_v4 = vadd.f32 %v12528_v27, %v6424_v63  ;;  %v6135_v13 = vadd.f32 0.5, %v6134_v17 }
 0x7d9   :  { %v6138_v24 = vadd.f32 %v6137_v1, %v5981_v21  ;;  %v6281_v21 = vadd.f32 %v6280_v33, %v11492_v6 }
 0x7db   :  { %11077 = vtanh.f32 %v6138_v24  ;;  %v6582_v12 = vpop.f32.mrb[80].mxu1 }
 0x7dc   :  { %v9870_v16 = vpop.f32.mrb[81].mxu1  ;;  %11079 = vtanh.f32 %v6434_v14 }
 0x7e2   :  { %v11076_v44 = vpop.eup %11075 }
 0x7e3   :  { %v6432_v39 = vmul.f32 0.5, %v11076_v44  ;;  %v6655_v37 = vpop.f32.mrb[48].mxu0  ;;  %v6726_v48 = vpop.f32.mrb[82].mxu1 }
 0x7e4   :  { %v10869_v25 = vadd.f32 %v6655_v37, %v12878_v52  ;;  %v6657_v51 = vpop.f32.mrb[49].mxu0  ;;  %v9881_v23 = vpop.f32.mrb[83].mxu1 }
 0x7e5   :  { %v11078_v8 = vpop.eup %11077  ;;  %v6433_v54 = vadd.f32 0.5, %v6432_v39  ;;  %v10870_v63 = vadd.f32 %v6657_v51, %v11690_v32 }
 0x7e6   :  { %v6140_v15 = vsub.f32 %v12381_v9, %v11078_v8  ;;  %v6732_v10 = vmul.f32 0.5, %v10869_v25  ;;  %v11080_v9 = vpop.eup %11079 }
 0x7e7   :  { %v6439_v1 = vmul.f32 %v6438_v4, %v6433_v54  ;;  %v6736_v33 = vmul.f32 0.5, %v10870_v63  ;;  %v6436_v44 = vmul.f32 0.5, %v11080_v9  ;;  %v6583_v4 = vadd.f32 %v6582_v12, %v11716_v3 }
 0x7e8   :  { %v6141_v37 = vmul.f32 %v6140_v15, %v6135_v13  ;;  %11081 = vtanh.f32 %v6732_v10 }
 0x7e9   :  { %v6440_v24 = vadd.f32 %v6439_v1, %v6281_v21 }
 0x7ea   :  { %v6142_v16 = vadd.f32 %v11078_v8, %v6141_v37  ;;  %v6740_v8 = vadd.f32 %v12262_v18, %v6726_v48 }
 0x7eb   :  { %11083 = vtanh.f32 %v6440_v24  ;;  %v12533_v31 = vpop.f32.mrb[84].mxu1 }
 0x7ec   :  { %v9892_v34 = vpop.f32.mrb[85].mxu1  ;;  %9109 = vmatmul.mubr.msk.f32.vlgmr.msra.gmra.mrb[52].mxu0 %vm87_vm1, %v6142_v16  ;;  %9913 = vmatmul.mubr.msk.f32.vlgmr.msra.gmra.mrb[88].mxu1 %vm87_vm1, %v6142_v16  ;;  %11085 = vtanh.f32 %v6736_v33  ;;  %v6885_v33 = vadd.f32 %v12533_v31, %v11997_v19 }
 0x7ed   :  { %10680 = vmatpush1.bf16.msra.mxu0 %v11404_v45  ;;  %10687 = vmatpush3.bf16.msra.mxu1 %v11416_v50 }
 0x7ee   :  { %10682 = vmatprep.subr.bf16.mxu0 %v11407_v46  ;;  %10688 = vmatprep.subr.bf16.mxu1 %v12861_v30 }
 0x7ef   :  { %7260 = vmatprep.mubr.f32.mxu0 %v12862_v60  ;;  %9923 = vmatprep.mubr.msk.f32.mxu1 %vm11140_vm0, %v12862_v60 }
 0x7f1   :  { %10684 = vmatpush1.bf16.msra.mxu0 %v11429_v56  ;;  %10690 = vmatpush3.bf16.msra.mxu1 %v11434_v57  ;;  %v6437_v56 = vadd.f32 0.5, %v6436_v44 }
 0x7f2   :  { %v11082_v14 = vpop.eup %11081  ;;  %10692 = vmatprep.subr.bf16.mxu0 %v11531_v47  ;;  %10699 = vmatprep.subr.bf16.mxu1 %v12861_v30 }
 0x7f3   :  { %v6734_v45 = vmul.f32 0.5, %v11082_v14  ;;  %v6957_v46 = vpop.f32.mrb[50].mxu0  ;;  %v7028_v50 = vpop.f32.mrb[86].mxu1 }
 0x7f4   :  { %v10871_v17 = vadd.f32 %v6957_v46, %v11944_v55  ;;  %v6959_v39 = vpop.f32.mrb[51].mxu0  ;;  %v9903_v25 = vpop.f32.mrb[87].mxu1  ;;  %v7042_v34 = vadd.f32 %v12446_v35, %v7028_v50 }
 0x7f5   :  { %v11084_v51 = vpop.eup %11083  ;;  %v6735_v23 = vadd.f32 0.5, %v6734_v45  ;;  %v10872_v18 = vadd.f32 %v6959_v39, %v11967_v5  ;;  %v12972_v39 = vld [vmem:[#allocation27_spill] sm:$0xff] }
 0x7f6   :  { %v6442_v57 = vsub.f32 %v12419_v58, %v11084_v51  ;;  %v7034_v54 = vmul.f32 0.5, %v10871_v17  ;;  %v11086_v58 = vpop.eup %11085  ;;  %v12971_v17 = vld [vmem:[#allocation25_spill] sm:$0xff] }
 0x7f7   :  { %v6741_v13 = vmul.f32 %v6740_v8, %v6735_v23  ;;  %v7038_v48 = vmul.f32 0.5, %v10872_v18  ;;  %v6738_v1 = vmul.f32 0.5, %v11086_v58  ;;  %v12974_v8 = vld [vmem:[#allocation26_spill] sm:$0xff] }
 0x7f8   :  { %v6443_v15 = vmul.f32 %v6442_v57, %v6437_v56  ;;  %11087 = vtanh.f32 %v7034_v54  ;;  %v12975_v57 = vld [vmem:[#allocation28_spill] sm:$0xff]  ;;  %v12976_v54 = vld [vmem:[#allocation29_spill] sm:$0xff] }
 0x7f9   :  { %v6742_v10 = vadd.f32 %v6741_v13, %v6583_v4  ;;  %v6739_v63 = vadd.f32 0.5, %v6738_v1 }
 0x7fa   :  { %v12553_v21 = vadd.f32 %v11084_v51, %v6443_v15  ;;  %v12973_v51 = vld [vmem:[#allocation9_spill] sm:$0xff] }
 0x7fb   :  { %11089 = vtanh.f32 %v6742_v10 }
 0x7fc   :  { %9111 = vmatmul.mubr.msk.f32.vlgmr.msra.gmra.mrb[52].mxu0 %vm87_vm1, %v12553_v21  ;;  %9924 = vmatmul.mubr.msk.f32.vlgmr.msra.gmra.mrb[90].mxu1 %vm87_vm1, %v12553_v21  ;;  %11091 = vtanh.f32 %v7038_v48 }
 0x7fd   :  { %10694 = vmatpush1.bf16.msra.mxu0 %v11553_v62  ;;  %10701 = vmatpush3.bf16.msra.mxu1 %v11555_v0 }
 0x7fe   :  { %10696 = vmatprep.subr.bf16.mxu0 %v11564_v7  ;;  %10702 = vmatprep.subr.bf16.mxu1 %v12861_v30 }
 0x7ff   :  { %7418 = vmatprep.mubr.f32.mxu0 %v12862_v60  ;;  %9934 = vmatprep.mubr.msk.f32.mxu1 %vm11140_vm0, %v12862_v60 }
 0x801   :  { %10698 = vmatpush1.bf16.msra.mxu0 %v11587_v20  ;;  %10704 = vmatpush3.bf16.msra.mxu1 %v11589_v26 }
 0x802   :  { %v11088_v12 = vpop.eup %11087  ;;  %10706 = vmatprep.subr.bf16.mxu0 %v11593_v28  ;;  %10713 = vmatprep.subr.bf16.mxu1 %v12861_v30 }
 0x803   :  { %v7036_v37 = vmul.f32 0.5, %v11088_v12 }
 0x804   :  { %9113 = vmatmul.mubr.msk.f32.vlgmr.msra.gmra.mrb[54].mxu0 %vm87_vm1, %v12553_v21  ;;  %9935 = vmatmul.mubr.msk.f32.vlgmr.msra.gmra.mrb[92].mxu1 %vm87_vm1, %v12553_v21 }
 0x805   :  { %v11090_v24 = vpop.eup %11089  ;;  %v7037_v16 = vadd.f32 0.5, %v7036_v37  ;;  %10708 = vmatpush1.bf16.msra.mxu0 %v11618_v41  ;;  %10715 = vmatpush3.bf16.msra.mxu1 %v11630_v53 }
 0x806   :  { %v6744_v9 = vsub.f32 %v12461_v2, %v11090_v24  ;;  %10710 = vmatprep.subr.bf16.mxu0 %v11621_v42  ;;  %10716 = vmatprep.subr.bf16.mxu1 %v12861_v30  ;;  %v11092_v31 = vpop.eup %11091 }
 0x807   :  { %v7043_v14 = vmul.f32 %v7042_v34, %v7037_v16  ;;  %7562 = vmatprep.mubr.f32.mxu0 %v12862_v60  ;;  %9945 = vmatprep.mubr.msk.f32.mxu1 %vm11140_vm0, %v12862_v60  ;;  %v7040_v46 = vmul.f32 0.5, %v11092_v31 }
 0x808   :  { %v6745_v44 = vmul.f32 %v6744_v9, %v6739_v63 }
 0x809   :  { %v7044_v45 = vadd.f32 %v7043_v14, %v6885_v33  ;;  %10712 = vmatpush1.bf16.msra.mxu0 %v11643_v59  ;;  %10718 = vmatpush3.bf16.msra.mxu1 %v11648_v61  ;;  %v7041_v25 = vadd.f32 0.5, %v7040_v46 }
 0x80a   :  { %v12588_v2 = vadd.f32 %v11090_v24, %v6745_v44  ;;  %10720 = vmatprep.subr.bf16.mxu0 %v11770_v22  ;;  %10727 = vmatprep.subr.bf16.mxu1 %v12861_v30 }
 0x80b   :  { %11093 = vtanh.f32 %v7044_v45 }
 0x80c   :  { %9115 = vmatmul.mubr.msk.f32.vlgmr.msra.gmra.mrb[54].mxu0 %vm87_vm1, %v12588_v2  ;;  %9946 = vmatmul.mubr.msk.f32.vlgmr.msra.gmra.mrb[94].mxu1 %vm87_vm1, %v12588_v2 }
 0x80d   :  { %10722 = vmatpush1.bf16.msra.mxu0 %v12952_v29  ;;  %10729 = vmatpush3.bf16.msra.mxu1 %v12953_v11 }
 0x80e   :  { %10724 = vmatprep.subr.bf16.mxu0 %v12954_v49  ;;  %10730 = vmatprep.subr.bf16.mxu1 %v12861_v30 }
 0x80f   :  { %7720 = vmatprep.mubr.f32.mxu0 %v12862_v60  ;;  %9956 = vmatprep.mubr.msk.f32.mxu1 %vm11140_vm0, %v12862_v60 }
 0x811   :  { %10726 = vmatpush1.bf16.msra.mxu0 %v12955_v36  ;;  %10732 = vmatpush3.bf16.msra.mxu1 %v12956_v38 }
 0x812   :  { %10734 = vmatprep.subr.bf16.mxu0 %v12957_v43  ;;  %10741 = vmatprep.subr.bf16.mxu1 %v12861_v30 }
 0x814   :  { %9117 = vmatmul.mubr.msk.f32.vlgmr.msra.gmra.mrb[56].mxu0 %vm87_vm1, %v12588_v2  ;;  %9957 = vmatmul.mubr.msk.f32.vlgmr.msra.gmra.mrb[96].mxu1 %vm87_vm1, %v12588_v2 }
 0x815   :  { %v11094_v50 = vpop.eup %11093  ;;  %10736 = vmatpush1.bf16.msra.mxu0 %v12971_v17  ;;  %10743 = vmatpush3.bf16.msra.mxu1 %v12972_v39 }
 0x816   :  { %v7046_v23 = vsub.f32 %v12973_v51, %v11094_v50  ;;  %10738 = vmatprep.subr.bf16.mxu0 %v12974_v8  ;;  %10744 = vmatprep.subr.bf16.mxu1 %v12861_v30 }
 0x817   :  { %7864 = vmatprep.mubr.f32.mxu0 %v12862_v60  ;;  %9967 = vmatprep.mubr.msk.f32.mxu1 %vm11140_vm0, %v12862_v60 }
 0x818   :  { %v7047_v56 = vmul.f32 %v7046_v23, %v7041_v25 }
 0x819   :  { %10740 = vmatpush1.bf16.msra.mxu0 %v12975_v57  ;;  %10746 = vmatpush3.bf16.msra.mxu1 %v12976_v54 }
 0x81a   :  { %v12621_v4 = vadd.f32 %v11094_v50, %v7047_v56  ;;  %10748 = vmatprep.subr.bf16.mxu0 %v11531_v47  ;;  %10755 = vmatprep.subr.bf16.mxu1 %v12861_v30 }
 0x81c   :  { %9119 = vmatmul.mubr.msk.f32.vlgmr.msra.gmra.mrb[56].mxu0 %vm87_vm1, %v12621_v4  ;;  %9968 = vmatmul.mubr.msk.f32.vlgmr.msra.gmra.mrb[98].mxu1 %vm87_vm1, %v12621_v4 }
 0x81d   :  { %10750 = vmatpush1.bf16.msra.mxu0 %v11553_v62  ;;  %10757 = vmatpush3.bf16.msra.mxu1 %v11555_v0 }
 0x81e   :  { %10752 = vmatprep.subr.bf16.mxu0 %v11564_v7  ;;  %10758 = vmatprep.subr.bf16.mxu1 %v12861_v30  ;;  %v12977_v7 = vld [vmem:[#allocation16_spill] sm:$0xff] }
 0x81f   :  { %8025 = vmatprep.mubr.f32.mxu0 %v12862_v60  ;;  %9978 = vmatprep.mubr.msk.f32.mxu1 %vm11140_vm0, %v12862_v60 }
 0x821   :  { %10754 = vmatpush1.bf16.msra.mxu0 %v11587_v20  ;;  %10760 = vmatpush3.bf16.msra.mxu1 %v11589_v26 }
 0x822   :  { %10762 = vmatprep.subr.bf16.mxu0 %v11593_v28  ;;  %10769 = vmatprep.subr.bf16.mxu1 %v12861_v30 }
 0x8bf   :  { %v7189_v47 = vpop.f32.mrb[88].mxu1 }
 0x8c0   :  { %v9914_v62 = vpop.f32.mrb[89].mxu1  ;;  %v7190_v44 = vadd.f32 %v7189_v47, %v11492_v6 }
 0x8cf   :  { %v7262_v0 = vpop.f32.mrb[52].mxu0  ;;  %v7333_v13 = vpop.f32.mrb[90].mxu1 }
 0x8d0   :  { %v10873_v15 = vadd.f32 %v7262_v0, %v12977_v7  ;;  %v7264_v10 = vpop.f32.mrb[53].mxu0  ;;  %v9925_v18 = vpop.f32.mrb[91].mxu1  ;;  %v7347_v33 = vadd.f32 %v12528_v27, %v7333_v13 }
 0x8d1   :  { %v10874_v20 = vadd.f32 %v7264_v10, %v12877_v40  ;;  %v12650_v10 = vld [vmem:[%s12777_s5 + $0x2] ss:$0 sm:$0xff] }
 0x8d2   :  { %v7339_v58 = vmul.f32 0.5, %v10873_v15 }
 0x8d3   :  { %v7343_v1 = vmul.f32 0.5, %v10874_v20 }
 0x8d4   :  { %11095 = vtanh.f32 %v7339_v58 }
 0x8d5   :  { %11097 = vtanh.f32 %v7343_v1 }
 0x8d7   :  { %v7491_v48 = vpop.f32.mrb[92].mxu1 }
 0x8d8   :  { %v9936_v12 = vpop.f32.mrb[93].mxu1  ;;  %v7492_v1 = vadd.f32 %v7491_v48, %v11716_v3 }
 0x8de   :  { %v11096_v26 = vpop.eup %11095 }
 0x8df   :  { %v7341_v37 = vmul.f32 0.5, %v11096_v26  ;;  %v7564_v28 = vpop.f32.mrb[54].mxu0  ;;  %v7635_v24 = vpop.f32.mrb[94].mxu1 }
 0x8e0   :  { %v10875_v16 = vadd.f32 %v7564_v28, %v12878_v52  ;;  %v7566_v34 = vpop.f32.mrb[55].mxu0  ;;  %v9947_v63 = vpop.f32.mrb[95].mxu1  ;;  %v7649_v18 = vadd.f32 %v12650_v10, %v7635_v24 }
 0x8e1   :  { %v7342_v9 = vadd.f32 0.5, %v7341_v37  ;;  %v10876_v50 = vadd.f32 %v7566_v34, %v11690_v32  ;;  %v11098_v25 = vpop.eup %11097 }
 0x8e2   :  { %v7641_v14 = vmul.f32 0.5, %v10875_v16  ;;  %v7345_v56 = vmul.f32 0.5, %v11098_v25 }
 0x8e3   :  { %v7348_v45 = vmul.f32 %v7347_v33, %v7342_v9  ;;  %v7645_v51 = vmul.f32 0.5, %v10876_v50 }
 0x8e4   :  { %11099 = vtanh.f32 %v7641_v14  ;;  %v7346_v58 = vadd.f32 0.5, %v7345_v56 }
 0x8e5   :  { %v7349_v31 = vadd.f32 %v7348_v45, %v7190_v44 }
 0x8e7   :  { %11101 = vtanh.f32 %v7349_v31  ;;  %v7793_v40 = vpop.f32.mrb[96].mxu1 }
 0x8e8   :  { %v9958_v46 = vpop.f32.mrb[97].mxu1  ;;  %11103 = vtanh.f32 %v7645_v51  ;;  %v7794_v44 = vadd.f32 %v7793_v40, %v11997_v19 }
 0x8ee   :  { %v11100_v23 = vpop.eup %11099 }
 0x8ef   :  { %v7643_v62 = vmul.f32 0.5, %v11100_v23  ;;  %v7866_v0 = vpop.f32.mrb[56].mxu0  ;;  %v7937_v7 = vpop.f32.mrb[98].mxu1 }
 0x8f0   :  { %v10877_v27 = vadd.f32 %v7866_v0, %v11944_v55  ;;  %v7868_v13 = vpop.f32.mrb[57].mxu0  ;;  %v9969_v15 = vpop.f32.mrb[99].mxu1  ;;  %v7951_v9 = vadd.f32 %v12446_v35, %v7937_v7 }
 0x8f1   :  { %v11102_v6 = vpop.eup %11101  ;;  %v7644_v47 = vadd.f32 0.5, %v7643_v62  ;;  %v10878_v34 = vadd.f32 %v7868_v13, %v11967_v5 }
 0x8f2   :  { %v7351_v12 = vsub.f32 %v12553_v21, %v11102_v6  ;;  %v7943_v20 = vmul.f32 0.5, %v10877_v27  ;;  %v11104_v21 = vpop.eup %11103 }
 0x8f3   :  { %v7650_v26 = vmul.f32 %v7649_v18, %v7644_v47  ;;  %v7947_v48 = vmul.f32 0.5, %v10878_v34  ;;  %v7647_v63 = vmul.f32 0.5, %v11104_v21 }
 0x8f4   :  { %v7352_v37 = vmul.f32 %v7351_v12, %v7346_v58  ;;  %11105 = vtanh.f32 %v7943_v20 }
 0x8f5   :  { %v7651_v28 = vadd.f32 %v7650_v26, %v7492_v1  ;;  %v7648_v33 = vadd.f32 0.5, %v7647_v63 }
 0x8f6   :  { %v7353_v16 = vadd.f32 %v11102_v6, %v7352_v37 }
 0x8f7   :  { %11107 = vtanh.f32 %v7651_v28 }
 0x8f8   :  { %9121 = vmatmul.mubr.msk.f32.vlgmr.msra.gmra.mrb[58].mxu0 %vm87_vm1, %v7353_v16  ;;  %9979 = vmatmul.mubr.msk.f32.vlgmr.msra.gmra.mrb[100].mxu1 %vm87_vm1, %v7353_v16  ;;  %11109 = vtanh.f32 %v7947_v48 }
 0x8f9   :  { %10764 = vmatpush1.bf16.msra.mxu0 %v11618_v41  ;;  %10771 = vmatpush3.bf16.msra.mxu1 %v11630_v53 }
 0x8fa   :  { %10766 = vmatprep.subr.bf16.mxu0 %v11621_v42  ;;  %10772 = vmatprep.subr.bf16.mxu1 %v12861_v30 }
 0x8fb   :  { %8169 = vmatprep.mubr.f32.mxu0 %v12862_v60  ;;  %9989 = vmatprep.mubr.msk.f32.mxu1 %vm11140_vm0, %v12862_v60 }
 0x8fd   :  { %10768 = vmatpush1.bf16.msra.mxu0 %v11643_v59  ;;  %10774 = vmatpush3.bf16.msra.mxu1 %v11648_v61 }
 0x8fe   :  { %v11106_v24 = vpop.eup %11105  ;;  %10776 = vmatprep.subr.bf16.mxu0 %v11770_v22  ;;  %10783 = vmatprep.subr.bf16.mxu1 %v12861_v30 }
 0x8ff   :  { %v7945_v41 = vmul.f32 0.5, %v11106_v24 }
 0x901   :  { %v11108_v42 = vpop.eup %11107  ;;  %v7946_v53 = vadd.f32 0.5, %v7945_v41 }
 0x902   :  { %v7653_v14 = vsub.f32 %v12588_v2, %v11108_v42  ;;  %v11110_v2 = vpop.eup %11109 }
 0x903   :  { %v7952_v59 = vmul.f32 %v7951_v9, %v7946_v53  ;;  %v7949_v40 = vmul.f32 0.5, %v11110_v2  ;;  %v8872_v2 = vld [vmem:[%s12778_s6 + $0x10] sm:$0xff] }
 0x904   :  { %v7654_v45 = vmul.f32 %v7653_v14, %v7648_v33 }
 0x905   :  { %v7953_v61 = vadd.f32 %v7952_v59, %v7794_v44  ;;  %v7950_v50 = vadd.f32 0.5, %v7949_v40 }
 0x906   :  { %v12672_v31 = vadd.f32 %v11108_v42, %v7654_v45 }
 0x907   :  { %11111 = vtanh.f32 %v7953_v61 }
 0x908   :  { %9123 = vmatmul.mubr.msk.f32.vlgmr.msra.gmra.mrb[58].mxu0 %vm87_vm1, %v12672_v31  ;;  %9990 = vmatmul.mubr.msk.f32.vlgmr.msra.gmra.mrb[102].mxu1 %vm87_vm1, %v12672_v31 }
 0x909   :  { %10778 = vmatpush1.bf16.msra.mxu0 %v12952_v29  ;;  %10785 = vmatpush3.bf16.msra.mxu1 %v12953_v11 }
 0x90a   :  { %10780 = vmatprep.subr.bf16.mxu0 %v12954_v49  ;;  %10786 = vmatprep.subr.bf16.mxu1 %v12861_v30 }
 0x90b   :  { %8327 = vmatprep.mubr.f32.mxu0 %v12862_v60  ;;  %10000 = vmatprep.mubr.msk.f32.mxu1 %vm11140_vm0, %v12862_v60 }
 0x90d   :  { %10782 = vmatpush1.bf16.msra.mxu0 %v12955_v36  ;;  %10788 = vmatpush3.bf16.msra.mxu1 %v12956_v38 }
 0x90e   :  { %10790 = vmatprep.subr.bf16.mxu0 %v12957_v43  ;;  %10797 = vmatprep.subr.bf16.mxu1 %v12861_v30 }
 0x910   :  { %9125 = vmatmul.mubr.msk.f32.vlgmr.msra.gmra.mrb[60].mxu0 %vm87_vm1, %v12672_v31  ;;  %10001 = vmatmul.mubr.msk.f32.vlgmr.msra.gmra.mrb[104].mxu1 %vm87_vm1, %v12672_v31 }
 0x911   :  { %v11112_v46 = vpop.eup %11111  ;;  %10792 = vmatpush1.bf16.msra.mxu0 %v12971_v17  ;;  %10799 = vmatpush3.bf16.msra.mxu1 %v12972_v39 }
 0x912   :  { %v7955_v25 = vsub.f32 %v12621_v4, %v11112_v46  ;;  %10794 = vmatprep.subr.bf16.mxu0 %v12974_v8  ;;  %10800 = vmatprep.subr.bf16.mxu1 %v12861_v30 }
 0x913   :  { %8471 = vmatprep.mubr.f32.mxu0 %v12862_v60  ;;  %10011 = vmatprep.mubr.msk.f32.mxu1 %vm11140_vm0, %v12862_v60 }
 0x914   :  { %v7956_v51 = vmul.f32 %v7955_v25, %v7950_v50 }
 0x915   :  { %10796 = vmatpush1.bf16.msra.mxu0 %v12975_v57  ;;  %10802 = vmatpush3.bf16.msra.mxu1 %v12976_v54 }
 0x916   :  { %v12703_v23 = vadd.f32 %v11112_v46, %v7956_v51  ;;  %10804 = vmatprep.subr.bf16.mxu0 %v11770_v22  ;;  %10811 = vmatprep.subr.bf16.mxu1 %v12861_v30 }
 0x918   :  { %9127 = vmatmul.mubr.msk.f32.vlgmr.msra.gmra.mrb[60].mxu0 %vm87_vm1, %v12703_v23  ;;  %10012 = vmatmul.mubr.msk.f32.vlgmr.msra.gmra.mrb[106].mxu1 %vm87_vm1, %v12703_v23 }
 0x919   :  { %10806 = vmatpush1.bf16.msra.mxu0 %v12952_v29  ;;  %10813 = vmatpush3.bf16.msra.mxu1 %v12953_v11 }
 0x91a   :  { %10808 = vmatprep.subr.bf16.mxu0 %v12954_v49  ;;  %10814 = vmatprep.subr.bf16.mxu1 %v12861_v30 }
 0x91b   :  { %8632 = vmatprep.mubr.f32.mxu0 %v12862_v60  ;;  %10022 = vmatprep.mubr.msk.f32.mxu1 %vm11140_vm0, %v12862_v60 }
 0x91d   :  { %10810 = vmatpush1.bf16.msra.mxu0 %v12955_v36  ;;  %10816 = vmatpush3.bf16.msra.mxu1 %v12956_v38 }
 0x91e   :  { %10818 = vmatprep.subr.bf16.mxu0 %v12957_v43  ;;  %10825 = vmatprep.subr.bf16.mxu1 %v12861_v30 }
 0x9cb   :  { %v8098_v22 = vpop.f32.mrb[100].mxu1 }
 0x9cc   :  { %v9980_v29 = vpop.f32.mrb[101].mxu1  ;;  %v8099_v1 = vadd.f32 %v8098_v22, %v11716_v3 }
 0x9db   :  { %v8171_v11 = vpop.f32.mrb[58].mxu0  ;;  %v8242_v4 = vpop.f32.mrb[102].mxu1 }
 0x9dc   :  { %v10879_v49 = vadd.f32 %v8171_v11, %v12878_v52  ;;  %v8173_v56 = vpop.f32.mrb[59].mxu0  ;;  %v9991_v62 = vpop.f32.mrb[103].mxu1  ;;  %v8256_v52 = vadd.f32 %v12650_v10, %v8242_v4 }
 0x9dd   :  { %v10880_v36 = vadd.f32 %v8173_v56, %v11690_v32 }
 0x9de   :  { %v8248_v0 = vmul.f32 0.5, %v10879_v49 }
 0x9df   :  { %v8252_v13 = vmul.f32 0.5, %v10880_v36 }
 0x9e0   :  { %11113 = vtanh.f32 %v8248_v0 }
 0x9e1   :  { %11115 = vtanh.f32 %v8252_v13 }
 0x9e3   :  { %v8400_v7 = vpop.f32.mrb[104].mxu1 }
 0x9e4   :  { %v10002_v27 = vpop.f32.mrb[105].mxu1  ;;  %v8401_v3 = vadd.f32 %v8400_v7, %v11997_v19 }
 0x9ea   :  { %v11114_v38 = vpop.eup %11113 }
 0x9eb   :  { %v8250_v15 = vmul.f32 0.5, %v11114_v38  ;;  %v8473_v43 = vpop.f32.mrb[60].mxu0  ;;  %v8544_v6 = vpop.f32.mrb[106].mxu1 }
 0x9ec   :  { %v10881_v47 = vadd.f32 %v8473_v43, %v11944_v55  ;;  %v8475_v18 = vpop.f32.mrb[61].mxu0  ;;  %v10013_v58 = vpop.f32.mrb[107].mxu1  ;;  %v8558_v41 = vadd.f32 %v12446_v35, %v8544_v6 }
 0x9ed   :  { %v8251_v12 = vadd.f32 0.5, %v8250_v15  ;;  %v10882_v32 = vadd.f32 %v8475_v18, %v11967_v5  ;;  %v11116_v28 = vpop.eup %11115 }
 0x9ee   :  { %v8550_v20 = vmul.f32 0.5, %v10881_v47  ;;  %v8254_v21 = vmul.f32 0.5, %v11116_v28 }
 0x9ef   :  { %v8257_v26 = vmul.f32 %v8256_v52, %v8251_v12  ;;  %v8554_v16 = vmul.f32 0.5, %v10882_v32 }
 0x9f0   :  { %11117 = vtanh.f32 %v8550_v20  ;;  %v8255_v10 = vadd.f32 0.5, %v8254_v21 }
 0x9f1   :  { %v8258_v37 = vadd.f32 %v8257_v26, %v8099_v1 }
 0x9f3   :  { %11119 = vtanh.f32 %v8258_v37 }
 0x9f4   :  { %11121 = vtanh.f32 %v8554_v16 }
 0x9fa   :  { %v11118_v34 = vpop.eup %11117 }
 0x9fb   :  { %v8552_v48 = vmul.f32 0.5, %v11118_v34 }
 0x9fd   :  { %v11120_v24 = vpop.eup %11119  ;;  %v8553_v63 = vadd.f32 0.5, %v8552_v48 }
 0x9fe   :  { %v8260_v42 = vsub.f32 %v12672_v31, %v11120_v24  ;;  %v11122_v44 = vpop.eup %11121 }
 0x9ff   :  { %v8559_v53 = vmul.f32 %v8558_v41, %v8553_v63  ;;  %v8556_v59 = vmul.f32 0.5, %v11122_v44 }
 0xa00   :  { %v8261_v9 = vmul.f32 %v8260_v42, %v8255_v10 }
 0xa01   :  { %v8560_v33 = vadd.f32 %v8559_v53, %v8401_v3  ;;  %v8557_v45 = vadd.f32 0.5, %v8556_v59 }
 0xa02   :  { %v8262_v14 = vadd.f32 %v11120_v24, %v8261_v9 }
 0xa03   :  { %11123 = vtanh.f32 %v8560_v33 }
 0xa04   :  { %9129 = vmatmul.mubr.msk.f32.vlgmr.msra.gmra.mrb[62].mxu0 %vm87_vm1, %v8262_v14  ;;  %10023 = vmatmul.mubr.msk.f32.vlgmr.msra.gmra.mrb[108].mxu1 %vm87_vm1, %v8262_v14 }
 0xa05   :  { %10820 = vmatpush1.bf16.msra.mxu0 %v12971_v17  ;;  %10827 = vmatpush3.bf16.msra.mxu1 %v12972_v39 }
 0xa06   :  { %10822 = vmatprep.subr.bf16.mxu0 %v12974_v8  ;;  %10828 = vmatprep.subr.bf16.mxu1 %v12861_v30 }
 0xa07   :  { %8776 = vmatprep.mubr.f32.mxu0 %v12862_v60  ;;  %10033 = vmatprep.mubr.msk.f32.mxu1 %vm11140_vm0, %v12862_v60 }
 0xa09   :  { %10824 = vmatpush1.bf16.msra.mxu0 %v12975_v57  ;;  %10830 = vmatpush3.bf16.msra.mxu1 %v12976_v54  ;;  %v8870_v57 = vld [vmem:[%s12778_s6] sm:$0xff]  ;;  %v8871_v54 = vld [vmem:[%s12778_s6 + $0x8] sm:$0xff] }
 0xa0a   :  { %10831 = vmatprep.subr.bf16.mxu0 %v12861_v30  ;;  %v10832_v31 = vpack.c.bf16 %v8871_v54, %v8870_v57 }
 0xa0d   :  { %v11124_v17 = vpop.eup %11123 }
 0xa0e   :  { %v8562_v39 = vsub.f32 %v12703_v23, %v11124_v17 }
 0xa10   :  { %v8563_v8 = vmul.f32 %v8562_v39, %v8557_v45 }
 0xa12   :  { %v8564_v61 = vadd.f32 %v11124_v17, %v8563_v8 }
 0xa14   :  { %9131 = vmatmul.mubr.msk.f32.vlgmr.msra.gmra.mrb[62].mxu0 %vm87_vm1, %v8564_v61  ;;  %10034 = vmatmul.mubr.msk.f32.vlgmr.msra.gmra.mrb[110].mxu1 %vm87_vm1, %v8564_v61 }
 0xa15   :  { %10044 = vmatprep.mubr.msk.f32.mxu0 %vm11140_vm0, %v12862_v60  ;;  %10833 = vmatpush3.bf16.msra.mxu0 %v10832_v31  ;;  %v8873_v60 = vld [vmem:[%s12778_s6 + $0x18] sm:$0xff] }
 0xa16   :  { %10834 = vmatprep.subr.bf16.mxu0 %v12861_v30  ;;  %v10835_v40 = vpack.c.bf16 %v8873_v60, %v8872_v2 }
 0xa19   :  { %10836 = vmatpush3.bf16.msra.mxu0 %v10835_v40 }
 0xad7   :  { %v8705_v46 = vpop.f32.mrb[108].mxu1 }
 0xad8   :  { %v10024_v50 = vpop.f32.mrb[109].mxu1  ;;  %v8706_v7 = vadd.f32 %v8705_v46, %v11997_v19 }
 0xae7   :  { %v8778_v25 = vpop.f32.mrb[62].mxu0  ;;  %v8849_v51 = vpop.f32.mrb[110].mxu1 }
 0xae8   :  { %v10883_v23 = vadd.f32 %v8778_v25, %v11944_v55  ;;  %v8780_v22 = vpop.f32.mrb[63].mxu0  ;;  %v10035_v29 = vpop.f32.mrb[111].mxu1  ;;  %v8863_v0 = vadd.f32 %v12446_v35, %v8849_v51 }
 0xae9   :  { %v10884_v30 = vadd.f32 %v8780_v22, %v11967_v5  ;;  %v9133_v5 = vld [vmem:[%s12779_s7] ss:$0 sm:$0xff] }
 0xaea   :  { %v8855_v11 = vmul.f32 0.5, %v10883_v23 }
 0xaeb   :  { %v8859_v4 = vmul.f32 0.5, %v10884_v30 }
 0xaec   :  { %11125 = vtanh.f32 %v8855_v11 }
 0xaed   :  { %11127 = vtanh.f32 %v8859_v4 }
 0xaf6   :  { %v11126_v49 = vpop.eup %11125 }
 0xaf7   :  { %v8857_v56 = vmul.f32 0.5, %v11126_v49  ;;  %v11128_v13 = vpop.eup %11127 }
 0xaf8   :  { %v8861_v55 = vmul.f32 0.5, %v11128_v13 }
 0xaf9   :  { %v8858_v62 = vadd.f32 0.5, %v8857_v56 }
 0xafa   :  { %v8862_v15 = vadd.f32 0.5, %v8861_v55 }
 0xafb   :  { %v8864_v27 = vmul.f32 %v8863_v0, %v8858_v62 }
 0xafd   :  { %v8865_v36 = vadd.f32 %v8864_v27, %v8706_v7 }
 0xaff   :  { %11129 = vtanh.f32 %v8865_v36 }
 0xb09   :  { %v11130_v38 = vpop.eup %11129 }
 0xb0a   :  { %v8867_v43 = vsub.f32 %v8564_v61, %v11130_v38 }
 0xb0c   :  { %v8868_v6 = vmul.f32 %v8867_v43, %v8862_v15 }
 0xb0e   :  { %v8869_v47 = vadd.f32 %v11130_v38, %v8868_v6 }
 0xb10   :  { %10045 = vmatmul.mubr.msk.f32.vlgmr.msra.gmra.mrb[64].mxu0 %vm87_vm1, %v8869_v47 }
 0xbe3   :  { %v8950_v35 = vpop.f32.mrb[64].mxu0 }
 0xbe4   :  { %v8951_v18 = vadd.f32 %v9133_v5, %v8950_v35  ;;  %v10046_v58 = vpop.f32.mrb[65].mxu0 }
 0xbe6   :  { %8954 = vst [vmem:[%s12780_s8] sm:$0xff] %v8951_v18 }

</bundles_post_ra>
